<compile_context>
chip_gen: v5e
topology: v5e:2x2
jax: 0.10.0
libtpu: 0.0.40
codegen_flags: <defaults>
</compile_context>

<pallas_src>
import functools

import jax
import jax.numpy as jnp
from jax.experimental import pallas as pl
from jax.experimental.pallas import tpu as pltpu

D_IN = 384
D_HID = 768  # kk in the PyTorch module


def mlp_kernel(x_ref, w1_ref, b1_ref, w2_ref, b2_ref, w3_ref, b3_ref, out_ref):
    # bf16 operands into the MXU (weights already stored bf16), f32 accumulate,
    # f32 elementwise math throughout.
    x = x_ref[...].astype(jnp.bfloat16)                                   # [bt, 384]

    # net1 (BN folded into the linear) + ReLU
    a = jnp.dot(x, w1_ref[...], preferred_element_type=jnp.float32) + b1_ref[...]
    a = jnp.maximum(a, 0.0)                                               # [bt, 768] f32

    # net2 (BN folded) + ReLU, residual add
    h = jnp.dot(a.astype(jnp.bfloat16), w2_ref[...],
                preferred_element_type=jnp.float32) + b2_ref[...]
    b = jnp.maximum(h, 0.0) + a                                           # [bt, 768] f32

    # net3 (BN folded, 768 -> 1): VPU multiply + cross-lane reduce (avoids an
    # N=1 MXU matmul), then sigmoid.
    logit = jnp.sum(b * w3_ref[...], axis=-1, keepdims=True) + b3_ref[...]  # [bt, 1]
    out_ref[...] = jax.nn.sigmoid(logit).astype(out_ref.dtype)


def fold_bn_linear(gamma, beta, mean, var, w, bias, eps=1e-5):
    """Fold eval-mode BatchNorm1d followed by Linear into a single Linear.

    Returns (w_folded [out, in], b_folded [out])."""
    s = gamma * jax.lax.rsqrt(var + eps)      # [in]
    t = beta - mean * s                       # [in]
    w_f = w * s[None, :]                      # [out, in]
    b_f = bias + w @ t                        # [out]
    return w_f, b_f


def prepare_params(raw):
    """One-time parameter preparation (do at load time, NOT per call)."""
    (g1, be1, m1, v1, w1, bb1,
     g2, be2, m2, v2, w2, bb2,
     g3, be3, m3, v3, w3, bb3) = raw
    w1f, b1f = fold_bn_linear(g1, be1, m1, v1, w1, bb1)   # [768,384], [768]
    w2f, b2f = fold_bn_linear(g2, be2, m2, v2, w2, bb2)   # [768,768], [768]
    w3f, b3f = fold_bn_linear(g3, be3, m3, v3, w3, bb3)   # [1,768],   [1]
    return (
        jnp.asarray(w1f.T, dtype=jnp.bfloat16),   # [384, 768]  bf16 MXU operand
        b1f.reshape(1, D_HID),                    # [1, 768]    f32
        jnp.asarray(w2f.T, dtype=jnp.bfloat16),   # [768, 768]  bf16 MXU operand
        b2f.reshape(1, D_HID),                    # [1, 768]    f32
        w3f.reshape(1, D_HID),                    # [1, 768]    f32 row vector (VPU)
        b3f.reshape(1, 1),                        # [1, 1]      f32
    )


@functools.partial(jax.jit, static_argnames=("block_b",))
def model_retrieval_forward(x, params, *, block_b=256):
    # block_b=256 targets v6e/v7x (256-row MXU, amortized step overhead);
    # on v5e prefer block_b=128.
    w1t, b1f, w2t, b2f, w3r, b3f = params
    B = x.shape[0]

    # Batch tile: multiple of 8 sublanes, capped at block_b.  No wrapper-side
    # padding: cdiv grid + Pallas masking of the ragged last block (tail rows
    # of the output are simply never valid and the caller only sees [:B]).
    bt = min(block_b, ((B + 7) // 8) * 8)
    grid = (pl.cdiv(B, bt),)

    resident = lambda i: (0, 0)                # weights: DMA once, stay resident
    single = pl.Buffered(buffer_count=1)       # grid-invariant -> no double buffer

    out = pl.pallas_call(
        mlp_kernel,
        out_shape=jax.ShapeDtypeStruct((B, 1), x.dtype),
        grid_spec=pltpu.PrefetchScalarGridSpec(
            num_scalar_prefetch=0,
            grid=grid,
            in_specs=[
                pl.BlockSpec((bt, D_IN), lambda i: (i, 0)),                     # x tile
                pl.BlockSpec((D_IN, D_HID), resident, pipeline_mode=single),    # W1 bf16
                pl.BlockSpec((1, D_HID), resident, pipeline_mode=single),       # b1
                pl.BlockSpec((D_HID, D_HID), resident, pipeline_mode=single),   # W2 bf16
                pl.BlockSpec((1, D_HID), resident, pipeline_mode=single),       # b2
                pl.BlockSpec((1, D_HID), resident, pipeline_mode=single),       # w3 row
                pl.BlockSpec((1, 1), resident, pipeline_mode=single),           # b3
            ],
            out_specs=pl.BlockSpec((bt, 1), lambda i: (i, 0)),
        ),
        compiler_params=pltpu.CompilerParams(
            dimension_semantics=("parallel",)),
    )(x, w1t, b1f, w2t, b2f, w3r, b3f)
    return out


if __name__ == "__main__":
    key = jax.random.PRNGKey(0)
    ks = jax.random.split(key, 8)

    def make_bn(k, n):
        k1, k2, k3, k4 = jax.random.split(k, 4)
        gamma = 1.0 + 0.1 * jax.random.normal(k1, (n,), dtype=jnp.float32)
        beta = 0.1 * jax.random.normal(k2, (n,), dtype=jnp.float32)
        mean = 0.1 * jax.random.normal(k3, (n,), dtype=jnp.float32)
        var = jax.random.uniform(k4, (n,), dtype=jnp.float32, minval=0.5, maxval=1.5)
        return gamma, beta, mean, var

    def make_linear(k, n_in, n_out):
        k1, k2 = jax.random.split(k)
        lim = 1.0 / (n_in ** 0.5)
        w = jax.random.uniform(k1, (n_out, n_in), dtype=jnp.float32, minval=-lim, maxval=lim)
        b = jax.random.uniform(k2, (n_out,), dtype=jnp.float32, minval=-lim, maxval=lim)
        return w, b

    g1, be1, m1, v1 = make_bn(ks[1], D_IN)
    w1, bb1 = make_linear(ks[2], D_IN, D_HID)
    g2, be2, m2, v2 = make_bn(ks[3], D_HID)
    w2, bb2 = make_linear(ks[4], D_HID, D_HID)
    g3, be3, m3, v3 = make_bn(ks[5], D_HID)
    w3, bb3 = make_linear(ks[6], D_HID, 1)

    params = prepare_params((g1, be1, m1, v1, w1, bb1,
                             g2, be2, m2, v2, w2, bb2,
                             g3, be3, m3, v3, w3, bb3))

    # Pure-JAX reference: unfolded eval-mode module.
    def bn_eval(z, gamma, beta, mean, var, eps=1e-5):
        return (z - mean) / jnp.sqrt(var + eps) * gamma + beta

    def reference(xx):
        a_ref = jnp.maximum(bn_eval(xx, g1, be1, m1, v1) @ w1.T + bb1, 0.0)
        b_ref = jnp.maximum(bn_eval(a_ref, g2, be2, m2, v2) @ w2.T + bb2, 0.0) + a_ref
        return jax.nn.sigmoid(bn_eval(b_ref, g3, be3, m3, v3) @ w3.T + bb3)

    # Case 1: tile-aligned batch.
    B = 64
    x = jax.random.normal(ks[0], (B, D_IN), dtype=jnp.float32)
    c = model_retrieval_forward(x, params)
    jax.block_until_ready(c)
    assert c.shape == (B, 1)
    c_ref = reference(x)
    # Tolerance accounts for bf16 MXU operands (same single bf16 pass the
    # default f32 matmul precision already performs); outputs are in (0, 1).
    err = float(jnp.max(jnp.abs(c - c_ref)))
    assert jnp.allclose(c, c_ref, atol=1e-2, rtol=1e-2), f"mismatch (B=64), max err {err}"

    # Case 2: ragged batch (exercises the pad-free masked last block).
    B2 = 52
    x2 = jax.random.normal(ks[7], (B2, D_IN), dtype=jnp.float32)
    c2 = model_retrieval_forward(x2, params)
    jax.block_until_ready(c2)
    assert c2.shape == (B2, 1)
    c2_ref = reference(x2)
    err2 = float(jnp.max(jnp.abs(c2 - c2_ref)))
    assert jnp.allclose(c2, c2_ref, atol=1e-2, rtol=1e-2), f"mismatch (B=52), max err {err2}"

    print("KERNEL_OK")
</pallas_src>

<mosaic_0001>
module attributes {stable_mosaic.version = 11 : i64} {
  func.func @mlp_kernel(%arg0: i32, %arg1: memref<64x384xf32, #tpu.memory_space<vmem>>, %arg2: memref<384x768xbf16, #tpu.memory_space<vmem>>, %arg3: memref<1x768xf32, #tpu.memory_space<vmem>>, %arg4: memref<768x768xbf16, #tpu.memory_space<vmem>>, %arg5: memref<1x768xf32, #tpu.memory_space<vmem>>, %arg6: memref<1x768xf32, #tpu.memory_space<vmem>>, %arg7: memref<1x1xf32, #tpu.memory_space<vmem>>, %arg8: memref<64x1xf32, #tpu.memory_space<vmem>>) attributes {dimension_semantics = [#tpu.dimension_semantics<parallel>], iteration_bounds = array<i64: 1>, scalar_prefetch = 0 : i64, scratch_operands = 0 : i64, tpu.core_type = #tpu.core_type<tc>, window_params = [{transform_indices = @transform_0, window_bounds = array<i64: 64, 384>}, {pipeline_mode = #tpu.pipeline_mode<synchronous>, transform_indices = @transform_1, window_bounds = array<i64: 384, 768>}, {pipeline_mode = #tpu.pipeline_mode<synchronous>, transform_indices = @transform_2, window_bounds = array<i64: 1, 768>}, {pipeline_mode = #tpu.pipeline_mode<synchronous>, transform_indices = @transform_3, window_bounds = array<i64: 768, 768>}, {pipeline_mode = #tpu.pipeline_mode<synchronous>, transform_indices = @transform_4, window_bounds = array<i64: 1, 768>}, {pipeline_mode = #tpu.pipeline_mode<synchronous>, transform_indices = @transform_5, window_bounds = array<i64: 1, 768>}, {pipeline_mode = #tpu.pipeline_mode<synchronous>, transform_indices = @transform_6, window_bounds = array<i64: 1, 1>}, {transform_indices = @transform_7, window_bounds = array<i64: 64, 1>}]} {
    %c0 = arith.constant 0 : index
    %c0_0 = arith.constant 0 : index
    %0 = vector.load %arg1[%c0, %c0_0] : memref<64x384xf32, #tpu.memory_space<vmem>>, vector<64x384xf32>
    %1 = arith.truncf %0 : vector<64x384xf32> to vector<64x384xbf16>
    %c0_1 = arith.constant 0 : index
    %c0_2 = arith.constant 0 : index
    %2 = vector.load %arg2[%c0_1, %c0_2] : memref<384x768xbf16, #tpu.memory_space<vmem>>, vector<384x768xbf16>
    %cst = arith.constant dense<0.000000e+00> : vector<64x768xf32>
    %3 = tpu.matmul %1, %2, %cst {dimension_numbers = #tpu.dot_dimension_numbers<[1], [0], [0], [1], [0, 0, 1, 1], [], []>} : vector<64x384xbf16>, vector<384x768xbf16>, vector<64x768xf32> -> vector<64x768xf32>
    %c0_3 = arith.constant 0 : index
    %c0_4 = arith.constant 0 : index
    %4 = vector.load %arg3[%c0_3, %c0_4] : memref<1x768xf32, #tpu.memory_space<vmem>>, vector<1x768xf32>
    %5 = vector.broadcast %4 : vector<1x768xf32> to vector<64x768xf32>
    %6 = arith.addf %3, %5 : vector<64x768xf32>
    %cst_5 = arith.constant 0.000000e+00 : f32
    %7 = vector.broadcast %cst_5 : f32 to vector<64x768xf32>
    %8 = arith.maximumf %6, %7 : vector<64x768xf32>
    %9 = arith.truncf %8 : vector<64x768xf32> to vector<64x768xbf16>
    %c0_6 = arith.constant 0 : index
    %c0_7 = arith.constant 0 : index
    %10 = vector.load %arg4[%c0_6, %c0_7] : memref<768x768xbf16, #tpu.memory_space<vmem>>, vector<768x768xbf16>
    %cst_8 = arith.constant dense<0.000000e+00> : vector<64x768xf32>
    %11 = tpu.matmul %9, %10, %cst_8 {dimension_numbers = #tpu.dot_dimension_numbers<[1], [0], [0], [1], [0, 0, 1, 1], [], []>} : vector<64x768xbf16>, vector<768x768xbf16>, vector<64x768xf32> -> vector<64x768xf32>
    %c0_9 = arith.constant 0 : index
    %c0_10 = arith.constant 0 : index
    %12 = vector.load %arg5[%c0_9, %c0_10] : memref<1x768xf32, #tpu.memory_space<vmem>>, vector<1x768xf32>
    %13 = vector.broadcast %12 : vector<1x768xf32> to vector<64x768xf32>
    %14 = arith.addf %11, %13 : vector<64x768xf32>
    %cst_11 = arith.constant 0.000000e+00 : f32
    %15 = vector.broadcast %cst_11 : f32 to vector<64x768xf32>
    %16 = arith.maximumf %14, %15 : vector<64x768xf32>
    %17 = arith.addf %16, %8 : vector<64x768xf32>
    %c0_12 = arith.constant 0 : index
    %c0_13 = arith.constant 0 : index
    %18 = vector.load %arg6[%c0_12, %c0_13] : memref<1x768xf32, #tpu.memory_space<vmem>>, vector<1x768xf32>
    %19 = vector.broadcast %18 : vector<1x768xf32> to vector<64x768xf32>
    %20 = arith.mulf %17, %19 : vector<64x768xf32>
    %cst_14 = arith.constant dense<0.000000e+00> : vector<64xf32>
    %21 = vector.multi_reduction <add>, %20, %cst_14 [1] : vector<64x768xf32> to vector<64xf32>
    %22 = vector.shape_cast %21 : vector<64xf32> to vector<64x1xf32>
    %c0_15 = arith.constant 0 : index
    %c0_16 = arith.constant 0 : index
    %23 = vector.load %arg7[%c0_15, %c0_16] : memref<1x1xf32, #tpu.memory_space<vmem>>, vector<1x1xf32>
    %24 = vector.broadcast %23 : vector<1x1xf32> to vector<64x1xf32>
    %25 = arith.addf %22, %24 : vector<64x1xf32>
    %26 = arith.negf %25 : vector<64x1xf32>
    %27 = math.exp %26 : vector<64x1xf32>
    %cst_17 = arith.constant 1.000000e+00 : f32
    %28 = vector.broadcast %cst_17 : f32 to vector<64x1xf32>
    %29 = arith.addf %28, %27 : vector<64x1xf32>
    %30 = arith.divf %28, %29 : vector<64x1xf32>
    %c0_18 = arith.constant 0 : index
    %c0_19 = arith.constant 0 : index
    %31 = vector.load %arg8[%c0_18, %c0_19] : memref<64x1xf32, #tpu.memory_space<vmem>>, vector<64x1xf32>
    tpu.vector_store %arg8[%c0_18, %c0_19], %30 {strides = array<i32>} : memref<64x1xf32, #tpu.memory_space<vmem>>, vector<64x1xf32>,
    return
  }
  func.func @transform_0(%arg0: i32) -> (i32, i32) {
    %c0_i32 = arith.constant 0 : i32
    %c0_i32_0 = arith.constant 0 : i32
    return %arg0, %c0_i32 : i32, i32
  }
  func.func @transform_1(%arg0: i32) -> (i32, i32) {
    %c0_i32 = arith.constant 0 : i32
    %c0_i32_0 = arith.constant 0 : i32
    %c0_i32_1 = arith.constant 0 : i32
    return %c0_i32, %c0_i32_0 : i32, i32
  }
  func.func @transform_2(%arg0: i32) -> (i32, i32) {
    %c0_i32 = arith.constant 0 : i32
    %c0_i32_0 = arith.constant 0 : i32
    %c0_i32_1 = arith.constant 0 : i32
    return %c0_i32, %c0_i32_0 : i32, i32
  }
  func.func @transform_3(%arg0: i32) -> (i32, i32) {
    %c0_i32 = arith.constant 0 : i32
    %c0_i32_0 = arith.constant 0 : i32
    %c0_i32_1 = arith.constant 0 : i32
    return %c0_i32, %c0_i32_0 : i32, i32
  }
  func.func @transform_4(%arg0: i32) -> (i32, i32) {
    %c0_i32 = arith.constant 0 : i32
    %c0_i32_0 = arith.constant 0 : i32
    %c0_i32_1 = arith.constant 0 : i32
    return %c0_i32, %c0_i32_0 : i32, i32
  }
  func.func @transform_5(%arg0: i32) -> (i32, i32) {
    %c0_i32 = arith.constant 0 : i32
    %c0_i32_0 = arith.constant 0 : i32
    %c0_i32_1 = arith.constant 0 : i32
    return %c0_i32, %c0_i32_0 : i32, i32
  }
  func.func @transform_6(%arg0: i32) -> (i32, i32) {
    %c0_i32 = arith.constant 0 : i32
    %c0_i32_0 = arith.constant 0 : i32
    %c0_i32_1 = arith.constant 0 : i32
    return %c0_i32, %c0_i32_0 : i32, i32
  }
  func.func @transform_7(%arg0: i32) -> (i32, i32) {
    %c0_i32 = arith.constant 0 : i32
    %c0_i32_0 = arith.constant 0 : i32
    return %arg0, %c0_i32 : i32, i32
  }
}

</mosaic_0001>

<bundles_post_ra>
// kernel: model_retrieval_forward.1
= control target key start
LH: loop header
LB: loop body
LE: loop exit
PB: predicated region body
PF: predicated region fallthrough
CT: control target
= control target key end

     0   :  { %s8667_s0 = inlined_call_operand.hbm [shape: f32[64,384], index: 0, kind: input, shape index: {}]   ;;  %s8668_s1 = inlined_call_operand.hbm [shape: bf16[384,768], index: 1, kind: input, shape index: {}]   ;;  %s8669_s2 = inlined_call_operand.hbm [shape: f32[1,768], index: 2, kind: input, shape index: {}]   ;;  %s8670_s3 = inlined_call_operand.hbm [shape: bf16[768,768], index: 3, kind: input, shape index: {}]   ;;  %s8671_s4 = inlined_call_operand.hbm [shape: f32[1,768], index: 4, kind: input, shape index: {}]   ;;  %s8672_s5 = inlined_call_operand.hbm [shape: f32[1,768], index: 5, kind: input, shape index: {}]   ;;  %s8673_s6 = inlined_call_operand.<no memory space> [shape: f32[1,1], index: 6, kind: input, shape index: {}]   ;;  %s8674_s7 = inlined_call_operand.vmem [shape: f32[64,1], index: 7, kind: output, shape index: {}]  }
   0x1   :  { %v12_v0 = vstv %s8673_s6 }
   0x2   :  { %13 = vst [vmem:[#allocation2] sm:$0x1] %v12_v0 }
   0x3   :  { %14 = vsyncpa [#allocation4], 0 }
   0x4   :  { %15 = vsyncpa [#allocation6], 0 }
   0x5   :  { %16 = vsyncpa [#allocation9], 0 }
   0x6   :  { %17 = vsyncpa [#allocation12], 0  ;;  %s35_s28 = sshll.u32 %s8668_s1, 4  ;;  %s7186_s29 = smov [#allocation5]   ;;  %s36_s28 = int_to_ptr.hbm [resolvable:$true] %s35_s28 }
   0x7   :  { %s37_s30 = sshll.u32 %s7186_s29, 4  ;;  %s59_s10 = sshll.u32 %s8670_s3, 4  ;;  %s38_s30 = int_to_ptr.vmem [resolvable:$true] %s37_s30  ;;  %s60_s10 = int_to_ptr.hbm [resolvable:$true] %s59_s10 }
   0x8   :  { %s7187_s11 = smov 384   ;;  %s7188_s12 = smov 24  }
   0x9   :  { %43 = dma.hbm_to_vmem [thread:$0]  %s36_s28, 18432, %s38_s30, [#allocation6], %s7187_s11, %s7187_s11, %s7188_s12  }
   0xa   :  { %s7189_s6 = smov [#allocation8]   ;;  %s22_s16 = sshll.u32 %s8667_s0, 4  ;;  %s23_s16 = int_to_ptr.hbm [resolvable:$true] %s22_s16 }
   0xb   :  { %s61_s13 = sshll.u32 %s7189_s6, 4  ;;  %s49_s18 = sshll.u32 %s8669_s2, 4  ;;  %s62_s13 = int_to_ptr.vmem [resolvable:$true] %s61_s13  ;;  %s50_s18 = int_to_ptr.hbm [resolvable:$true] %s49_s18 }
   0xc   :  { %67 = dma.hbm_to_vmem [thread:$0]  %s60_s10, 36864, %s62_s13, [#allocation9], %s7187_s11, %s7187_s11, %s7188_s12  }
   0xd   :  { %s7190_s19 = smov [#allocation3]   ;;  %s7191_s3 = smov [#allocation7]  }
   0xe   :  { %s24_s20 = sshll.u32 %s7190_s19, 4  ;;  %s51_s21 = sshll.u32 %s7191_s3, 4  ;;  %s25_s20 = int_to_ptr.vmem [resolvable:$true] %s24_s20  ;;  %s52_s21 = int_to_ptr.vmem [resolvable:$true] %s51_s21 }
   0xf   :  { %30 = dma.hbm_to_vmem [thread:$0]  %s23_s16, 3072, %s25_s20, [#allocation4], %s7187_s11, %s7187_s11, %s7188_s12  }
  0x10   :  { %s73_s24 = sshll.u32 %s8671_s4, 4  ;;  %s84_s26 = sshll.u32 %s8672_s5, 4  ;;  %s74_s24 = int_to_ptr.hbm [resolvable:$true] %s73_s24  ;;  %s85_s26 = int_to_ptr.hbm [resolvable:$true] %s84_s26 }
  0x11   :  { %54 = dma.hbm_to_vmem [thread:$0]  %s50_s18, 96, %s52_s21, [#allocation6]  }
  0x12   :  { %s7192_s27 = smov [#allocation10]   ;;  %s7193_s28 = smov [#allocation11]  }
  0x13   :  { %s75_s2 = sshll.u32 %s7192_s27, 4  ;;  %s86_s29 = sshll.u32 %s7193_s28, 4  ;;  %s76_s2 = int_to_ptr.vmem [resolvable:$true] %s75_s2  ;;  %s87_s29 = int_to_ptr.vmem [resolvable:$true] %s86_s29 }
  0x14   :  { %78 = dma.hbm_to_vmem [thread:$0]  %s74_s24, 96, %s76_s2, [#allocation9]  }
  0x15   :  { %89 = dma.hbm_to_vmem [thread:$0]  %s85_s26, 96, %s87_s29, [#allocation12]  }
  0x16   :  { %7178 = dma.done.wait [#allocation4], 3072  }
  0x17   :  { %7179 = vsyncadd [#allocation4], 4294964224 }
  0x18   :  { %7180 = dma.done.wait [#allocation6], 18528  }
  0x19   :  { %7181 = vsyncadd [#allocation6], 4294948768 }
  0x1a   :  { %7182 = dma.done.wait [#allocation9], 36960  }
  0x1b   :  { %7183 = vsyncadd [#allocation9], 4294930336 }
  0x1c   :  { %7184 = dma.done.wait [#allocation12], 96  }
  0x1d   :  { %7185 = vsyncadd [#allocation12], 4294967200  ;;  %v4975_v1 = vld [vmem:[#allocation5 + $0x150] sm:$0xf]  ;;  %v6586_v2 = vld [vmem:[#allocation5 + $0x164] sm:$0xf0] }
  0x1e   :  { %v5167_v3 = vld [vmem:[#allocation5 + $0x2d0] sm:$0xf]  ;;  %v4976_v4 = vor.u32 %v6586_v2, %v4975_v1  ;;  %v6634_v5 = vld [vmem:[#allocation5 + $0x2e4] sm:$0xf0]  ;;  %v4951_v6 = vld [vmem:[#allocation5 + $0x120] sm:$0xf] }
  0x1f   :  { %v6580_v7 = vld [vmem:[#allocation5 + $0x134] sm:$0xf0]  ;;  %v5168_v8 = vor.u32 %v6634_v5, %v5167_v3  ;;  %v5143_v9 = vld [vmem:[#allocation5 + $0x2a0] sm:$0xf]  ;;  %v4927_v13 = vld [vmem:[#allocation5 + $0xf0] sm:$0xf] }
  0x20   :  { %v6628_v10 = vld [vmem:[#allocation5 + $0x2b4] sm:$0xf0]  ;;  %1030 = vmatpush.bf16.msra.mxu0 %v4976_v4  ;;  %6973 = vmatpush.bf16.msra.mxu2 %v4976_v4  ;;  %v4952_v11 = vor.u32 %v6580_v7, %v4951_v6  ;;  %v6574_v14 = vld [vmem:[#allocation5 + $0x104] sm:$0xf0]  ;;  %v5119_v15 = vld [vmem:[#allocation5 + $0x270] sm:$0xf] }
  0x21   :  { %6981 = vmatpush.bf16.msra.mxu3 %v5168_v8  ;;  %1059 = vmatpush.bf16.msra.mxu1 %v5168_v8  ;;  %v5144_v12 = vor.u32 %v6628_v10, %v5143_v9  ;;  %v6622_v16 = vld [vmem:[#allocation5 + $0x284] sm:$0xf0]  ;;  %v4928_v17 = vor.u32 %v6574_v14, %v4927_v13  ;;  %v4903_v19 = vld [vmem:[#allocation5 + $0xc0] sm:$0xf]  ;;  %v6568_v20 = vld [vmem:[#allocation5 + $0xd4] sm:$0xf0] }
  0x22   :  { %v5120_v18 = vor.u32 %v6622_v16, %v5119_v15  ;;  %v5095_v21 = vld [vmem:[#allocation5 + $0x240] sm:$0xf]  ;;  %v6616_v22 = vld [vmem:[#allocation5 + $0x254] sm:$0xf0]  ;;  %v4904_v23 = vor.u32 %v6568_v20, %v4903_v19  ;;  %v4879_v25 = vld [vmem:[#allocation5 + $0x90] sm:$0xf] }
  0x23   :  { %v5096_v24 = vor.u32 %v6616_v22, %v5095_v21  ;;  %v6562_v26 = vld [vmem:[#allocation5 + $0xa4] sm:$0xf0]  ;;  %v5071_v27 = vld [vmem:[#allocation5 + $0x210] sm:$0xf]  ;;  %v4855_v31 = vld [vmem:[#allocation5 + $0x60] sm:$0xf] }
  0x24   :  { %1031 = vmatpush.bf16.msra.mxu0 %v4952_v11  ;;  %6974 = vmatpush.bf16.msra.mxu2 %v4952_v11  ;;  %v6610_v28 = vld [vmem:[#allocation5 + $0x224] sm:$0xf0]  ;;  %v4880_v29 = vor.u32 %v6562_v26, %v4879_v25  ;;  %v6556_v32 = vld [vmem:[#allocation5 + $0x74] sm:$0xf0]  ;;  %v5047_v33 = vld [vmem:[#allocation5 + $0x1e0] sm:$0xf] }
  0x25   :  { %6982 = vmatpush.bf16.msra.mxu3 %v5144_v12  ;;  %1060 = vmatpush.bf16.msra.mxu1 %v5144_v12  ;;  %v5072_v30 = vor.u32 %v6610_v28, %v5071_v27  ;;  %v6604_v34 = vld [vmem:[#allocation5 + $0x1f4] sm:$0xf0]  ;;  %v4856_v35 = vor.u32 %v6556_v32, %v4855_v31  ;;  %v4831_v37 = vld [vmem:[#allocation5 + $0x30] sm:$0xf]  ;;  %v6550_v38 = vld [vmem:[#allocation5 + $0x44] sm:$0xf0] }
  0x26   :  { %v5048_v36 = vor.u32 %v6604_v34, %v5047_v33  ;;  %v5023_v39 = vld [vmem:[#allocation5 + $0x1b0] sm:$0xf]  ;;  %v6598_v40 = vld [vmem:[#allocation5 + $0x1c4] sm:$0xf0]  ;;  %v4832_v41 = vor.u32 %v6550_v38, %v4831_v37  ;;  %v4807_v42 = vld [vmem:[#allocation5] sm:$0xf] }
  0x27   :  { %v5024_v43 = vor.u32 %v6598_v40, %v5023_v39  ;;  %v6544_v44 = vld [vmem:[#allocation5 + $0x14] sm:$0xf0]  ;;  %v4999_v45 = vld [vmem:[#allocation5 + $0x180] sm:$0xf]  ;;  %v6583_v49 = vld [vmem:[#allocation5 + $0x154] sm:$0xf] }
  0x28   :  { %1032 = vmatpush.bf16.msra.mxu0 %v4928_v17  ;;  %6975 = vmatpush.bf16.msra.mxu2 %v4928_v17  ;;  %v6592_v46 = vld [vmem:[#allocation5 + $0x194] sm:$0xf0]  ;;  %v116_v47 = vld [vmem:[#allocation3] sm:$0xff]  ;;  %v4977_v50 = vld [vmem:[#allocation5 + $0x168] sm:$0xf0]  ;;  %v4808_v53 = vor.u32 %v6544_v44, %v4807_v42  ;;  %vm4788_vm2 = vcmask 7168  }
  0x29   :  { %6983 = vmatpush.bf16.msra.mxu3 %v5120_v18  ;;  %1061 = vmatpush.bf16.msra.mxu1 %v5120_v18  ;;  %v119_v48 = vld [vmem:[#allocation3 + $0x18] sm:$0xff]  ;;  %v5359_v51 = vld [vmem:[#allocation5 + $0x450] sm:$0xf]  ;;  %v6682_v52 = vld [vmem:[#allocation5 + $0x464] sm:$0xf0]  ;;  %v5000_v57 = vor.u32 %v6592_v46, %v4999_v45  ;;  %v4980_v61 = vor.u32 %v6583_v49, %v4977_v50 }
  0x2a   :  { %v128_v54 = vld [vmem:[#allocation3 + $0x60] sm:$0xff]  ;;  %v131_v55 = vld [vmem:[#allocation3 + $0x78] sm:$0xff]  ;;  %v129_v56 = vld [vmem:[#allocation3 + $0x68] sm:$0xff]  ;;  %v5360_v62 = vor.u32 %v6682_v52, %v5359_v51  ;;  %v7255_v2 = vpack.c.bf16 %v119_v48, %v116_v47 }
  0x2b   :  { %v132_v58 = vld [vmem:[#allocation3 + $0x80] sm:$0xff]  ;;  %v6631_v59 = vld [vmem:[#allocation5 + $0x2d4] sm:$0xf]  ;;  %v5169_v60 = vld [vmem:[#allocation5 + $0x2e8] sm:$0xf0]  ;;  %v7257_v3 = vpack.c.bf16 %v131_v55, %v128_v54 }
  0x2c   :  { %1033 = vmatpush.bf16.msra.mxu0 %v4904_v23  ;;  %6976 = vmatpush.bf16.msra.mxu2 %v4904_v23  ;;  %v117_v63 = vld [vmem:[#allocation3 + $0x8] sm:$0xff]  ;;  %v120_v0 = vld [vmem:[#allocation3 + $0x20] sm:$0xff]  ;;  %v6679_v1 = vld [vmem:[#allocation5 + $0x454] sm:$0xf]  ;;  %v7259_v7 = vpack.c.bf16 %v132_v58, %v129_v56  ;;  %v5172_v8 = vor.u32 %v6631_v59, %v5169_v60 }
  0x2d   :  { %6984 = vmatpush.bf16.msra.mxu3 %v5096_v24  ;;  %1062 = vmatpush.bf16.msra.mxu1 %v5096_v24  ;;  %v5361_v4 = vld [vmem:[#allocation5 + $0x468] sm:$0xf0]  ;;  %v6577_v5 = vld [vmem:[#allocation5 + $0x124] sm:$0xf]  ;;  %v4953_v6 = vld [vmem:[#allocation5 + $0x138] sm:$0xf0]  ;;  %v7261_v11 = vpack.c.bf16 %v120_v0, %v117_v63 }
  0x2e   :  { %v5335_v9 = vld [vmem:[#allocation5 + $0x420] sm:$0xf]  ;;  %v6676_v10 = vld [vmem:[#allocation5 + $0x434] sm:$0xf0]  ;;  %v6625_v12 = vld [vmem:[#allocation5 + $0x2a4] sm:$0xf]  ;;  %v5364_v14 = vor.u32 %v6679_v1, %v5361_v4  ;;  %v4956_v15 = vor.u32 %v6577_v5, %v4953_v6 }
  0x2f   :  { %v5145_v13 = vld [vmem:[#allocation5 + $0x2b8] sm:$0xf0]  ;;  %v6673_v16 = vld [vmem:[#allocation5 + $0x424] sm:$0xf]  ;;  %v5336_v17 = vor.u32 %v6676_v10, %v5335_v9  ;;  %v6571_v19 = vld [vmem:[#allocation5 + $0xf4] sm:$0xf] }
  0x30   :  { %1034 = vmatpush.bf16.msra.mxu0 %v4880_v29  ;;  %6977 = vmatpush.bf16.msra.mxu2 %v4880_v29  ;;  %v5337_v18 = vld [vmem:[#allocation5 + $0x438] sm:$0xf0]  ;;  %v4929_v20 = vld [vmem:[#allocation5 + $0x108] sm:$0xf0]  ;;  %v5148_v21 = vor.u32 %v6625_v12, %v5145_v13  ;;  %v5311_v22 = vld [vmem:[#allocation5 + $0x3f0] sm:$0xf] }
  0x31   :  { %6985 = vmatpush.bf16.msra.mxu3 %v5072_v30  ;;  %1063 = vmatpush.bf16.msra.mxu1 %v5072_v30  ;;  %v6670_v23 = vld [vmem:[#allocation5 + $0x404] sm:$0xf0]  ;;  %v6619_v24 = vld [vmem:[#allocation5 + $0x274] sm:$0xf]  ;;  %v5121_v25 = vld [vmem:[#allocation5 + $0x288] sm:$0xf0]  ;;  %v5340_v26 = vor.u32 %v6673_v16, %v5337_v18  ;;  %v4932_v27 = vor.u32 %v6571_v19, %v4929_v20 }
  0x32   :  { %v6667_v28 = vld [vmem:[#allocation5 + $0x3f4] sm:$0xf]  ;;  %v5312_v29 = vor.u32 %v6670_v23, %v5311_v22  ;;  %v5313_v30 = vld [vmem:[#allocation5 + $0x408] sm:$0xf0]  ;;  %v6565_v31 = vld [vmem:[#allocation5 + $0xc4] sm:$0xf]  ;;  %v5124_v33 = vor.u32 %v6619_v24, %v5121_v25 }
  0x33   :  { %v4905_v32 = vld [vmem:[#allocation5 + $0xd8] sm:$0xf0]  ;;  %v5287_v34 = vld [vmem:[#allocation5 + $0x3c0] sm:$0xf]  ;;  %v6661_v38 = vld [vmem:[#allocation5 + $0x3c4] sm:$0xf]  ;;  %v5316_v40 = vor.u32 %v6667_v28, %v5313_v30 }
  0x34   :  { %1035 = vmatpush.bf16.msra.mxu0 %v4856_v35  ;;  %6978 = vmatpush.bf16.msra.mxu2 %v4856_v35  ;;  %v6664_v35 = vld [vmem:[#allocation5 + $0x3d4] sm:$0xf0]  ;;  %v5097_v37 = vld [vmem:[#allocation5 + $0x258] sm:$0xf0]  ;;  %v122_v42 = vld [vmem:[#allocation3 + $0x30] sm:$0xff] }
  0x35   :  { %6986 = vmatpush.bf16.msra.mxu3 %v5048_v36  ;;  %1064 = vmatpush.bf16.msra.mxu1 %v5048_v36  ;;  %v6613_v36 = vld [vmem:[#allocation5 + $0x244] sm:$0xf]  ;;  %v5289_v39 = vld [vmem:[#allocation5 + $0x3d8] sm:$0xf0]  ;;  %v134_v44 = vld [vmem:[#allocation3 + $0x90] sm:$0xff]  ;;  %v5288_v46 = vor.u32 %v6664_v35, %v5287_v34 }
  0x36   :  { %v137_v45 = vld [vmem:[#allocation3 + $0xa8] sm:$0xff]  ;;  %v6559_v47 = vld [vmem:[#allocation5 + $0x94] sm:$0xf]  ;;  %v5100_v49 = vor.u32 %v6613_v36, %v5097_v37  ;;  %v135_v50 = vld [vmem:[#allocation3 + $0x98] sm:$0xff]  ;;  %v5292_v56 = vor.u32 %v6661_v38, %v5289_v39 }
  0x37   :  { %v4881_v48 = vld [vmem:[#allocation5 + $0xa8] sm:$0xf0]  ;;  %v138_v51 = vld [vmem:[#allocation3 + $0xb0] sm:$0xff]  ;;  %v123_v58 = vld [vmem:[#allocation3 + $0x38] sm:$0xff] }
  0x38   :  { %1036 = vmatpush.bf16.msra.mxu0 %v4832_v41  ;;  %6979 = vmatpush.bf16.msra.mxu2 %v4832_v41  ;;  %v4908_v41 = vor.u32 %v6565_v31, %v4905_v32  ;;  %v5263_v52 = vld [vmem:[#allocation5 + $0x390] sm:$0xf]  ;;  %v6607_v54 = vld [vmem:[#allocation5 + $0x214] sm:$0xf]  ;;  %v5073_v55 = vld [vmem:[#allocation5 + $0x228] sm:$0xf0]  ;;  %v7271_v4 = vpack.c.bf16 %v138_v51, %v135_v50 }
  0x39   :  { %6987 = vmatpush.bf16.msra.mxu3 %v5024_v43  ;;  %1065 = vmatpush.bf16.msra.mxu1 %v5024_v43  ;;  %v125_v43 = vld [vmem:[#allocation3 + $0x48] sm:$0xff]  ;;  %v126_v59 = vld [vmem:[#allocation3 + $0x50] sm:$0xff]  ;;  %v6553_v0 = vld [vmem:[#allocation5 + $0x64] sm:$0xf]  ;;  %v5076_v6 = vor.u32 %v6607_v54, %v5073_v55 }
  0x3a   :  { %v6655_v60 = vld [vmem:[#allocation5 + $0x394] sm:$0xf]  ;;  %v5265_v63 = vld [vmem:[#allocation5 + $0x3a8] sm:$0xf0]  ;;  %v4857_v1 = vld [vmem:[#allocation5 + $0x78] sm:$0xf0] }
  0x3b   :  { %v5239_v9 = vld [vmem:[#allocation5 + $0x360] sm:$0xf]  ;;  %v6652_v10 = vld [vmem:[#allocation5 + $0x374] sm:$0xf0]  ;;  %v5268_v12 = vor.u32 %v6655_v60, %v5265_v63  ;;  %v4860_v13 = vor.u32 %v6553_v0, %v4857_v1  ;;  %v6649_v16 = vld [vmem:[#allocation5 + $0x364] sm:$0xf] }
  0x3c   :  { %1037 = vmatpush.bf16.msra.mxu0 %v4808_v53  ;;  %6980 = vmatpush.bf16.msra.mxu2 %v4808_v53  ;;  %v6658_v53 = vld [vmem:[#allocation5 + $0x3a4] sm:$0xf0]  ;;  %v6547_v18 = vld [vmem:[#allocation5 + $0x34] sm:$0xf]  ;;  %v4833_v19 = vld [vmem:[#allocation5 + $0x48] sm:$0xf0]  ;;  %v5240_v20 = vor.u32 %v6652_v10, %v5239_v9 }
  0x3d   :  { %6988 = vmatpush.bf16.msra.mxu3 %v5000_v57  ;;  %1066 = vmatpush.bf16.msra.mxu1 %v5000_v57  ;;  %v4884_v57 = vor.u32 %v6559_v47, %v4881_v48  ;;  %v5264_v5 = vor.u32 %v6658_v53, %v5263_v52  ;;  %v5215_v22 = vld [vmem:[#allocation5 + $0x330] sm:$0xf]  ;;  %v6646_v23 = vld [vmem:[#allocation5 + $0x344] sm:$0xf0]  ;;  %v6595_v24 = vld [vmem:[#allocation5 + $0x1b4] sm:$0xf] }
  0x3e   :  { %v6643_v28 = vld [vmem:[#allocation5 + $0x334] sm:$0xf]  ;;  %v6541_v30 = vld [vmem:[#allocation5 + $0x4] sm:$0xf]  ;;  %v4809_v31 = vld [vmem:[#allocation5 + $0x18] sm:$0xf0] }
  0x3f   :  { %1038 = vmatmul.bf16.vlgmr.msra.gmra.mxu0 %v7255_v2  ;;  %1048 = vmatmul.bf16.vlgmr.msra.gmra.mxu2 %v7257_v3  ;;  %v5191_v32 = vld [vmem:[#allocation5 + $0x300] sm:$0xf]  ;;  %v6640_v34 = vld [vmem:[#allocation5 + $0x314] sm:$0xf0]  ;;  %v6635_v36 = vld [vmem:[#allocation5 + $0x2ec] sm:$0xf0] }
  0x40   :  { %1088 = vmatpush.bf16.msrb.mxu2 %v5360_v62  ;;  %1077 = vmatmul.bf16.vlgmr.msra.gmra.mxu3 %v7259_v7  ;;  %v7269_v62 = vpack.c.bf16 %v137_v45, %v134_v44  ;;  %v5175_v35 = vld [vmem:[#allocation5 + $0x2d8] sm:$0xf]  ;;  %v6589_v38 = vld [vmem:[#allocation5 + $0x184] sm:$0xf]  ;;  %v5001_v39 = vld [vmem:[#allocation5 + $0x198] sm:$0xf0]  ;;  %v5192_v50 = vor.u32 %v6640_v34, %v5191_v32 }
  0x41   :  { %1117 = vmatpush.bf16.msrb.mxu3 %v4980_v61  ;;  %1146 = vmatpush.bf16.msrb.mxu0 %v5172_v8  ;;  %v7267_v61 = vpack.c.bf16 %v125_v43, %v122_v42  ;;  %v7273_v8 = vpack.c.bf16 %v126_v59, %v123_v58  ;;  %v4812_v42 = vor.u32 %v6541_v30, %v4809_v31  ;;  %v5193_v43 = vld [vmem:[#allocation5 + $0x318] sm:$0xf0]  ;;  %v4983_v44 = vld [vmem:[#allocation5 + $0x158] sm:$0xf]  ;;  %v6587_v45 = vld [vmem:[#allocation5 + $0x16c] sm:$0xf0] }
  0x42   :  { %1067 = vmatmul.bf16.vlgmr.msra.gmra.mxu1 %v7261_v11  ;;  %v5176_v47 = vor.u32 %v6635_v36, %v5175_v35  ;;  %v5367_v48 = vld [vmem:[#allocation5 + $0x458] sm:$0xf]  ;;  %v121_v51 = vld [vmem:[#allocation3 + $0x28] sm:$0xff]  ;;  %v6629_v53 = vld [vmem:[#allocation5 + $0x2bc] sm:$0xf0]  ;;  %v5004_v54 = vor.u32 %v6589_v38, %v5001_v39  ;;  %v4984_v55 = vor.u32 %v6587_v45, %v4983_v44 }
  0x43   :  { %1175 = vmatpush.bf16.msrb.mxu1 %v5364_v14  ;;  %v6601_v14 = vld [vmem:[#allocation5 + $0x1e4] sm:$0xf]  ;;  %v5151_v52 = vld [vmem:[#allocation5 + $0x2a8] sm:$0xf]  ;;  %v6581_v59 = vld [vmem:[#allocation5 + $0x13c] sm:$0xf0] }
  0x44   :  { %1089 = vmatpush.bf16.msrb.mxu2 %v5336_v17  ;;  %v5241_v17 = vld [vmem:[#allocation5 + $0x378] sm:$0xf0]  ;;  %v4959_v58 = vld [vmem:[#allocation5 + $0x128] sm:$0xf]  ;;  %v5152_v0 = vor.u32 %v6629_v53, %v5151_v52  ;;  %v4985_v1 = vld [vmem:[#allocation5 + $0x170] sm:$0xf0] }
  0x45   :  { %1118 = vmatpush.bf16.msrb.mxu3 %v4956_v15  ;;  %1147 = vmatpush.bf16.msrb.mxu0 %v5148_v21  ;;  %v5049_v15 = vld [vmem:[#allocation5 + $0x1f8] sm:$0xf0]  ;;  %v5244_v25 = vor.u32 %v6649_v16, %v5241_v17  ;;  %v5127_v9 = vld [vmem:[#allocation5 + $0x278] sm:$0xf]  ;;  %v6623_v10 = vld [vmem:[#allocation5 + $0x28c] sm:$0xf0] }
  0x46   :  { %v5052_v21 = vor.u32 %v6601_v14, %v5049_v15  ;;  %v6584_v60 = vld [vmem:[#allocation5 + $0x15c] sm:$0xf]  ;;  %v4935_v15 = vld [vmem:[#allocation5 + $0xf8] sm:$0xf]  ;;  %v6575_v16 = vld [vmem:[#allocation5 + $0x10c] sm:$0xf0] }
  0x47   :  { %1176 = vmatpush.bf16.msrb.mxu1 %v5340_v26  ;;  %v4836_v26 = vor.u32 %v6547_v18, %v4833_v19  ;;  %v6578_v17 = vld [vmem:[#allocation5 + $0x12c] sm:$0xf]  ;;  %v5128_v18 = vor.u32 %v6623_v10, %v5127_v9  ;;  %v4961_v19 = vld [vmem:[#allocation5 + $0x140] sm:$0xf0]  ;;  %v4937_v31 = vld [vmem:[#allocation5 + $0x110] sm:$0xf0] }
  0x48   :  { %1090 = vmatpush.bf16.msrb.mxu2 %v5312_v29  ;;  %v5217_v29 = vld [vmem:[#allocation5 + $0x348] sm:$0xf0]  ;;  %v5295_v32 = vld [vmem:[#allocation5 + $0x3c8] sm:$0xf]  ;;  %v5079_v34 = vld [vmem:[#allocation5 + $0x218] sm:$0xf] }
  0x49   :  { %1119 = vmatpush.bf16.msrb.mxu3 %v4932_v27  ;;  %1148 = vmatpush.bf16.msrb.mxu0 %v5124_v33  ;;  %v5025_v27 = vld [vmem:[#allocation5 + $0x1c8] sm:$0xf0]  ;;  %v5216_v33 = vor.u32 %v6646_v23, %v5215_v22  ;;  %v5103_v22 = vld [vmem:[#allocation5 + $0x248] sm:$0xf]  ;;  %v6617_v23 = vld [vmem:[#allocation5 + $0x25c] sm:$0xf0] }
  0x4a   :  { %v5028_v37 = vor.u32 %v6595_v24, %v5025_v27  ;;  %v4936_v24 = vor.u32 %v6575_v16, %v4935_v15  ;;  %v4911_v27 = vld [vmem:[#allocation5 + $0xc8] sm:$0xf]  ;;  %v5104_v30 = vor.u32 %v6617_v23, %v5103_v22  ;;  %v6611_v35 = vld [vmem:[#allocation5 + $0x22c] sm:$0xf0]  ;;  %v4913_v44 = vld [vmem:[#allocation5 + $0xe0] sm:$0xf0] }
  0x4b   :  { %1177 = vmatpush.bf16.msrb.mxu1 %v5316_v40  ;;  %v6637_v40 = vld [vmem:[#allocation5 + $0x304] sm:$0xf]  ;;  %v5271_v45 = vld [vmem:[#allocation5 + $0x398] sm:$0xf]  ;;  %v4863_v53 = vld [vmem:[#allocation5 + $0x68] sm:$0xf] }
  0x4c   :  { %1091 = vmatpush.bf16.msrb.mxu2 %v5288_v46  ;;  %v118_v46 = vld [vmem:[#allocation3 + $0x10] sm:$0xff]  ;;  %v6653_v9 = vld [vmem:[#allocation5 + $0x37c] sm:$0xf0]  ;;  %v4839_v10 = vld [vmem:[#allocation5 + $0x38] sm:$0xf] }
  0x4d   :  { %1120 = vmatpush.bf16.msrb.mxu3 %v4908_v41  ;;  %1149 = vmatpush.bf16.msrb.mxu0 %v5100_v49  ;;  %v5220_v41 = vor.u32 %v6643_v28, %v5217_v29  ;;  %v6683_v49 = vld [vmem:[#allocation5 + $0x46c] sm:$0xf0]  ;;  %v7279_v63 = vpack.c.bf16 %v121_v51, %v118_v46  ;;  %v6569_v28 = vld [vmem:[#allocation5 + $0xdc] sm:$0xf0]  ;;  %v6572_v29 = vld [vmem:[#allocation5 + $0xfc] sm:$0xf] }
  0x4e   :  { %v4912_v36 = vor.u32 %v6569_v28, %v4911_v27  ;;  %v4940_v38 = vor.u32 %v6572_v29, %v4937_v31  ;;  %v6659_v46 = vld [vmem:[#allocation5 + $0x3ac] sm:$0xf0]  ;;  %v6554_v15 = vld [vmem:[#allocation5 + $0x6c] sm:$0xf]  ;;  %v4865_v16 = vld [vmem:[#allocation5 + $0x80] sm:$0xf0] }
  0x4f   :  { %1178 = vmatpush.bf16.msrb.mxu1 %v5292_v56  ;;  %1043 = vmatmul.bf16.gmra.mxu0 %v7267_v61  ;;  %v5196_v56 = vor.u32 %v6637_v40, %v5193_v43  ;;  %v4887_v40 = vld [vmem:[#allocation5 + $0x98] sm:$0xf]  ;;  %v5080_v43 = vor.u32 %v6611_v35, %v5079_v34  ;;  %v5272_v52 = vor.u32 %v6659_v46, %v5271_v45  ;;  %v4841_v28 = vld [vmem:[#allocation5 + $0x50] sm:$0xf0]  ;;  %v5199_v29 = vld [vmem:[#allocation5 + $0x308] sm:$0xf] }
  0x50   :  { %1053 = vmatmul.bf16.gmra.mxu2 %v7269_v62  ;;  %1082 = vmatmul.bf16.gmra.mxu3 %v7271_v4  ;;  %v130_v34 = vld [vmem:[#allocation3 + $0x70] sm:$0xff]  ;;  %v133_v35 = vld [vmem:[#allocation3 + $0x88] sm:$0xff]  ;;  %v5345_v46 = vld [vmem:[#allocation5 + $0x440] sm:$0xf0] }
  0x51   :  { %1121 = vmatpush.bf16.msrb.mxu3 %v4884_v57  ;;  %1092 = vmatpush.bf16.msrb.mxu2 %v5264_v5  ;;  %v5368_v57 = vor.u32 %v6683_v49, %v5367_v48  ;;  %v5343_v5 = vld [vmem:[#allocation5 + $0x428] sm:$0xf]  ;;  %v6605_v49 = vld [vmem:[#allocation5 + $0x1fc] sm:$0xf0] }
  0x52   :  { %1150 = vmatpush.bf16.msrb.mxu0 %v5076_v6  ;;  %1072 = vmatmul.bf16.gmra.mxu1 %v7273_v8  ;;  %v6677_v6 = vld [vmem:[#allocation5 + $0x43c] sm:$0xf0]  ;;  %v5055_v48 = vld [vmem:[#allocation5 + $0x1e8] sm:$0xf] }
  0x53   :  { %1179 = vmatpush.bf16.msrb.mxu1 %v5268_v12  ;;  %v4960_v12 = vor.u32 %v6581_v59, %v4959_v58  ;;  %v5344_v14 = vor.u32 %v6677_v6, %v5343_v5  ;;  %v4889_v58 = vld [vmem:[#allocation5 + $0xb0] sm:$0xf0]  ;;  %v5247_v5 = vld [vmem:[#allocation5 + $0x368] sm:$0xf] }
  0x55   :  { %1122 = vmatpush.bf16.msrb.mxu3 %v4860_v13  ;;  %1093 = vmatpush.bf16.msrb.mxu2 %v5240_v20  ;;  %v4988_v13 = vor.u32 %v6584_v60, %v4985_v1  ;;  %v5319_v20 = vld [vmem:[#allocation5 + $0x3f8] sm:$0xf]  ;;  %v6599_v1 = vld [vmem:[#allocation5 + $0x1cc] sm:$0xf0] }
  0x56   :  { %1151 = vmatpush.bf16.msrb.mxu0 %v5052_v21  ;;  %v6671_v21 = vld [vmem:[#allocation5 + $0x40c] sm:$0xf0] }
  0x57   :  { %1180 = vmatpush.bf16.msrb.mxu1 %v5244_v25  ;;  %v4964_v25 = vor.u32 %v6578_v17, %v4961_v19  ;;  %v5007_v17 = vld [vmem:[#allocation5 + $0x188] sm:$0xf]  ;;  %v6593_v19 = vld [vmem:[#allocation5 + $0x19c] sm:$0xf0] }
  0x58   :  { %v5008_v22 = vor.u32 %v6593_v19, %v5007_v17  ;;  %v6662_v17 = vld [vmem:[#allocation5 + $0x3cc] sm:$0xf]  ;;  %v5297_v19 = vld [vmem:[#allocation5 + $0x3e0] sm:$0xf0] }
  0x59   :  { %1123 = vmatpush.bf16.msrb.mxu3 %v4836_v26  ;;  %1094 = vmatpush.bf16.msrb.mxu2 %v5216_v33  ;;  %v5320_v26 = vor.u32 %v6671_v21, %v5319_v20  ;;  %v6665_v33 = vld [vmem:[#allocation5 + $0x3dc] sm:$0xf0]  ;;  %v5223_v20 = vld [vmem:[#allocation5 + $0x338] sm:$0xf]  ;;  %v6647_v21 = vld [vmem:[#allocation5 + $0x34c] sm:$0xf0] }
  0x5a   :  { %1152 = vmatpush.bf16.msrb.mxu0 %v5028_v37  ;;  %v124_v37 = vld [vmem:[#allocation3 + $0x40] sm:$0xff]  ;;  %v5296_v39 = vor.u32 %v6665_v33, %v5295_v32  ;;  %v5224_v23 = vor.u32 %v6647_v21, %v5223_v20  ;;  %v6542_v32 = vld [vmem:[#allocation5 + $0xc] sm:$0xf]  ;;  %v6576_v21 = vld [vmem:[#allocation5 + $0x114] sm:$0xf0] }
  0x5b   :  { %1181 = vmatpush.bf16.msrb.mxu1 %v5220_v41  ;;  %v6563_v41 = vld [vmem:[#allocation5 + $0xac] sm:$0xf0]  ;;  %v4817_v33 = vld [vmem:[#allocation5 + $0x20] sm:$0xf0]  ;;  %v4943_v20 = vld [vmem:[#allocation5 + $0x100] sm:$0xf] }
  0x5d   :  { %1124 = vmatpush.bf16.msrb.mxu3 %v4812_v42  ;;  %1095 = vmatpush.bf16.msrb.mxu2 %v5192_v50  ;;  %v6566_v42 = vld [vmem:[#allocation5 + $0xcc] sm:$0xf]  ;;  %v4888_v50 = vor.u32 %v6563_v41, %v4887_v40  ;;  %v5369_v40 = vld [vmem:[#allocation5 + $0x470] sm:$0xf0] }
  0x5e   :  { %1153 = vmatpush.bf16.msrb.mxu0 %v5004_v54  ;;  %v4916_v51 = vor.u32 %v6566_v42, %v4913_v44  ;;  %v6557_v54 = vld [vmem:[#allocation5 + $0x7c] sm:$0xf0]  ;;  %v6632_v42 = vld [vmem:[#allocation5 + $0x2dc] sm:$0xf]  ;;  %v6674_v44 = vld [vmem:[#allocation5 + $0x42c] sm:$0xf] }
  0x5f   :  { %1182 = vmatpush.bf16.msrb.mxu1 %v5196_v56  ;;  %v5056_v56 = vor.u32 %v6605_v49, %v5055_v48  ;;  %v4864_v59 = vor.u32 %v6557_v54, %v4863_v53  ;;  %v6588_v48 = vld [vmem:[#allocation5 + $0x174] sm:$0xf0]  ;;  %v5348_v49 = vor.u32 %v6674_v44, %v5345_v46  ;;  %v5183_v53 = vld [vmem:[#allocation5 + $0x2e0] sm:$0xf]  ;;  %v5249_v44 = vld [vmem:[#allocation5 + $0x380] sm:$0xf0] }
  0x60   :  { %1096 = vmatmul.bf16.vlgmr.msrb.gmra.mxu2 %v7279_v63  ;;  %1125 = vmatmul.bf16.vlgmr.msrb.gmra.mxu3 %v7255_v2 }
  0x61   :  { %1233 = vmatpush.bf16.msra.mxu3 %v5176_v47  ;;  %1204 = vmatpush.bf16.msra.mxu2 %v4984_v55  ;;  %v127_v47 = vld [vmem:[#allocation3 + $0x58] sm:$0xff] }
  0x62   :  { %1262 = vmatpush.bf16.msra.mxu0 %v5368_v57  ;;  %1183 = vmatmul.bf16.vlgmr.msrb.gmra.mxu1 %v7279_v63  ;;  %v7285_v55 = vpack.c.bf16 %v127_v47, %v124_v37  ;;  %v6560_v57 = vld [vmem:[#allocation5 + $0x9c] sm:$0xf]  ;;  %v4820_v37 = vor.u32 %v6542_v32, %v4817_v33  ;;  %v4991_v47 = vld [vmem:[#allocation5 + $0x160] sm:$0xf]  ;;  %v4919_v32 = vld [vmem:[#allocation5 + $0xd0] sm:$0xf] }
  0x63   :  { %1154 = vmatmul.bf16.vlgmr.msrb.gmra.mxu0 %v7261_v11  ;;  %1291 = vmatpush.bf16.msra.mxu1 %v4988_v13  ;;  %v4892_v60 = vor.u32 %v6560_v57, %v4889_v58  ;;  %v5248_v13 = vor.u32 %v6653_v9, %v5247_v5  ;;  %v136_v58 = vld [vmem:[#allocation3 + $0xa0] sm:$0xff]  ;;  %v4967_v5 = vld [vmem:[#allocation5 + $0x130] sm:$0xf]  ;;  %v6582_v9 = vld [vmem:[#allocation5 + $0x144] sm:$0xf0] }
  0x65   :  { %1234 = vmatpush.bf16.msra.mxu3 %v5152_v0  ;;  %1205 = vmatpush.bf16.msra.mxu2 %v4960_v12  ;;  %v5031_v0 = vld [vmem:[#allocation5 + $0x1b8] sm:$0xf]  ;;  %v6551_v12 = vld [vmem:[#allocation5 + $0x4c] sm:$0xf0] }
  0x66   :  { %1263 = vmatpush.bf16.msra.mxu0 %v5344_v14  ;;  %v5032_v6 = vor.u32 %v6599_v1, %v5031_v0  ;;  %v4840_v14 = vor.u32 %v6551_v12, %v4839_v10  ;;  %v6668_v0 = vld [vmem:[#allocation5 + $0x3fc] sm:$0xf]  ;;  %v5321_v1 = vld [vmem:[#allocation5 + $0x410] sm:$0xf0] }
  0x67   :  { %1292 = vmatpush.bf16.msra.mxu1 %v4964_v25  ;;  %v6545_v25 = vld [vmem:[#allocation5 + $0x1c] sm:$0xf0]  ;;  %v6620_v10 = vld [vmem:[#allocation5 + $0x27c] sm:$0xf]  ;;  %v5129_v12 = vld [vmem:[#allocation5 + $0x290] sm:$0xf0] }
  0x69   :  { %1235 = vmatpush.bf16.msra.mxu3 %v5128_v18  ;;  %1206 = vmatpush.bf16.msra.mxu2 %v4936_v24  ;;  %v4868_v18 = vor.u32 %v6554_v15, %v4865_v16  ;;  %v4815_v24 = vld [vmem:[#allocation5 + $0x8] sm:$0xf]  ;;  %v5159_v15 = vld [vmem:[#allocation5 + $0x2b0] sm:$0xf] }
  0x6a   :  { %1264 = vmatpush.bf16.msra.mxu0 %v5320_v26  ;;  %v6548_v26 = vld [vmem:[#allocation5 + $0x3c] sm:$0xf]  ;;  %v4816_v27 = vor.u32 %v6545_v25, %v4815_v24  ;;  %v6630_v16 = vld [vmem:[#allocation5 + $0x2c4] sm:$0xf0]  ;;  %v6614_v24 = vld [vmem:[#allocation5 + $0x24c] sm:$0xf] }
  0x6b   :  { %1293 = vmatpush.bf16.msra.mxu1 %v4940_v38  ;;  %v4844_v31 = vor.u32 %v6548_v26, %v4841_v28  ;;  %v7291_v38 = vpack.c.bf16 %v133_v35, %v130_v34  ;;  %v5105_v25 = vld [vmem:[#allocation5 + $0x260] sm:$0xf0]  ;;  %v5135_v26 = vld [vmem:[#allocation5 + $0x280] sm:$0xf]  ;;  %v6624_v28 = vld [vmem:[#allocation5 + $0x294] sm:$0xf0] }
  0x6c   :  { %v6570_v34 = vld [vmem:[#allocation5 + $0xe4] sm:$0xf0]  ;;  %v6608_v35 = vld [vmem:[#allocation5 + $0x21c] sm:$0xf] }
  0x6d   :  { %1236 = vmatpush.bf16.msra.mxu3 %v5104_v30  ;;  %1207 = vmatpush.bf16.msra.mxu2 %v4912_v36  ;;  %v6641_v30 = vld [vmem:[#allocation5 + $0x31c] sm:$0xf0] }
  0x6e   :  { %1265 = vmatpush.bf16.msra.mxu0 %v5296_v39  ;;  %v5200_v36 = vor.u32 %v6641_v30, %v5199_v29  ;;  %v6680_v39 = vld [vmem:[#allocation5 + $0x45c] sm:$0xf]  ;;  %v5136_v29 = vor.u32 %v6624_v28, %v5135_v26  ;;  %v6546_v28 = vld [vmem:[#allocation5 + $0x24] sm:$0xf0] }
  0x6f   :  { %1294 = vmatpush.bf16.msra.mxu1 %v4916_v51  ;;  %v5372_v41 = vor.u32 %v6680_v39, %v5369_v40  ;;  %v6626_v51 = vld [vmem:[#allocation5 + $0x2ac] sm:$0xf]  ;;  %v6656_v30 = vld [vmem:[#allocation5 + $0x39c] sm:$0xf]  ;;  %v5111_v40 = vld [vmem:[#allocation5 + $0x250] sm:$0xf] }
  0x70   :  { %1101 = vmatmul.bf16.gmra.mxu2 %v7285_v55  ;;  %1130 = vmatmul.bf16.gmra.mxu3 %v7267_v61 }
  0x71   :  { %1237 = vmatpush.bf16.msra.mxu3 %v5080_v43  ;;  %1208 = vmatpush.bf16.msra.mxu2 %v4888_v50  ;;  %v5177_v43 = vld [vmem:[#allocation5 + $0x2f0] sm:$0xf0]  ;;  %v4992_v50 = vor.u32 %v6588_v48, %v4991_v47  ;;  %v6564_v47 = vld [vmem:[#allocation5 + $0xb4] sm:$0xf0]  ;;  %v6602_v48 = vld [vmem:[#allocation5 + $0x1ec] sm:$0xf] }
  0x72   :  { %1266 = vmatpush.bf16.msra.mxu0 %v5272_v52  ;;  %1188 = vmatmul.bf16.gmra.mxu1 %v7285_v55  ;;  %v5180_v45 = vor.u32 %v6632_v42, %v5177_v43  ;;  %v5153_v52 = vld [vmem:[#allocation5 + $0x2c0] sm:$0xf0]  ;;  %v6650_v43 = vld [vmem:[#allocation5 + $0x36c] sm:$0xf] }
  0x73   :  { %1159 = vmatmul.bf16.gmra.mxu0 %v7273_v8  ;;  %1295 = vmatpush.bf16.msra.mxu1 %v4892_v60  ;;  %v5156_v54 = vor.u32 %v6626_v51, %v5153_v52  ;;  %v5252_v46 = vor.u32 %v6650_v43, %v5249_v44  ;;  %v5087_v52 = vld [vmem:[#allocation5 + $0x220] sm:$0xf]  ;;  %v6684_v43 = vld [vmem:[#allocation5 + $0x474] sm:$0xf0] }
  0x75   :  { %1238 = vmatpush.bf16.msra.mxu3 %v5056_v56  ;;  %1209 = vmatpush.bf16.msra.mxu2 %v4864_v59  ;;  %v6636_v56 = vld [vmem:[#allocation5 + $0x2f4] sm:$0xf0] }
  0x76   :  { %1267 = vmatpush.bf16.msra.mxu0 %v5248_v13  ;;  %v5184_v57 = vor.u32 %v6636_v56, %v5183_v53  ;;  %v139_v59 = vld [vmem:[#allocation3 + $0xb8] sm:$0xff]  ;;  %v4968_v13 = vor.u32 %v6582_v9, %v4967_v5  ;;  %v5033_v5 = vld [vmem:[#allocation5 + $0x1d0] sm:$0xf0] }
  0x77   :  { %1296 = vmatpush.bf16.msra.mxu1 %v4868_v18  ;;  %v7297_v60 = vpack.c.bf16 %v139_v59, %v136_v58  ;;  %v5160_v18 = vor.u32 %v6630_v16, %v5159_v15  ;;  %v6612_v53 = vld [vmem:[#allocation5 + $0x234] sm:$0xf0]  ;;  %v6644_v56 = vld [vmem:[#allocation5 + $0x33c] sm:$0xf]  ;;  %v4871_v58 = vld [vmem:[#allocation5 + $0x70] sm:$0xf] }
  0x78   :  { %v4847_v15 = vld [vmem:[#allocation5 + $0x40] sm:$0xf]  ;;  %v6552_v16 = vld [vmem:[#allocation5 + $0x54] sm:$0xf0] }
  0x79   :  { %1239 = vmatpush.bf16.msra.mxu3 %v5032_v6  ;;  %1210 = vmatpush.bf16.msra.mxu2 %v4840_v14  ;;  %v5324_v6 = vor.u32 %v6668_v0, %v5321_v1  ;;  %v5132_v14 = vor.u32 %v6620_v10, %v5129_v12  ;;  %v6558_v0 = vld [vmem:[#allocation5 + $0x84] sm:$0xf0]  ;;  %v6596_v1 = vld [vmem:[#allocation5 + $0x1bc] sm:$0xf]  ;;  %v5063_v10 = vld [vmem:[#allocation5 + $0x1f0] sm:$0xf] }
  0x7a   :  { %1268 = vmatpush.bf16.msra.mxu0 %v5224_v23  ;;  %v4944_v23 = vor.u32 %v6576_v21, %v4943_v20  ;;  %v5036_v9 = vor.u32 %v6596_v1, %v5033_v5  ;;  %v6606_v12 = vld [vmem:[#allocation5 + $0x204] sm:$0xf0]  ;;  %v6590_v20 = vld [vmem:[#allocation5 + $0x18c] sm:$0xf]  ;;  %v5185_v1 = vld [vmem:[#allocation5 + $0x2f8] sm:$0xf0] }
  0x7b   :  { %1297 = vmatpush.bf16.msra.mxu1 %v4844_v31  ;;  %v5273_v31 = vld [vmem:[#allocation5 + $0x3b0] sm:$0xf0]  ;;  %v5351_v5 = vld [vmem:[#allocation5 + $0x430] sm:$0xf] }
  0x7c   :  { %v5276_v33 = vor.u32 %v6656_v30, %v5273_v31 }
  0x7d   :  { %1240 = vmatpush.bf16.msra.mxu3 %v5008_v22  ;;  %1211 = vmatpush.bf16.msra.mxu2 %v4816_v27  ;;  %v5300_v22 = vor.u32 %v6662_v17, %v5297_v19  ;;  %v5108_v27 = vor.u32 %v6614_v24, %v5105_v25  ;;  %v6638_v17 = vld [vmem:[#allocation5 + $0x30c] sm:$0xf]  ;;  %v4848_v19 = vor.u32 %v6552_v16, %v4847_v15  ;;  %v6600_v24 = vld [vmem:[#allocation5 + $0x1d4] sm:$0xf0]  ;;  %v5377_v15 = vld [vmem:[#allocation5 + $0x478] sm:$0xf0] }
  0x7e   :  { %1269 = vmatpush.bf16.msra.mxu0 %v5200_v36  ;;  %v5081_v36 = vld [vmem:[#allocation5 + $0x230] sm:$0xf0] }
  0x7f   :  { %1298 = vmatpush.bf16.msra.mxu1 %v4820_v37  ;;  %v4920_v37 = vor.u32 %v6570_v34, %v4919_v32  ;;  %v5084_v39 = vor.u32 %v6608_v35, %v5081_v36  ;;  %v5015_v32 = vld [vmem:[#allocation5 + $0x190] sm:$0xf] }
  0x80   :  { %1106 = vmatmul.bf16.gmra.mxu2 %v7291_v38  ;;  %1135 = vmatmul.bf16.gmra.mxu3 %v7257_v3 }
  0x81   :  { %1349 = vmatpush.bf16.msrb.mxu3 %v5372_v41  ;;  %1320 = vmatpush.bf16.msrb.mxu2 %v5180_v45  ;;  %v6618_v41 = vld [vmem:[#allocation5 + $0x264] sm:$0xf0]  ;;  %v4895_v45 = vld [vmem:[#allocation5 + $0xa0] sm:$0xf] }
  0x82   :  { %1193 = vmatmul.bf16.gmra.mxu1 %v7291_v38  ;;  %1378 = vmatpush.bf16.msrb.mxu0 %v4992_v50  ;;  %v5112_v42 = vor.u32 %v6618_v41, %v5111_v40  ;;  %v4896_v50 = vor.u32 %v6564_v47, %v4895_v45  ;;  %v4993_v40 = vld [vmem:[#allocation5 + $0x178] sm:$0xf0] }
  0x83   :  { %1164 = vmatmul.bf16.gmra.mxu0 %v7259_v7  ;;  %1407 = vmatpush.bf16.msrb.mxu1 %v5184_v57  ;;  %v5225_v57 = vld [vmem:[#allocation5 + $0x350] sm:$0xf0] }
  0x84   :  { %v5228_v59 = vor.u32 %v6644_v56, %v5225_v57  ;;  %v4969_v56 = vld [vmem:[#allocation5 + $0x148] sm:$0xf0]  ;;  %v6633_v57 = vld [vmem:[#allocation5 + $0x2e4] sm:$0xf] }
  0x85   :  { %1350 = vmatpush.bf16.msrb.mxu3 %v5348_v49  ;;  %1321 = vmatpush.bf16.msrb.mxu2 %v5156_v54  ;;  %v5057_v49 = vld [vmem:[#allocation5 + $0x200] sm:$0xf0]  ;;  %v5088_v54 = vor.u32 %v6612_v53, %v5087_v52 }
  0x86   :  { %1379 = vmatpush.bf16.msrb.mxu0 %v4968_v13  ;;  %v5060_v51 = vor.u32 %v6602_v48, %v5057_v49  ;;  %v5064_v13 = vor.u32 %v6606_v12, %v5063_v10  ;;  %v5188_v10 = vor.u32 %v6633_v57, %v5185_v1 }
  0x87   :  { %1408 = vmatpush.bf16.msrb.mxu1 %v5160_v18  ;;  %v5201_v18 = vld [vmem:[#allocation5 + $0x320] sm:$0xf0] }
  0x88   :  { %v5204_v21 = vor.u32 %v6638_v17, %v5201_v18 }
  0x89   :  { %1351 = vmatpush.bf16.msrb.mxu3 %v5324_v6  ;;  %1322 = vmatpush.bf16.msrb.mxu2 %v5132_v14  ;;  %v4872_v6 = vor.u32 %v6558_v0, %v4871_v58  ;;  %v7311_v14 = vld [vmem:[#allocation7] sm:$0x3f] }
  0x8a   :  { %1380 = vmatpush.bf16.msrb.mxu0 %v4944_v23  ;;  %v5039_v23 = vld [vmem:[#allocation5 + $0x1c0] sm:$0xf] }
  0x8b   :  { %1409 = vmatpush.bf16.msrb.mxu1 %v5136_v29  ;;  %v5040_v26 = vor.u32 %v6600_v24, %v5039_v23  ;;  %v7314_v29 = vperm.slane %v7311_v14, 0 }
  0x8d   :  { %1352 = vmatpush.bf16.msrb.mxu3 %v5300_v22  ;;  %1323 = vmatpush.bf16.msrb.mxu2 %v5108_v27  ;;  %v5009_v22 = vld [vmem:[#allocation5 + $0x1a0] sm:$0xf0]  ;;  %v4823_v27 = vld [vmem:[#allocation5 + $0x10] sm:$0xf] }
  0x8e   :  { %1381 = vmatpush.bf16.msrb.mxu0 %v4920_v37  ;;  %v5012_v25 = vor.u32 %v6590_v20, %v5009_v22  ;;  %v4824_v30 = vor.u32 %v6546_v28, %v4823_v27  ;;  %v6627_v27 = vld [vmem:[#allocation5 + $0x2b4] sm:$0xf] }
  0x8f   :  { %1410 = vmatpush.bf16.msrb.mxu1 %v5112_v42  ;;  %v5375_v42 = vld [vmem:[#allocation5 + $0x460] sm:$0xf] }
  0x90   :  { %1111 = vmatmul.bf16.gmra.mxu2 %v7297_v60  ;;  %1140 = vmatmul.bf16.gmra.mxu3 %v7269_v62  ;;  %v5376_v45 = vor.u32 %v6684_v43, %v5375_v42 }
  0x91   :  { %1353 = vmatpush.bf16.msrb.mxu3 %v5276_v33  ;;  %1324 = vmatpush.bf16.msrb.mxu2 %v5084_v39  ;;  %v6594_v33 = vld [vmem:[#allocation5 + $0x1a4] sm:$0xf0]  ;;  %v6585_v39 = vld [vmem:[#allocation5 + $0x164] sm:$0xf] }
  0x92   :  { %1198 = vmatmul.bf16.gmra.mxu1 %v7297_v60  ;;  %1382 = vmatpush.bf16.msrb.mxu0 %v4896_v50  ;;  %v5016_v35 = vor.u32 %v6594_v33, %v5015_v32  ;;  %v4996_v41 = vor.u32 %v6585_v39, %v4993_v40  ;;  %v5161_v32 = vld [vmem:[#allocation5 + $0x2c8] sm:$0xf0]  ;;  %v5327_v33 = vld [vmem:[#allocation5 + $0x400] sm:$0xf]  ;;  %v6675_v40 = vld [vmem:[#allocation5 + $0x434] sm:$0xf] }
  0x93   :  { %1169 = vmatmul.bf16.gmra.mxu0 %v7271_v4  ;;  %1411 = vmatpush.bf16.msrb.mxu1 %v5088_v54  ;;  %v6579_v54 = vld [vmem:[#allocation5 + $0x134] sm:$0xf] }
  0x94   :  { %v4972_v0 = vor.u32 %v6579_v54, %v4969_v56  ;;  %v5303_v54 = vld [vmem:[#allocation5 + $0x3d0] sm:$0xf]  ;;  %v6666_v56 = vld [vmem:[#allocation5 + $0x3e4] sm:$0xf0] }
  0x95   :  { %1354 = vmatpush.bf16.msrb.mxu3 %v5252_v46  ;;  %1325 = vmatpush.bf16.msrb.mxu2 %v5060_v51 }
  0x96   :  { %1383 = vmatpush.bf16.msrb.mxu0 %v4872_v6  ;;  %v6678_v6 = vld [vmem:[#allocation5 + $0x444] sm:$0xf0] }
  0x97   :  { %1412 = vmatpush.bf16.msrb.mxu1 %v5064_v13  ;;  %v5352_v12 = vor.u32 %v6678_v6, %v5351_v5  ;;  %v6681_v13 = vld [vmem:[#allocation5 + $0x464] sm:$0xf] }
  0x98   :  { %v5380_v18 = vor.u32 %v6681_v13, %v5377_v15 }
  0x99   :  { %1355 = vmatpush.bf16.msrb.mxu3 %v5228_v59  ;;  %1326 = vmatpush.bf16.msrb.mxu2 %v5036_v9 }
  0x9a   :  { %1384 = vmatpush.bf16.msrb.mxu0 %v4848_v19 }
  0x9b   :  { %1413 = vmatpush.bf16.msrb.mxu1 %v5040_v26  ;;  %v4945_v26 = vld [vmem:[#allocation5 + $0x118] sm:$0xf0] }
  0x9d   :  { %1356 = vmatpush.bf16.msrb.mxu3 %v5204_v21  ;;  %1327 = vmatpush.bf16.msrb.mxu2 %v5012_v25  ;;  %v6573_v25 = vld [vmem:[#allocation5 + $0x104] sm:$0xf] }
  0x9e   :  { %1385 = vmatpush.bf16.msrb.mxu0 %v4824_v30 }
  0x9f   :  { %1414 = vmatpush.bf16.msrb.mxu1 %v5016_v35 }
  0xa0   :  { %1212 = vmatmul.bf16.vlgmr.msra.gmra.mxu2 %v7255_v2  ;;  %1241 = vmatmul.bf16.vlgmr.msra.gmra.mxu3 %v7261_v11 }
  0xa1   :  { %1465 = vmatpush.bf16.msra.mxu3 %v4996_v41  ;;  %1436 = vmatpush.bf16.msra.mxu2 %v5376_v45  ;;  %v5353_v41 = vld [vmem:[#allocation5 + $0x448] sm:$0xf0]  ;;  %v6567_v45 = vld [vmem:[#allocation5 + $0xd4] sm:$0xf] }
  0xa2   :  { %1299 = vmatmul.bf16.vlgmr.msra.gmra.mxu1 %v7255_v2  ;;  %v5356_v43 = vor.u32 %v6675_v40, %v5353_v41 }
  0xa3   :  { %1270 = vmatmul.bf16.vlgmr.msra.gmra.mxu0 %v7279_v63  ;;  %1523 = vmatpush.bf16.msra.mxu1 %v5380_v18  ;;  %v4897_v18 = vld [vmem:[#allocation5 + $0xb8] sm:$0xf0] }
  0xa4   :  { %1494 = vmatpush.bf16.msra.mxu0 %v5188_v10 }
  0xa5   :  { %1466 = vmatpush.bf16.msra.mxu3 %v4972_v0  ;;  %1437 = vmatpush.bf16.msra.mxu2 %v5352_v12  ;;  %v5329_v0 = vld [vmem:[#allocation5 + $0x418] sm:$0xf0] }
  0xa7   :  { %1524 = vmatpush.bf16.msra.mxu1 %v5356_v43 }
  0xb0   :  { %1217 = vmatmul.bf16.gmra.mxu2 %v7267_v61  ;;  %1246 = vmatmul.bf16.gmra.mxu3 %v7273_v8 }
  0xb2   :  { %1304 = vmatmul.bf16.gmra.mxu1 %v7267_v61 }
  0xb3   :  { %1275 = vmatmul.bf16.gmra.mxu0 %v7285_v55 }
  0xbc   :  { %v1039_v31 = vpop.f32.mrf.mxu0 }
  0xbd   :  { %v1040_v34 = vadd.f32 %v1039_v31, %v7314_v29  ;;  %v4948_v31 = vor.u32 %v6573_v25, %v4945_v26 }
  0xbf   :  { %v1068_v36 = vpop.f32.mrf.mxu1  ;;  %1467 = vmatpush.bf16.msra.mxu3 %v4948_v31  ;;  %v6663_v31 = vld [vmem:[#allocation5 + $0x3d4] sm:$0xf] }
  0xc0   :  { %v7317_v37 = vadd.f32 %v1068_v36, %v1040_v34  ;;  %1222 = vmatmul.bf16.gmra.mxu2 %v7257_v3  ;;  %1251 = vmatmul.bf16.gmra.mxu3 %v7259_v7  ;;  %v6672_v34 = vld [vmem:[#allocation5 + $0x414] sm:$0xf0]  ;;  %v5164_v36 = vor.u32 %v6627_v27, %v5161_v32  ;;  %v5305_v32 = vld [vmem:[#allocation5 + $0x3e8] sm:$0xf0] }
  0xc1   :  { %v5328_v39 = vor.u32 %v6672_v34, %v5327_v33 }
  0xc2   :  { %1309 = vmatmul.bf16.gmra.mxu1 %v7257_v3  ;;  %v1049_v44 = vpop.f32.mrf.mxu2  ;;  %1495 = vmatpush.bf16.msra.mxu0 %v5164_v36  ;;  %v6555_v36 = vld [vmem:[#allocation5 + $0x74] sm:$0xf] }
  0xc3   :  { %1280 = vmatmul.bf16.gmra.mxu0 %v7291_v38  ;;  %v1050_v46 = vadd.f32 %v1049_v44, %v7314_v29  ;;  %v1078_v47 = vpop.f32.mrf.mxu3  ;;  %1438 = vmatpush.bf16.msra.mxu2 %v5328_v39  ;;  %v4873_v39 = vld [vmem:[#allocation5 + $0x88] sm:$0xf0] }
  0xc4   :  { %v1041_v48 = vpop.f32.mrf.mxu0  ;;  %v4876_v43 = vor.u32 %v6555_v36, %v4873_v39  ;;  %v5233_v36 = vld [vmem:[#allocation5 + $0x358] sm:$0xf0] }
  0xc5   :  { %v7324_v49 = vadd.f32 %v1078_v47, %v1050_v46  ;;  %v1042_v50 = vadd.f32 %v1041_v48, %v7314_v29  ;;  %v4921_v46 = vld [vmem:[#allocation5 + $0xe8] sm:$0xf0]  ;;  %v6621_v47 = vld [vmem:[#allocation5 + $0x284] sm:$0xf] }
  0xc7   :  { %v1070_v51 = vpop.f32.mrf.mxu1 }
  0xc8   :  { %v7327_v52 = vadd.f32 %v1070_v51, %v1042_v50  ;;  %v4924_v51 = vor.u32 %v6567_v45, %v4921_v46  ;;  %v5089_v45 = vld [vmem:[#allocation5 + $0x238] sm:$0xf0]  ;;  %v5255_v46 = vld [vmem:[#allocation5 + $0x370] sm:$0xf] }
  0xca   :  { %v1051_v53 = vpop.f32.mrf.mxu2  ;;  %1468 = vmatpush.bf16.msra.mxu3 %v4924_v51  ;;  %v6657_v51 = vld [vmem:[#allocation5 + $0x3a4] sm:$0xf] }
  0xcb   :  { %v1052_v58 = vadd.f32 %v1051_v53, %v7314_v29  ;;  %v1080_v59 = vpop.f32.mrf.mxu3  ;;  %v5137_v53 = vld [vmem:[#allocation5 + $0x298] sm:$0xf0] }
  0xcc   :  { %v1044_v9 = vpop.f32.mrf.mxu0  ;;  %v5140_v57 = vor.u32 %v6621_v47, %v5137_v53  ;;  %v5281_v53 = vld [vmem:[#allocation5 + $0x3b8] sm:$0xf0] }
  0xcd   :  { %v7330_v16 = vadd.f32 %v1080_v59, %v1052_v58  ;;  %v1045_v17 = vadd.f32 %v1044_v9, %v7314_v29  ;;  %v5304_v58 = vor.u32 %v6666_v56, %v5303_v54  ;;  %v6669_v59 = vld [vmem:[#allocation5 + $0x404] sm:$0xf] }
  0xce   :  { %v5332_v6 = vor.u32 %v6669_v59, %v5329_v0  ;;  %1496 = vmatpush.bf16.msra.mxu0 %v5140_v57  ;;  %v5284_v57 = vor.u32 %v6657_v51, %v5281_v53  ;;  %v6591_v51 = vld [vmem:[#allocation5 + $0x194] sm:$0xf] }
  0xcf   :  { %v1073_v19 = vpop.f32.mrf.mxu1  ;;  %1439 = vmatpush.bf16.msra.mxu2 %v5304_v58 }
  0xd0   :  { %v7333_v20 = vadd.f32 %v1073_v19, %v1045_v17  ;;  %1227 = vmatmul.bf16.gmra.mxu2 %v7269_v62  ;;  %1256 = vmatmul.bf16.gmra.mxu3 %v7271_v4  ;;  %v6561_v17 = vld [vmem:[#allocation5 + $0xa4] sm:$0xf]  ;;  %v6615_v19 = vld [vmem:[#allocation5 + $0x254] sm:$0xf] }
  0xd1   :  { %1525 = vmatpush.bf16.msra.mxu1 %v5332_v6  ;;  %v5065_v6 = vld [vmem:[#allocation5 + $0x208] sm:$0xf0] }
  0xd2   :  { %1314 = vmatmul.bf16.gmra.mxu1 %v7269_v62 }
  0xd3   :  { %1285 = vmatmul.bf16.gmra.mxu0 %v7297_v60  ;;  %v1054_v21 = vpop.f32.mrf.mxu2  ;;  %v1083_v23 = vpop.f32.mrf.mxu3 }
  0xd4   :  { %v1055_v22 = vadd.f32 %v1054_v21, %v7314_v29  ;;  %v1046_v24 = vpop.f32.mrf.mxu0 }
  0xd5   :  { %v1047_v30 = vadd.f32 %v1046_v24, %v7314_v29  ;;  %v5279_v24 = vld [vmem:[#allocation5 + $0x3a0] sm:$0xf] }
  0xd6   :  { %v7340_v28 = vadd.f32 %v1083_v23, %v1055_v22  ;;  %v4900_v22 = vor.u32 %v6561_v17, %v4897_v18  ;;  %v5113_v23 = vld [vmem:[#allocation5 + $0x268] sm:$0xf0]  ;;  %v6549_v17 = vld [vmem:[#allocation5 + $0x44] sm:$0xf]  ;;  %v4849_v18 = vld [vmem:[#allocation5 + $0x58] sm:$0xf0] }
  0xd7   :  { %v1075_v35 = vpop.f32.mrf.mxu1  ;;  %v5116_v27 = vor.u32 %v6615_v19, %v5113_v23  ;;  %v5231_v19 = vld [vmem:[#allocation5 + $0x340] sm:$0xf]  ;;  %v6648_v23 = vld [vmem:[#allocation5 + $0x354] sm:$0xf0] }
  0xd8   :  { %v7343_v42 = vadd.f32 %v1075_v35, %v1047_v30  ;;  %v6660_v30 = vld [vmem:[#allocation5 + $0x3b4] sm:$0xf0]  ;;  %1469 = vmatpush.bf16.msra.mxu3 %v4900_v22  ;;  %v4852_v22 = vor.u32 %v6549_v17, %v4849_v18 }
  0xd9   :  { %v5280_v33 = vor.u32 %v6660_v30, %v5279_v24  ;;  %1497 = vmatpush.bf16.msra.mxu0 %v5116_v27  ;;  %v6651_v24 = vld [vmem:[#allocation5 + $0x374] sm:$0xf]  ;;  %v5232_v27 = vor.u32 %v6648_v23, %v5231_v19  ;;  %v5257_v30 = vld [vmem:[#allocation5 + $0x388] sm:$0xf0] }
  0xdb   :  { %v1056_v44 = vpop.f32.mrf.mxu2  ;;  %v1085_v50 = vpop.f32.mrf.mxu3  ;;  %1440 = vmatpush.bf16.msra.mxu2 %v5280_v33 }
  0xdc   :  { %v1057_v48 = vadd.f32 %v1056_v44, %v7314_v29  ;;  %v7352_v29 = vperm.slane %v7311_v14, 1  ;;  %v6609_v44 = vld [vmem:[#allocation5 + $0x224] sm:$0xf]  ;;  %1470 = vmatpush.bf16.msra.mxu3 %v4876_v43  ;;  %v6543_v43 = vld [vmem:[#allocation5 + $0x14] sm:$0xf] }
  0xde   :  { %v7346_v1 = vadd.f32 %v1085_v50, %v1057_v48  ;;  %v5092_v48 = vor.u32 %v6609_v44, %v5089_v45  ;;  %v6654_v50 = vld [vmem:[#allocation5 + $0x384] sm:$0xf0]  ;;  %v4825_v44 = vld [vmem:[#allocation5 + $0x28] sm:$0xf0] }
  0xdf   :  { %v1184_v9 = vpop.f32.mrf.mxu1  ;;  %v5256_v56 = vor.u32 %v6654_v50, %v5255_v46  ;;  %v6642_v50 = vld [vmem:[#allocation5 + $0x324] sm:$0xf0] }
  0xe0   :  { %v1155_v5 = vpop.f32.mrf.mxu0  ;;  %1328 = vmatmul.bf16.vlgmr.msrb.gmra.mxu2 %v7261_v11  ;;  %1357 = vmatmul.bf16.vlgmr.msrb.gmra.mxu3 %v7279_v63 }
  0xe1   :  { %1498 = vmatpush.bf16.msra.mxu0 %v5092_v48  ;;  %1441 = vmatpush.bf16.msra.mxu2 %v5256_v56  ;;  %v5207_v48 = vld [vmem:[#allocation5 + $0x310] sm:$0xf]  ;;  %v5017_v56 = vld [vmem:[#allocation5 + $0x1a8] sm:$0xf0] }
  0xe2   :  { %1415 = vmatmul.bf16.vlgmr.msrb.gmra.mxu1 %v7261_v11  ;;  %1471 = vmatpush.bf16.msra.mxu3 %v4852_v22 }
  0xe3   :  { %1386 = vmatmul.bf16.vlgmr.msrb.gmra.mxu0 %v7255_v2  ;;  %v1097_v10 = vpop.f32.mrf.mxu2  ;;  %v1126_v13 = vpop.f32.mrf.mxu3 }
  0xe4   :  { %v7356_v12 = vadd.f32 %v1097_v10, %v7317_v37  ;;  %v1127_v15 = vadd.f32 %v1126_v13, %v7352_v29  ;;  %v5308_v37 = vor.u32 %v6663_v31, %v5305_v32  ;;  %v6597_v31 = vld [vmem:[#allocation5 + $0x1c4] sm:$0xf]  ;;  %v5041_v32 = vld [vmem:[#allocation5 + $0x1d8] sm:$0xf0] }
  0xe5   :  { %v5044_v33 = vor.u32 %v6597_v31, %v5041_v32  ;;  %1442 = vmatpush.bf16.msra.mxu2 %v5232_v27 }
  0xe6   :  { %v1156_v25 = vadd.f32 %v1155_v5, %v1127_v15  ;;  %1526 = vmatpush.bf16.msra.mxu1 %v5308_v37  ;;  %v6603_v5 = vld [vmem:[#allocation5 + $0x1f4] sm:$0xf] }
  0xe7   :  { %v1186_v26 = vpop.f32.mrf.mxu1  ;;  %v5068_v13 = vor.u32 %v6603_v5, %v5065_v6 }
  0xe8   :  { %v1157_v21 = vpop.f32.mrf.mxu0  ;;  %v7359_v34 = vadd.f32 %v1184_v9, %v1156_v25 }
  0xe9   :  { %1499 = vmatpush.bf16.msra.mxu0 %v5068_v13 }
  0xea   :  { %8783 = vst [vmem:[#allocation17_spill] sm:$0xff] %v7359_v34  ;;  %1527 = vmatpush.bf16.msra.mxu1 %v5284_v57  ;;  %v6639_v57 = vld [vmem:[#allocation5 + $0x314] sm:$0xf] }
  0xeb   :  { %v1099_v35 = vpop.f32.mrf.mxu2  ;;  %v1128_v41 = vpop.f32.mrf.mxu3 }
  0xec   :  { %v7362_v40 = vadd.f32 %v1099_v35, %v7327_v52  ;;  %v1129_v47 = vadd.f32 %v1128_v41, %v7352_v29  ;;  %v6645_v35 = vld [vmem:[#allocation5 + $0x344] sm:$0xf] }
  0xed   :  { %1500 = vmatpush.bf16.msra.mxu0 %v5044_v33  ;;  %v5236_v39 = vor.u32 %v6645_v35, %v5233_v36 }
  0xee   :  { %8784 = vst [vmem:[#allocation18_spill] sm:$0xff] %v7362_v40  ;;  %v1158_v58 = vadd.f32 %v1157_v21, %v1129_v47  ;;  %v4828_v47 = vor.u32 %v6543_v43, %v4825_v44  ;;  %v5551_v44 = vld [vmem:[#allocation8 + $0x150] sm:$0xf] }
  0xef   :  { %v1189_v59 = vpop.f32.mrf.mxu1 }
  0xf0   :  { %v1160_v54 = vpop.f32.mrf.mxu0  ;;  %1333 = vmatmul.bf16.gmra.mxu2 %v7273_v8  ;;  %v7366_v52 = vadd.f32 %v1186_v26, %v1158_v58  ;;  %1362 = vmatmul.bf16.gmra.mxu3 %v7285_v55  ;;  %v5209_v58 = vld [vmem:[#allocation5 + $0x328] sm:$0xf0] }
  0xf1   :  { %1472 = vmatpush.bf16.msra.mxu3 %v4828_v47  ;;  %v5743_v47 = vld [vmem:[#allocation8 + $0x2d0] sm:$0xf] }
  0xf2   :  { %8785 = vst [vmem:[#allocation19_spill] sm:$0xff] %v7366_v52  ;;  %1420 = vmatmul.bf16.gmra.mxu1 %v7273_v8 }
  0xf3   :  { %1391 = vmatmul.bf16.gmra.mxu0 %v7267_v61  ;;  %v1102_v0 = vpop.f32.mrf.mxu2  ;;  %v1131_v10 = vpop.f32.mrf.mxu3 }
  0xf4   :  { %v7372_v9 = vadd.f32 %v1102_v0, %v7333_v20  ;;  %v1132_v15 = vadd.f32 %v1131_v10, %v7352_v29  ;;  %v5260_v20 = vor.u32 %v6651_v24, %v5257_v30  ;;  %v5020_v0 = vor.u32 %v6591_v51, %v5017_v56  ;;  %v6778_v51 = vld [vmem:[#allocation8 + $0x2e4] sm:$0xf0] }
  0xf6   :  { %v1161_v25 = vadd.f32 %v1160_v54, %v1132_v15  ;;  %1528 = vmatpush.bf16.msra.mxu1 %v5260_v20  ;;  %v5208_v54 = vor.u32 %v6642_v50, %v5207_v48  ;;  %1501 = vmatpush.bf16.msra.mxu0 %v5020_v0  ;;  %v5935_v0 = vld [vmem:[#allocation8 + $0x450] sm:$0xf] }
  0xf7   :  { %v1191_v26 = vpop.f32.mrf.mxu1 }
  0xf8   :  { %v1162_v21 = vpop.f32.mrf.mxu0  ;;  %v7375_v37 = vadd.f32 %v1189_v59, %v1161_v25  ;;  %1443 = vmatpush.bf16.msra.mxu2 %v5208_v54 }
  0xfa   :  { %1529 = vmatpush.bf16.msra.mxu1 %v5236_v39 }
  0xfb   :  { %v1104_v41 = vpop.f32.mrf.mxu2  ;;  %v1133_v46 = vpop.f32.mrf.mxu3 }
  0xfc   :  { %v7378_v45 = vadd.f32 %v1104_v41, %v7343_v42  ;;  %v1134_v53 = vadd.f32 %v1133_v46, %v7352_v29  ;;  %v5212_v42 = vor.u32 %v6639_v57, %v5209_v58  ;;  %v6730_v46 = vld [vmem:[#allocation8 + $0x164] sm:$0xf0] }
  0xfd   :  { %v5552_v50 = vor.u32 %v6730_v46, %v5551_v44 }
  0xfe   :  { %v1163_v5 = vadd.f32 %v1162_v21, %v1134_v53  ;;  %1530 = vmatpush.bf16.msra.mxu1 %v5212_v42 }
  0xff   :  { %v1194_v6 = vpop.f32.mrf.mxu1  ;;  %3366 = vmatpush.bf16.msrb.mxu2 %v5552_v50 }
 0x100   :  { %v1165_v59 = vpop.f32.mrf.mxu0  ;;  %1338 = vmatmul.bf16.gmra.mxu2 %v7259_v7  ;;  %v7382_v10 = vadd.f32 %v1191_v26, %v1163_v5  ;;  %1367 = vmatmul.bf16.gmra.mxu3 %v7291_v38  ;;  %v6826_v5 = vld [vmem:[#allocation8 + $0x464] sm:$0xf0] }
 0x102   :  { %1425 = vmatmul.bf16.gmra.mxu1 %v7259_v7 }
 0x103   :  { %1396 = vmatmul.bf16.gmra.mxu0 %v7257_v3  ;;  %v1107_v13 = vpop.f32.mrf.mxu2  ;;  %v1136_v17 = vpop.f32.mrf.mxu3 }
 0x104   :  { %v7388_v15 = vadd.f32 %v1107_v13, %v7324_v49  ;;  %v1137_v18 = vadd.f32 %v1136_v17, %v7352_v29  ;;  %v6724_v13 = vld [vmem:[#allocation8 + $0x134] sm:$0xf0] }
 0x106   :  { %v1166_v21 = vadd.f32 %v1165_v59, %v1137_v18 }
 0x107   :  { %v1196_v22 = vpop.f32.mrf.mxu1 }
 0x108   :  { %v1167_v19 = vpop.f32.mrf.mxu0  ;;  %v7391_v23 = vadd.f32 %v1194_v6, %v1166_v21  ;;  %v5936_v6 = vor.u32 %v6826_v5, %v5935_v0  ;;  %v6772_v21 = vld [vmem:[#allocation8 + $0x2b4] sm:$0xf0] }
 0x109   :  { %v6760_v5 = vld [vmem:[#allocation8 + $0x254] sm:$0xf0] }
 0x10a   :  { %3424 = vmatpush.bf16.msrb.mxu0 %v5936_v6  ;;  %v5863_v6 = vld [vmem:[#allocation8 + $0x3c0] sm:$0xf] }
 0x10b   :  { %v1109_v24 = vpop.f32.mrf.mxu2  ;;  %v1138_v26 = vpop.f32.mrf.mxu3 }
 0x10c   :  { %v7394_v25 = vadd.f32 %v1109_v24, %v7330_v16  ;;  %v1139_v27 = vadd.f32 %v1138_v26, %v7352_v29  ;;  %v6874_v26 = vld [vmem:[#allocation8 + $0x5e4] sm:$0xf0] }
 0x10e   :  { %v1168_v31 = vadd.f32 %v1167_v19, %v1139_v27  ;;  %v5719_v19 = vld [vmem:[#allocation8 + $0x2a0] sm:$0xf] }
 0x10f   :  { %v1199_v32 = vpop.f32.mrf.mxu1  ;;  %v5720_v24 = vor.u32 %v6772_v21, %v5719_v19  ;;  %v5911_v27 = vld [vmem:[#allocation8 + $0x420] sm:$0xf] }
 0x110   :  { %v1170_v30 = vpop.f32.mrf.mxu0  ;;  %1343 = vmatmul.bf16.gmra.mxu2 %v7271_v4  ;;  %v7398_v49 = vadd.f32 %v1196_v22, %v1168_v31  ;;  %1372 = vmatmul.bf16.gmra.mxu3 %v7297_v60  ;;  %v6127_v22 = vld [vmem:[#allocation8 + $0x5d0] sm:$0xf] }
 0x112   :  { %1430 = vmatmul.bf16.gmra.mxu1 %v7271_v4 }
 0x113   :  { %1401 = vmatmul.bf16.gmra.mxu0 %v7269_v62  ;;  %v1112_v20 = vpop.f32.mrf.mxu2  ;;  %v1141_v33 = vpop.f32.mrf.mxu3 }
 0x114   :  { %v7404_v16 = vadd.f32 %v1112_v20, %v7340_v28  ;;  %v1142_v35 = vadd.f32 %v1141_v33, %v7352_v29  ;;  %v5744_v28 = vor.u32 %v6778_v51, %v5743_v47  ;;  %v6718_v20 = vld [vmem:[#allocation8 + $0x104] sm:$0xf0]  ;;  %v5695_v33 = vld [vmem:[#allocation8 + $0x270] sm:$0xf]  ;;  %v6103_v47 = vld [vmem:[#allocation8 + $0x5a0] sm:$0xf] }
 0x116   :  { %v1171_v39 = vadd.f32 %v1170_v30, %v1142_v35  ;;  %3395 = vmatpush.bf16.msrb.mxu3 %v5744_v28  ;;  %v6820_v30 = vld [vmem:[#allocation8 + $0x434] sm:$0xf0] }
 0x117   :  { %v1201_v41 = vpop.f32.mrf.mxu1  ;;  %v6712_v28 = vld [vmem:[#allocation8 + $0xd4] sm:$0xf0] }
 0x118   :  { %v1172_v36 = vpop.f32.mrf.mxu0  ;;  %v7407_v43 = vadd.f32 %v1199_v32, %v1171_v39  ;;  %v5503_v32 = vld [vmem:[#allocation8 + $0xf0] sm:$0xf] }
 0x119   :  { %v5504_v35 = vor.u32 %v6718_v20, %v5503_v32  ;;  %v5887_v39 = vld [vmem:[#allocation8 + $0x3f0] sm:$0xf] }
 0x11a   :  { %8786 = vst [vmem:[#allocation20_spill] sm:$0xff] %v7407_v43  ;;  %3396 = vmatpush.bf16.msrb.mxu3 %v5720_v24  ;;  %v6706_v24 = vld [vmem:[#allocation8 + $0xa4] sm:$0xf0] }
 0x11b   :  { %v1114_v48 = vpop.f32.mrf.mxu2  ;;  %v1143_v54 = vpop.f32.mrf.mxu3 }
 0x11c   :  { %v7410_v53 = vadd.f32 %v1114_v48, %v7346_v1  ;;  %v1144_v56 = vadd.f32 %v1143_v54, %v7352_v29  ;;  %v5527_v29 = vld [vmem:[#allocation8 + $0x120] sm:$0xf]  ;;  %v6868_v48 = vld [vmem:[#allocation8 + $0x5b4] sm:$0xf0] }
 0x11d   :  { %v5528_v18 = vor.u32 %v6724_v13, %v5527_v29  ;;  %v6104_v51 = vor.u32 %v6868_v48, %v6103_v47  ;;  %v5479_v54 = vld [vmem:[#allocation8 + $0xc0] sm:$0xf]  ;;  %v6808_v29 = vld [vmem:[#allocation8 + $0x3d4] sm:$0xf0] }
 0x11e   :  { %8787 = vst [vmem:[#allocation21_spill] sm:$0xff] %v7410_v53  ;;  %v1173_v58 = vadd.f32 %v1172_v36, %v1144_v56  ;;  %v6766_v36 = vld [vmem:[#allocation8 + $0x284] sm:$0xf0]  ;;  %v5671_v56 = vld [vmem:[#allocation8 + $0x240] sm:$0xf]  ;;  %v5480_v0 = vor.u32 %v6712_v28, %v5479_v54 }
 0x11f   :  { %v7415_v59 = vpop.f32.mrf.mxu1  ;;  %3367 = vmatpush.bf16.msrb.mxu2 %v5528_v18  ;;  %v5696_v44 = vor.u32 %v6766_v36, %v5695_v33  ;;  %v5672_v13 = vor.u32 %v6760_v5, %v5671_v56  ;;  %v5864_v18 = vor.u32 %v6808_v29, %v5863_v6  ;;  %v6700_v36 = vld [vmem:[#allocation8 + $0x74] sm:$0xf0]  ;;  %v6694_v5 = vld [vmem:[#allocation8 + $0x44] sm:$0xf0]  ;;  %v5599_v6 = vld [vmem:[#allocation8 + $0x1b0] sm:$0xf] }
 0x120   :  { %v7413_v57 = vpop.f32.mrf.mxu0  ;;  %1444 = vmatmul.bf16.vlgmr.msra.gmra.mxu2 %v7279_v63  ;;  %v7418_v42 = vadd.f32 %v1201_v41, %v1173_v58  ;;  %1473 = vmatmul.bf16.vlgmr.msra.gmra.mxu3 %v7255_v2  ;;  %v6814_v41 = vld [vmem:[#allocation8 + $0x404] sm:$0xf0]  ;;  %v6796_v54 = vld [vmem:[#allocation8 + $0x374] sm:$0xf0] }
 0x121   :  { %v5888_v46 = vor.u32 %v6814_v41, %v5887_v39  ;;  %3397 = vmatpush.bf16.msrb.mxu3 %v5696_v44  ;;  %v5623_v39 = vld [vmem:[#allocation8 + $0x1e0] sm:$0xf]  ;;  %v6079_v44 = vld [vmem:[#allocation8 + $0x570] sm:$0xf] }
 0x122   :  { %8788 = vst [vmem:[#allocation22_spill] sm:$0xff] %v7418_v42  ;;  %1531 = vmatmul.bf16.vlgmr.msra.gmra.mxu1 %v7279_v63  ;;  %v5912_v63 = vor.u32 %v6820_v30, %v5911_v27  ;;  %v6754_v30 = vld [vmem:[#allocation8 + $0x224] sm:$0xf0] }
 0x123   :  { %1502 = vmatmul.bf16.vlgmr.msra.gmra.mxu0 %v7261_v11  ;;  %v7423_v1 = vpop.f32.mrf.mxu2  ;;  %v7425_v17 = vpop.f32.mrf.mxu3  ;;  %v6128_v11 = vor.u32 %v6874_v26, %v6127_v22  ;;  %3368 = vmatpush.bf16.msrb.mxu2 %v5504_v35  ;;  %v5455_v22 = vld [vmem:[#allocation8 + $0x90] sm:$0xf]  ;;  %v5431_v35 = vld [vmem:[#allocation8 + $0x60] sm:$0xf] }
 0x124   :  { %3425 = vmatpush.bf16.msrb.mxu0 %v5912_v63  ;;  %v5647_v26 = vld [vmem:[#allocation8 + $0x210] sm:$0xf]  ;;  %v5456_v27 = vor.u32 %v6706_v24, %v5455_v22  ;;  %v6802_v63 = vld [vmem:[#allocation8 + $0x3a4] sm:$0xf0]  ;;  %v5432_v47 = vor.u32 %v6700_v36, %v5431_v35  ;;  %v5575_v35 = vld [vmem:[#allocation8 + $0x180] sm:$0xf] }
 0x125   :  { %3453 = vmatpush.bf16.msrb.mxu1 %v6128_v11  ;;  %3398 = vmatpush.bf16.msrb.mxu3 %v5672_v13  ;;  %v5839_v11 = vld [vmem:[#allocation8 + $0x390] sm:$0xf]  ;;  %v5648_v32 = vor.u32 %v6754_v30, %v5647_v26  ;;  %v6742_v13 = vld [vmem:[#allocation8 + $0x1c4] sm:$0xf0]  ;;  %v6856_v30 = vld [vmem:[#allocation8 + $0x554] sm:$0xf0] }
 0x126   :  { %v5840_v20 = vor.u32 %v6802_v63, %v5839_v11  ;;  %v6790_v22 = vld [vmem:[#allocation8 + $0x344] sm:$0xf0]  ;;  %v5600_v24 = vor.u32 %v6742_v13, %v5599_v6 }
 0x127   :  { %v7429_v31 = vpop.f32.mrf.mxu1  ;;  %3369 = vmatpush.bf16.msrb.mxu2 %v5480_v0  ;;  %v5407_v0 = vld [vmem:[#allocation8 + $0x30] sm:$0xf] }
 0x128   :  { %v7427_v2 = vpop.f32.mrf.mxu0  ;;  %3426 = vmatpush.bf16.msrb.mxu0 %v5888_v46  ;;  %v6862_v46 = vld [vmem:[#allocation8 + $0x584] sm:$0xf0]  ;;  %v5408_v29 = vor.u32 %v6694_v5, %v5407_v0 }
 0x129   :  { %3454 = vmatpush.bf16.msrb.mxu1 %v6104_v51  ;;  %3399 = vmatpush.bf16.msrb.mxu3 %v5648_v32  ;;  %v6080_v48 = vor.u32 %v6862_v46, %v6079_v44  ;;  %v5815_v51 = vld [vmem:[#allocation8 + $0x360] sm:$0xf]  ;;  %v6736_v44 = vld [vmem:[#allocation8 + $0x194] sm:$0xf0]  ;;  %v6850_v0 = vld [vmem:[#allocation8 + $0x524] sm:$0xf0] }
 0x12a   :  { %v5383_v32 = vld [vmem:[#allocation8] sm:$0xf] }
 0x12b   :  { %v7431_v50 = vpop.f32.mrf.mxu2  ;;  %v7433_v58 = vpop.f32.mrf.mxu3  ;;  %3370 = vmatpush.bf16.msrb.mxu2 %v5456_v27  ;;  %v6055_v27 = vld [vmem:[#allocation8 + $0x540] sm:$0xf] }
 0x12c   :  { %3427 = vmatpush.bf16.msrb.mxu0 %v5864_v18  ;;  %v5791_v18 = vld [vmem:[#allocation8 + $0x330] sm:$0xf]  ;;  %v6056_v63 = vor.u32 %v6856_v30, %v6055_v27  ;;  %v5767_v46 = vld [vmem:[#allocation8 + $0x300] sm:$0xf]  ;;  %v7476_v30 = vperm.slane %v7311_v14, 2 }
 0x12d   :  { %3455 = vmatpush.bf16.msrb.mxu1 %v6080_v48  ;;  %v5792_v26 = vor.u32 %v6790_v22, %v5791_v18  ;;  %v6007_v18 = vld [vmem:[#allocation8 + $0x4e0] sm:$0xf]  ;;  %v6844_v22 = vld [vmem:[#allocation8 + $0x4f4] sm:$0xf0] }
 0x12f   :  { %v7437_v21 = vpop.f32.mrf.mxu1  ;;  %3371 = vmatpush.bf16.msrb.mxu2 %v5432_v47  ;;  %v6784_v47 = vld [vmem:[#allocation8 + $0x314] sm:$0xf0] }
 0x130   :  { %v7435_v19 = vpop.f32.mrf.mxu0  ;;  %1449 = vmatmul.bf16.gmra.mxu2 %v7285_v55  ;;  %1478 = vmatmul.bf16.gmra.mxu3 %v7267_v61  ;;  %v6748_v61 = vld [vmem:[#allocation8 + $0x1f4] sm:$0xf0]  ;;  %v5768_v48 = vor.u32 %v6784_v47, %v5767_v46  ;;  %v1214_v46 = vadd.f32 %v7423_v1, %v7476_v30 }
 0x131   :  { %3428 = vmatpush.bf16.msrb.mxu0 %v5840_v20  ;;  %v6688_v20 = vld [vmem:[#allocation8 + $0x14] sm:$0xf0]  ;;  %3456 = vmatpush.bf16.msrb.mxu1 %v6056_v63 }
 0x132   :  { %1536 = vmatmul.bf16.gmra.mxu1 %v7285_v55  ;;  %v5816_v55 = vor.u32 %v6796_v54, %v5815_v51 }
 0x133   :  { %1507 = vmatmul.bf16.gmra.mxu0 %v7273_v8  ;;  %v7443_v33 = vpop.f32.mrf.mxu2  ;;  %v7445_v41 = vpop.f32.mrf.mxu3  ;;  %v5624_v8 = vor.u32 %v6748_v61, %v5623_v39  ;;  %3372 = vmatpush.bf16.msrb.mxu2 %v5408_v29  ;;  %v5384_v39 = vor.u32 %v6688_v20, %v5383_v32  ;;  %v5576_v61 = vor.u32 %v6736_v44, %v5575_v35  ;;  %v5959_v35 = vld [vmem:[#allocation8 + $0x480] sm:$0xf] }
 0x134   :  { %v1216_v32 = vadd.f32 %v7431_v50, %v7476_v30 }
 0x135   :  { %3400 = vmatpush.bf16.msrb.mxu3 %v5624_v8  ;;  %3429 = vmatpush.bf16.msrb.mxu0 %v5816_v55  ;;  %v6031_v55 = vld [vmem:[#allocation8 + $0x510] sm:$0xf] }
 0x136   :  { %v6032_v6 = vor.u32 %v6850_v0, %v6031_v55  ;;  %v1245_v47 = vadd.f32 %v7433_v58, %v1216_v32 }
 0x137   :  { %v7449_v56 = vpop.f32.mrf.mxu1  ;;  %3373 = vmatpush.bf16.msrb.mxu2 %v5384_v39  ;;  %v6832_v39 = vld [vmem:[#allocation8 + $0x494] sm:$0xf0] }
 0x138   :  { %v7447_v28 = vpop.f32.mrf.mxu0  ;;  %3457 = vmatpush.bf16.msrb.mxu1 %v6032_v6  ;;  %v5960_v44 = vor.u32 %v6832_v39, %v5959_v35  ;;  %v7499_v0 = vadd.f32 %v7427_v2, %v1245_v47  ;;  %v6511_v6 = vld [vmem:[#allocation8 + $0x8d0] sm:$0xf]  ;;  %v7512_v2 = vperm.slane %v7311_v14, 4 }
 0x139   :  { %3401 = vmatpush.bf16.msrb.mxu3 %v5600_v24  ;;  %3430 = vmatpush.bf16.msrb.mxu0 %v5792_v26  ;;  %v6008_v24 = vor.u32 %v6844_v22, %v6007_v18  ;;  %v6970_v18 = vld [vmem:[#allocation8 + $0x8e4] sm:$0xf0]  ;;  %v8678_v22 = vmax.f32 %v7362_v40, 0.0 }
 0x13a   :  { %8789 = vst [vmem:[#allocation23_spill] sm:$0xff] %v7499_v0 }
 0x13b   :  { %v7451_v11 = vpop.f32.mrf.mxu2  ;;  %v7453_v36 = vpop.f32.mrf.mxu3 }
 0x13c   :  { %3458 = vmatpush.bf16.msrb.mxu1 %v6008_v24  ;;  %v6512_v24 = vor.u32 %v6970_v18, %v6511_v6  ;;  %v6727_v6 = vld [vmem:[#allocation8 + $0x154] sm:$0xf] }
 0x13d   :  { %3402 = vmatpush.bf16.msrb.mxu3 %v5576_v61  ;;  %3431 = vmatpush.bf16.msrb.mxu0 %v5768_v48  ;;  %v1243_v48 = vadd.f32 %v7425_v17, %v1214_v46  ;;  %v8675_v17 = vmax.f32 %v7366_v52, 0.0 }
 0x13f   :  { %v7457_v51 = vpop.f32.mrf.mxu1 }
 0x140   :  { %v7455_v8 = vpop.f32.mrf.mxu0  ;;  %1454 = vmatmul.bf16.gmra.mxu2 %v7291_v38  ;;  %1483 = vmatmul.bf16.gmra.mxu3 %v7257_v3 }
 0x141   :  { %3511 = vmatpush.bf16.msra.mxu3 %v6512_v24  ;;  %v1219_v24 = vadd.f32 %v7443_v33, %v7476_v30 }
 0x142   :  { %1541 = vmatmul.bf16.gmra.mxu1 %v7291_v38  ;;  %v6838_v38 = vld [vmem:[#allocation8 + $0x4c4] sm:$0xf0] }
 0x143   :  { %1512 = vmatmul.bf16.gmra.mxu0 %v7259_v7  ;;  %v7463_v54 = vpop.f32.mrf.mxu2  ;;  %v7465_v5 = vpop.f32.mrf.mxu3  ;;  %v5983_v7 = vld [vmem:[#allocation8 + $0x4b0] sm:$0xf]  ;;  %v1248_v52 = vadd.f32 %v7445_v41, %v1219_v24  ;;  %v6958_v24 = vld [vmem:[#allocation8 + $0x884] sm:$0xf0] }
 0x144   :  { %v5984_v27 = vor.u32 %v6838_v38, %v5983_v7  ;;  %v8676_v7 = vmax.f32 %v7499_v0, 0.0  ;;  %v6721_v0 = vld [vmem:[#allocation8 + $0x124] sm:$0xf]  ;;  %v6271_v41 = vld [vmem:[#allocation8 + $0x6f0] sm:$0xf] }
 0x146   :  { %3459 = vmatpush.bf16.msrb.mxu1 %v5984_v27  ;;  %v8680_v27 = vmax.f32 %v7356_v12, 0.0 }
 0x147   :  { %v7469_v13 = vpop.f32.mrf.mxu1 }
 0x148   :  { %v7467_v29 = vpop.f32.mrf.mxu0  ;;  %v7523_v39 = vpack.c.bf16 %v8678_v22, %v8680_v27  ;;  %v6775_v27 = vld [vmem:[#allocation8 + $0x2d4] sm:$0xf] }
 0x14a   :  { %3460 = vmatpush.bf16.msrb.mxu1 %v5960_v44  ;;  %8791 = vst [vmem:[#allocation25_spill] sm:$0xff] %v7523_v39 }
 0x14b   :  { %v7471_v3 = vpop.f32.mrf.mxu2  ;;  %v7473_v26 = vpop.f32.mrf.mxu3 }
 0x14f   :  { %v7482_v20 = vpop.f32.mrf.mxu1 }
 0x150   :  { %v7478_v63 = vpop.f32.mrf.mxu0  ;;  %1459 = vmatmul.bf16.gmra.mxu2 %v7297_v60  ;;  %1488 = vmatmul.bf16.gmra.mxu3 %v7269_v62  ;;  %v6319_v62 = vld [vmem:[#allocation8 + $0x750] sm:$0xf] }
 0x152   :  { %1546 = vmatmul.bf16.gmra.mxu1 %v7297_v60  ;;  %v7504_v60 = vadd.f32 %v7413_v57, %v1243_v48  ;;  %v8679_v57 = vmax.f32 %v7359_v34, 0.0  ;;  %v1221_v48 = vadd.f32 %v7451_v11, %v7476_v30  ;;  %v6295_v11 = vld [vmem:[#allocation8 + $0x720] sm:$0xf] }
 0x153   :  { %1517 = vmatmul.bf16.gmra.mxu0 %v7271_v4  ;;  %v7491_v61 = vpop.f32.mrf.mxu2  ;;  %v7493_v50 = vpop.f32.mrf.mxu3  ;;  %v6922_v4 = vld [vmem:[#allocation8 + $0x764] sm:$0xf0] }
 0x154   :  { %8790 = vst [vmem:[#allocation24_spill] sm:$0xff] %v7504_v60  ;;  %v6320_v58 = vor.u32 %v6922_v4, %v6319_v62  ;;  %v8677_v35 = vmax.f32 %v7504_v60, 0.0  ;;  %v7529_v46 = vpack.c.bf16 %v8675_v17, %v8679_v57  ;;  %v5529_v60 = vld [vmem:[#allocation8 + $0x138] sm:$0xf0] }
 0x155   :  { %v5532_v40 = vor.u32 %v6721_v0, %v5529_v60  ;;  %v7562_v0 = vadd.f32 %v7435_v19, %v1248_v52  ;;  %v6463_v60 = vld [vmem:[#allocation8 + $0x870] sm:$0xf]  ;;  %v6709_v52 = vld [vmem:[#allocation8 + $0xc4] sm:$0xf]  ;;  %v5481_v19 = vld [vmem:[#allocation8 + $0xd8] sm:$0xf0] }
 0x156   :  { %3482 = vmatpush.bf16.msra.mxu2 %v6320_v58  ;;  %8792 = vst [vmem:[#allocation26_spill] sm:$0xff] %v7529_v46  ;;  %v7535_v47 = vpack.c.bf16 %v8676_v7, %v8677_v35  ;;  %v5553_v58 = vld [vmem:[#allocation8 + $0x168] sm:$0xf0]  ;;  %v7548_v7 = vperm.slane %v7311_v14, 3  ;;  %v1250_v35 = vadd.f32 %v7453_v36, %v1221_v48 }
 0x157   :  { %v7501_v1 = vpop.f32.mrf.mxu1  ;;  %v5556_v18 = vor.u32 %v6727_v6, %v5553_v58  ;;  %v6487_v6 = vld [vmem:[#allocation8 + $0x8a0] sm:$0xf]  ;;  %v6964_v58 = vld [vmem:[#allocation8 + $0x8b4] sm:$0xf0]  ;;  %8795 = vst [vmem:[#allocation29_spill] sm:$0xff] %v7562_v0 }
 0x158   :  { %v7496_v55 = vpop.f32.mrf.mxu0  ;;  %8793 = vst [vmem:[#allocation27_spill] sm:$0xff] %v7535_v47  ;;  %v7557_v36 = vadd.f32 %v7447_v28, %v1250_v35  ;;  %v8689_v28 = vmax.f32 %v7378_v45, 0.0  ;;  %v1303_v35 = vadd.f32 %v7429_v31, %v7548_v7  ;;  %v5484_v31 = vor.u32 %v6709_v52, %v5481_v19 }
 0x159   :  { %3540 = vmatpush.bf16.msra.mxu0 %v5556_v18  ;;  %v1301_v18 = vadd.f32 %v7415_v59, %v7548_v7 }
 0x15a   :  { %8794 = vst [vmem:[#allocation28_spill] sm:$0xff] %v7557_v36 }
 0x15b   :  { %v7509_v38 = vpop.f32.mrf.mxu2  ;;  %v7515_v32 = vpop.f32.mrf.mxu3 }
 0x15d   :  { %3541 = vmatpush.bf16.msra.mxu0 %v5532_v40  ;;  %v5721_v40 = vld [vmem:[#allocation8 + $0x2b8] sm:$0xf0] }
 0x15f   :  { %v1416_v4 = vpop.f32.mrf.mxu1 }
 0x160   :  { %v1387_v44 = vpop.f32.mrf.mxu0  ;;  %3374 = vmatmul.bf16.vlgmr.msrb.gmra.mxu2 %v7523_v39  ;;  %3403 = vmatmul.bf16.vlgmr.msrb.gmra.mxu3 %v7529_v46 }
 0x161   :  { %v1388_v62 = vadd.f32 %v1387_v44, %v7512_v2  ;;  %v6916_v44 = vld [vmem:[#allocation8 + $0x734] sm:$0xf0] }
 0x162   :  { %v6296_v57 = vor.u32 %v6916_v44, %v6295_v11  ;;  %v6715_v11 = vld [vmem:[#allocation8 + $0xf4] sm:$0xf]  ;;  %v5505_v44 = vld [vmem:[#allocation8 + $0x108] sm:$0xf0] }
 0x163   :  { %v7543_v17 = vadd.f32 %v1416_v4, %v1388_v62  ;;  %3432 = vmatmul.bf16.vlgmr.msrb.gmra.mxu0 %v7535_v47  ;;  %v1329_v22 = vpop.f32.mrf.mxu2  ;;  %v1358_v33 = vpop.f32.mrf.mxu3  ;;  %v6488_v62 = vor.u32 %v6964_v58, %v6487_v6  ;;  %v5745_v4 = vld [vmem:[#allocation8 + $0x2e8] sm:$0xf0]  ;;  %v6769_v58 = vld [vmem:[#allocation8 + $0x2a4] sm:$0xf] }
 0x164   :  { %3483 = vmatpush.bf16.msra.mxu2 %v6296_v57  ;;  %v5748_v14 = vor.u32 %v6775_v27, %v5745_v4  ;;  %v1330_v6 = vadd.f32 %v1329_v22, %v1301_v18  ;;  %v6910_v57 = vld [vmem:[#allocation8 + $0x704] sm:$0xf0]  ;;  %v5508_v27 = vor.u32 %v6715_v11, %v5505_v44  ;;  %v8688_v4 = vmax.f32 %v7382_v10, 0.0 }
 0x165   :  { %3512 = vmatpush.bf16.msra.mxu3 %v6488_v62  ;;  %v6272_v59 = vor.u32 %v6910_v57, %v6271_v41  ;;  %v6464_v62 = vor.u32 %v6958_v24, %v6463_v60  ;;  %v8686_v22 = vmax.f32 %v7557_v36, 0.0  ;;  %v5724_v18 = vor.u32 %v6769_v58, %v5721_v40  ;;  %v6907_v36 = vld [vmem:[#allocation8 + $0x6f4] sm:$0xf] }
 0x166   :  { %3569 = vmatpush.bf16.msra.mxu1 %v5748_v14  ;;  %3542 = vmatpush.bf16.msra.mxu0 %v5508_v27  ;;  %v8691_v11 = vmax.f32 %v7372_v9, 0.0  ;;  %v7570_v44 = vadd.f32 %v1358_v33, %v1330_v6  ;;  %v8690_v60 = vmax.f32 %v7375_v37, 0.0  ;;  %v8687_v24 = vmax.f32 %v7562_v0, 0.0  ;;  %v6273_v0 = vld [vmem:[#allocation8 + $0x708] sm:$0xf0] }
 0x167   :  { %v7559_v48 = vpop.f32.mrf.mxu1 }
 0x168   :  { %v7554_v34 = vpop.f32.mrf.mxu0  ;;  %3484 = vmatpush.bf16.msra.mxu2 %v6272_v59  ;;  %8796 = vst [vmem:[#allocation30_spill] sm:$0xff] %v7570_v44  ;;  %v7578_v27 = vpack.c.bf16 %v8689_v28, %v8691_v11  ;;  %v7586_v33 = vpack.c.bf16 %v8688_v4, %v8690_v60  ;;  %v7592_v6 = vpack.c.bf16 %v8686_v22, %v8687_v24  ;;  %v8695_v52 = vmax.f32 %v7570_v44, 0.0  ;;  %v6439_v24 = vld [vmem:[#allocation8 + $0x840] sm:$0xf]  ;;  %v6697_v44 = vld [vmem:[#allocation8 + $0x64] sm:$0xf] }
 0x169   :  { %3513 = vmatpush.bf16.msra.mxu3 %v6464_v62 }
 0x16a   :  { %3570 = vmatpush.bf16.msra.mxu1 %v5724_v18  ;;  %8797 = vst [vmem:[#allocation31_spill] sm:$0xff] %v7578_v27  ;;  %3543 = vmatpush.bf16.msra.mxu0 %v5484_v31  ;;  %v5457_v18 = vld [vmem:[#allocation8 + $0xa8] sm:$0xf0]  ;;  %v6247_v31 = vld [vmem:[#allocation8 + $0x6c0] sm:$0xf] }
 0x16b   :  { %v1331_v14 = vpop.f32.mrf.mxu2  ;;  %v1360_v57 = vpop.f32.mrf.mxu3  ;;  %8799 = vst [vmem:[#allocation33_spill] sm:$0xff] %v7586_v33 }
 0x16c   :  { %v1332_v41 = vadd.f32 %v1331_v14, %v1303_v35  ;;  %8800 = vst [vmem:[#allocation34_spill] sm:$0xff] %v7592_v6  ;;  %v1226_v35 = vadd.f32 %v7471_v3, %v7476_v30  ;;  %v6703_v14 = vld [vmem:[#allocation8 + $0x94] sm:$0xf] }
 0x16e   :  { %v7580_v59 = vadd.f32 %v1360_v57, %v1332_v41  ;;  %v5460_v41 = vor.u32 %v6703_v14, %v5457_v18  ;;  %v1224_v57 = vadd.f32 %v7463_v54, %v7476_v30  ;;  %v1255_v14 = vadd.f32 %v7473_v26, %v1226_v35  ;;  %v6952_v54 = vld [vmem:[#allocation8 + $0x854] sm:$0xf0] }
 0x16f   :  { %v1421_v40 = vpop.f32.mrf.mxu1  ;;  %v6440_v60 = vor.u32 %v6952_v54, %v6439_v24  ;;  %v1306_v26 = vadd.f32 %v7437_v21, %v7548_v7  ;;  %v6691_v24 = vld [vmem:[#allocation8 + $0x34] sm:$0xf] }
 0x170   :  { %8798 = vst [vmem:[#allocation32_spill] sm:$0xff] %v7580_v59  ;;  %v1392_v58 = vpop.f32.mrf.mxu0  ;;  %v8694_v19 = vmax.f32 %v7580_v59, 0.0  ;;  %3379 = vmatmul.bf16.gmra.mxu2 %v7578_v27  ;;  %3408 = vmatmul.bf16.gmra.mxu3 %v7586_v33  ;;  %v5433_v59 = vld [vmem:[#allocation8 + $0x78] sm:$0xf0] }
 0x171   :  { %v1393_v62 = vadd.f32 %v1392_v58, %v7512_v2  ;;  %v6904_v58 = vld [vmem:[#allocation8 + $0x6d4] sm:$0xf0]  ;;  %3544 = vmatpush.bf16.msra.mxu0 %v5460_v41  ;;  %3514 = vmatpush.bf16.msra.mxu3 %v6440_v60  ;;  %v7620_v41 = vadd.f32 %v7467_v29, %v1255_v14  ;;  %v6757_v60 = vld [vmem:[#allocation8 + $0x244] sm:$0xf]  ;;  %v1308_v29 = vadd.f32 %v7449_v56, %v7548_v7 }
 0x172   :  { %v7610_v3 = vpack.c.bf16 %v8694_v19, %v8695_v52  ;;  %v6248_v4 = vor.u32 %v6904_v58, %v6247_v31  ;;  %v1253_v19 = vadd.f32 %v7465_v5, %v1224_v57  ;;  %v5436_v52 = vor.u32 %v6697_v44, %v5433_v59  ;;  %v5409_v58 = vld [vmem:[#allocation8 + $0x48] sm:$0xf0]  ;;  %v6898_v5 = vld [vmem:[#allocation8 + $0x6a4] sm:$0xf0]  ;;  %v6415_v59 = vld [vmem:[#allocation8 + $0x810] sm:$0xf] }
 0x173   :  { %v7602_v22 = vadd.f32 %v1421_v40, %v1393_v62  ;;  %3437 = vmatmul.bf16.gmra.mxu0 %v7592_v6  ;;  %v1334_v18 = vpop.f32.mrf.mxu2  ;;  %v6763_v62 = vld [vmem:[#allocation8 + $0x274] sm:$0xf]  ;;  %v5697_v40 = vld [vmem:[#allocation8 + $0x288] sm:$0xf0]  ;;  %v1363_v28 = vpop.f32.mrf.mxu3  ;;  %8802 = vst [vmem:[#allocation36_spill] sm:$0xff] %v7620_v41 }
 0x174   :  { %8801 = vst [vmem:[#allocation35_spill] sm:$0xff] %v7610_v3  ;;  %3461 = vmatmul.bf16.vlgmr.msrb.gmra.mxu1 %v7610_v3  ;;  %v5700_v11 = vor.u32 %v6763_v62, %v5697_v40  ;;  %3485 = vmatpush.bf16.msra.mxu2 %v6248_v4  ;;  %v1335_v54 = vadd.f32 %v1334_v18, %v1306_v26  ;;  %v6223_v62 = vld [vmem:[#allocation8 + $0x690] sm:$0xf]  ;;  %v6946_v57 = vld [vmem:[#allocation8 + $0x824] sm:$0xf0]  ;;  %v8698_v40 = vmax.f32 %v7398_v49, 0.0 }
 0x175   :  { %3545 = vmatpush.bf16.msra.mxu0 %v5436_v52  ;;  %v5412_v4 = vor.u32 %v6691_v24, %v5409_v58  ;;  %v7625_v44 = vadd.f32 %v7455_v8, %v1253_v19  ;;  %v6224_v21 = vor.u32 %v6898_v5, %v6223_v62  ;;  %v6416_v14 = vor.u32 %v6946_v57, %v6415_v59  ;;  %v5673_v52 = vld [vmem:[#allocation8 + $0x258] sm:$0xf0]  ;;  %v6685_v8 = vld [vmem:[#allocation8 + $0x4] sm:$0xf] }
 0x176   :  { %3571 = vmatpush.bf16.msra.mxu1 %v5700_v11  ;;  %v8696_v18 = vmax.f32 %v7620_v41, 0.0  ;;  %v5676_v24 = vor.u32 %v6757_v60, %v5673_v52  ;;  %v5385_v19 = vld [vmem:[#allocation8 + $0x18] sm:$0xf0]  ;;  %v8702_v58 = vmax.f32 %v7388_v15, 0.0  ;;  %v7633_v62 = vadd.f32 %v1363_v28, %v1335_v54 }
 0x177   :  { %v7622_v31 = vpop.f32.mrf.mxu1  ;;  %8803 = vst [vmem:[#allocation37_spill] sm:$0xff] %v7625_v44  ;;  %3515 = vmatpush.bf16.msra.mxu3 %v6416_v14  ;;  %v5388_v56 = vor.u32 %v6685_v8, %v5385_v19  ;;  %v8699_v59 = vmax.f32 %v7391_v23, 0.0  ;;  %v8697_v57 = vmax.f32 %v7625_v44, 0.0  ;;  %v1231_v60 = vadd.f32 %v7509_v38, %v7476_v30 }
 0x178   :  { %v7617_v35 = vpop.f32.mrf.mxu0  ;;  %3486 = vmatpush.bf16.msra.mxu2 %v6224_v21  ;;  %8804 = vst [vmem:[#allocation38_spill] sm:$0xff] %v7633_v62  ;;  %v8805_v21 = vmax.f32 %v7394_v25, 0.0  ;;  %v8701_v38 = vmax.f32 %v7633_v62, 0.0 }
 0x179   :  { %3546 = vmatpush.bf16.msra.mxu0 %v5412_v4  ;;  %v7657_v14 = vpack.c.bf16 %v8696_v18, %v8697_v57  ;;  %v1260_v19 = vadd.f32 %v7515_v32, %v1231_v60  ;;  %v1311_v60 = vadd.f32 %v7457_v51, %v7548_v7  ;;  %v6886_v51 = vld [vmem:[#allocation8 + $0x644] sm:$0xf0] }
 0x17a   :  { %3572 = vmatpush.bf16.msra.mxu1 %v5676_v24  ;;  %v7641_v4 = vpack.c.bf16 %v8805_v21, %v8702_v58  ;;  %v1229_v24 = vadd.f32 %v7491_v61, %v7476_v30  ;;  %v6892_v21 = vld [vmem:[#allocation8 + $0x674] sm:$0xf0]  ;;  %v6751_v61 = vld [vmem:[#allocation8 + $0x214] sm:$0xf]  ;;  %v5625_v58 = vld [vmem:[#allocation8 + $0x1f8] sm:$0xf0] }
 0x17b   :  { %v1336_v26 = vpop.f32.mrf.mxu2  ;;  %v1365_v11 = vpop.f32.mrf.mxu3  ;;  %8808 = vst [vmem:[#allocation41_spill] sm:$0xff] %v7657_v14  ;;  %v6940_v30 = vld [vmem:[#allocation8 + $0x7f4] sm:$0xf0] }
 0x17c   :  { %v1337_v5 = vadd.f32 %v1336_v26, %v1308_v29  ;;  %8806 = vst [vmem:[#allocation39_spill] sm:$0xff] %v7641_v4  ;;  %v7651_v29 = vpack.c.bf16 %v8698_v40, %v8699_v59  ;;  %v1258_v32 = vadd.f32 %v7493_v50, %v1229_v24  ;;  %v1313_v24 = vadd.f32 %v7469_v13, %v7548_v7 }
 0x17d   :  { %3547 = vmatpush.bf16.msra.mxu0 %v5388_v56  ;;  %v6199_v56 = vld [vmem:[#allocation8 + $0x660] sm:$0xf] }
 0x17e   :  { %v7645_v28 = vadd.f32 %v1365_v11, %v1337_v5  ;;  %v6200_v57 = vor.u32 %v6892_v21, %v6199_v56  ;;  %v6745_v21 = vld [vmem:[#allocation8 + $0x1e4] sm:$0xf]  ;;  %v7689_v50 = vadd.f32 %v7478_v63, %v1258_v32 }
 0x17f   :  { %v1426_v26 = vpop.f32.mrf.mxu1 }
 0x180   :  { %8807 = vst [vmem:[#allocation40_spill] sm:$0xff] %v7645_v28  ;;  %v1397_v54 = vpop.f32.mrf.mxu0  ;;  %v8700_v11 = vmax.f32 %v7645_v28, 0.0  ;;  %3384 = vmatmul.bf16.gmra.mxu2 %v7641_v4  ;;  %3413 = vmatmul.bf16.gmra.mxu3 %v7651_v29  ;;  %v8705_v13 = vmax.f32 %v7689_v50, 0.0 }
 0x181   :  { %v1398_v52 = vadd.f32 %v1397_v54, %v7512_v2  ;;  %v6391_v54 = vld [vmem:[#allocation8 + $0x7e0] sm:$0xf]  ;;  %3487 = vmatpush.bf16.msra.mxu2 %v6200_v57  ;;  %8811 = vst [vmem:[#allocation44_spill] sm:$0xff] %v7689_v50  ;;  %v6175_v57 = vld [vmem:[#allocation8 + $0x630] sm:$0xf] }
 0x182   :  { %v7674_v5 = vpack.c.bf16 %v8700_v11, %v8701_v38  ;;  %v6392_v40 = vor.u32 %v6940_v30, %v6391_v54  ;;  %v7681_v11 = vadd.f32 %v7496_v55, %v1260_v19  ;;  %v5628_v54 = vor.u32 %v6745_v21, %v5625_v58  ;;  %v6739_v58 = vld [vmem:[#allocation8 + $0x1b4] sm:$0xf]  ;;  %v5601_v55 = vld [vmem:[#allocation8 + $0x1c8] sm:$0xf0] }
 0x183   :  { %v7665_v8 = vadd.f32 %v1426_v26, %v1398_v52  ;;  %3442 = vmatmul.bf16.gmra.mxu0 %v7657_v14  ;;  %v1339_v18 = vpop.f32.mrf.mxu2  ;;  %v5649_v52 = vld [vmem:[#allocation8 + $0x228] sm:$0xf0]  ;;  %v1368_v26 = vpop.f32.mrf.mxu3  ;;  %v8706_v30 = vmax.f32 %v7407_v43, 0.0  ;;  %v6859_v43 = vld [vmem:[#allocation8 + $0x574] sm:$0xf] }
 0x184   :  { %8809 = vst [vmem:[#allocation42_spill] sm:$0xff] %v7674_v5  ;;  %3466 = vmatmul.bf16.gmra.mxu1 %v7674_v5  ;;  %v5652_v59 = vor.u32 %v6751_v61, %v5649_v52  ;;  %3516 = vmatpush.bf16.msra.mxu3 %v6392_v40  ;;  %v1340_v28 = vadd.f32 %v1339_v18, %v1311_v60  ;;  %v6367_v61 = vld [vmem:[#allocation8 + $0x7b0] sm:$0xf]  ;;  %v6934_v18 = vld [vmem:[#allocation8 + $0x7c4] sm:$0xf0]  ;;  %v8709_v52 = vmax.f32 %v7404_v16, 0.0 }
 0x185   :  { %8810 = vst [vmem:[#allocation43_spill] sm:$0xff] %v7681_v11  ;;  %v6368_v21 = vor.u32 %v6934_v18, %v6367_v61  ;;  %v6151_v40 = vld [vmem:[#allocation8 + $0x600] sm:$0xf] }
 0x186   :  { %3573 = vmatpush.bf16.msra.mxu1 %v5652_v59  ;;  %v6176_v59 = vor.u32 %v6886_v51, %v6175_v57  ;;  %v7696_v60 = vadd.f32 %v1368_v26, %v1340_v28  ;;  %v6880_v57 = vld [vmem:[#allocation8 + $0x614] sm:$0xf0]  ;;  %v8813_v51 = vmax.f32 %v7410_v53, 0.0 }
 0x187   :  { %v7685_v56 = vpop.f32.mrf.mxu1 }
 0x188   :  { %v7683_v38 = vpop.f32.mrf.mxu0  ;;  %8812 = vst [vmem:[#allocation45_spill] sm:$0xff] %v7696_v60  ;;  %3488 = vmatpush.bf16.msra.mxu2 %v6176_v59  ;;  %v7704_v62 = vpack.c.bf16 %v8813_v51, %v8709_v52  ;;  %3517 = vmatpush.bf16.msra.mxu3 %v6368_v21  ;;  %v8815_v59 = vmax.f32 %v7418_v42, 0.0 }
 0x18a   :  { %3574 = vmatpush.bf16.msra.mxu1 %v5628_v54  ;;  %v5604_v54 = vor.u32 %v6739_v58, %v5601_v55  ;;  %v8816_v55 = vmax.f32 %v7681_v11, 0.0 }
 0x18b   :  { %v1341_v19 = vpop.f32.mrf.mxu2  ;;  %v1370_v32 = vpop.f32.mrf.mxu3 }
 0x18c   :  { %v1342_v63 = vadd.f32 %v1341_v19, %v1313_v24  ;;  %v6152_v24 = vor.u32 %v6880_v57, %v6151_v40  ;;  %v7712_v19 = vpack.c.bf16 %v8815_v59, %v8706_v30  ;;  %v7718_v61 = vpack.c.bf16 %v8816_v55, %v8705_v13  ;;  %v6343_v59 = vld [vmem:[#allocation8 + $0x780] sm:$0xf]  ;;  %v6928_v55 = vld [vmem:[#allocation8 + $0x794] sm:$0xf0] }
 0x18d   :  { %v8708_v40 = vmax.f32 %v7696_v60, 0.0  ;;  %v6129_v60 = vld [vmem:[#allocation8 + $0x5e8] sm:$0xf0] }
 0x18e   :  { %v7706_v28 = vadd.f32 %v1370_v32, %v1342_v63  ;;  %8817 = vst [vmem:[#allocation47_spill] sm:$0xff] %v7718_v61  ;;  %3575 = vmatpush.bf16.msra.mxu1 %v5604_v54  ;;  %v6733_v63 = vld [vmem:[#allocation8 + $0x184] sm:$0xf]  ;;  %v5577_v32 = vld [vmem:[#allocation8 + $0x198] sm:$0xf0]  ;;  %3489 = vmatpush.bf16.msra.mxu2 %v6152_v24 }
 0x18f   :  { %v1431_v58 = vpop.f32.mrf.mxu1  ;;  %v5580_v57 = vor.u32 %v6733_v63, %v5577_v32  ;;  %v6823_v24 = vld [vmem:[#allocation8 + $0x454] sm:$0xf] }
 0x190   :  { %8814 = vst [vmem:[#allocation46_spill] sm:$0xff] %v7706_v28  ;;  %v1402_v26 = vpop.f32.mrf.mxu0  ;;  %v8707_v21 = vmax.f32 %v7706_v28, 0.0  ;;  %3389 = vmatmul.bf16.gmra.mxu2 %v7704_v62  ;;  %3418 = vmatmul.bf16.gmra.mxu3 %v7712_v19 }
 0x191   :  { %v1403_v18 = vadd.f32 %v1402_v26, %v7512_v2  ;;  %v6344_v26 = vor.u32 %v6928_v55, %v6343_v59  ;;  %v5937_v59 = vld [vmem:[#allocation8 + $0x468] sm:$0xf0]  ;;  %v6871_v55 = vld [vmem:[#allocation8 + $0x5d4] sm:$0xf] }
 0x192   :  { %v7732_v54 = vpack.c.bf16 %v8707_v21, %v8708_v40  ;;  %3576 = vmatpush.bf16.msra.mxu1 %v5580_v57  ;;  %v1318_v21 = vadd.f32 %v7501_v1, %v7548_v7  ;;  %v6132_v11 = vor.u32 %v6871_v55, %v6129_v60  ;;  %v7030_v60 = vld [vmem:[#allocation7] sm:$0x3f]  ;;  %v6865_v55 = vld [vmem:[#allocation8 + $0x5a4] sm:$0xf] }
 0x193   :  { %v7724_v51 = vadd.f32 %v1431_v58, %v1403_v18  ;;  %3447 = vmatmul.bf16.gmra.mxu0 %v7718_v61  ;;  %v1344_v13 = vpop.f32.mrf.mxu2  ;;  %v1373_v30 = vpop.f32.mrf.mxu3  ;;  %3518 = vmatpush.bf16.msra.mxu3 %v6344_v26  ;;  %v1316_v18 = vadd.f32 %v7482_v20, %v7548_v7  ;;  %v5940_v26 = vor.u32 %v6823_v24, %v5937_v59  ;;  %v6817_v24 = vld [vmem:[#allocation8 + $0x424] sm:$0xf]  ;;  %v5913_v59 = vld [vmem:[#allocation8 + $0x438] sm:$0xf0] }
 0x194   :  { %3471 = vmatmul.bf16.gmra.mxu1 %v7732_v54 }
 0x195   :  { %v1345_v32 = vadd.f32 %v1344_v13, %v1316_v18  ;;  %3598 = vmatpush.bf16.msrb.mxu2 %v5940_v26  ;;  %v6919_v13 = vld [vmem:[#allocation8 + $0x754] sm:$0xf]  ;;  %v6321_v18 = vld [vmem:[#allocation8 + $0x768] sm:$0xf0]  ;;  %v1390_v26 = vadd.f32 %v7554_v34, %v7512_v2 }
 0x196   :  { %v6324_v44 = vor.u32 %v6919_v13, %v6321_v18  ;;  %v5916_v18 = vor.u32 %v6817_v24, %v5913_v59  ;;  %v6811_v59 = vld [vmem:[#allocation8 + $0x3f4] sm:$0xf] }
 0x197   :  { %v7739_v63 = vpop.f32.mrf.mxu1  ;;  %v7743_v57 = vadd.f32 %v1373_v30, %v1345_v32  ;;  %3627 = vmatpush.bf16.msrb.mxu3 %v6132_v11  ;;  %v6913_v11 = vld [vmem:[#allocation8 + $0x724] sm:$0xf]  ;;  %v1419_v42 = vadd.f32 %v7559_v48, %v1390_v26  ;;  %v6489_v48 = vld [vmem:[#allocation8 + $0x8b8] sm:$0xf0] }
 0x198   :  { %v7737_v58 = vpop.f32.mrf.mxu0  ;;  %3656 = vmatpush.bf16.msrb.mxu0 %v6324_v44  ;;  %v6967_v44 = vld [vmem:[#allocation8 + $0x8d4] sm:$0xf] }
 0x199   :  { %8818 = vst [vmem:[#allocation48_spill] sm:$0xff] %v7743_v57  ;;  %v8717_v1 = vmax.f32 %v7743_v57, 0.0  ;;  %v6513_v57 = vld [vmem:[#allocation8 + $0x8e8] sm:$0xf0]  ;;  %3599 = vmatpush.bf16.msrb.mxu2 %v5916_v18 }
 0x19a   :  { %v6081_v18 = vld [vmem:[#allocation8 + $0x588] sm:$0xf0] }
 0x19b   :  { %v1346_v40 = vpop.f32.mrf.mxu2  ;;  %v1375_v28 = vpop.f32.mrf.mxu3 }
 0x19c   :  { %v1347_v52 = vadd.f32 %v1346_v40, %v1318_v21  ;;  %v6297_v40 = vld [vmem:[#allocation8 + $0x738] sm:$0xf0] }
 0x19d   :  { %v6300_v32 = vor.u32 %v6913_v11, %v6297_v40  ;;  %v6516_v11 = vor.u32 %v6967_v44, %v6513_v57  ;;  %v6276_v40 = vor.u32 %v6907_v36, %v6273_v0  ;;  %v6961_v57 = vld [vmem:[#allocation8 + $0x8a4] sm:$0xf]  ;;  %v6084_v0 = vor.u32 %v6859_v43, %v6081_v18  ;;  %v6201_v18 = vld [vmem:[#allocation8 + $0x678] sm:$0xf0] }
 0x19e   :  { %v7745_v20 = vadd.f32 %v1375_v28, %v1347_v52  ;;  %v7756_v28 = vperm.slane %v7030_v60, 5  ;;  %v6492_v44 = vor.u32 %v6961_v57, %v6489_v48  ;;  %v5865_v48 = vld [vmem:[#allocation8 + $0x3d8] sm:$0xf0] }
 0x19f   :  { %v1532_v41 = vpop.f32.mrf.mxu1  ;;  %3657 = vmatpush.bf16.msrb.mxu0 %v6300_v32  ;;  %3685 = vmatpush.bf16.msrb.mxu1 %v6516_v11 }
 0x1a0   :  { %8819 = vst [vmem:[#allocation49_spill] sm:$0xff] %v7745_v20  ;;  %v1503_v50 = vpop.f32.mrf.mxu0  ;;  %v8716_v7 = vmax.f32 %v7745_v20, 0.0 }
 0x1a2   :  { %v7754_v30 = vpack.c.bf16 %v8716_v7, %v8717_v1  ;;  %v6105_v7 = vld [vmem:[#allocation8 + $0x5b8] sm:$0xf0] }
 0x1a3   :  { %3548 = vmatmul.bf16.vlgmr.msra.gmra.mxu0 %v7523_v39  ;;  %v1445_v52 = vpop.f32.mrf.mxu2  ;;  %v1474_v21 = vpop.f32.mrf.mxu3  ;;  %v6108_v20 = vor.u32 %v6865_v55, %v6105_v7  ;;  %3686 = vmatpush.bf16.msrb.mxu1 %v6492_v44 }
 0x1a4   :  { %8820 = vst [vmem:[#allocation50_spill] sm:$0xff] %v7754_v30  ;;  %3476 = vmatmul.bf16.gmra.mxu1 %v7754_v30  ;;  %v1475_v60 = vadd.f32 %v1474_v21, %v7756_v28  ;;  %v7764_v34 = vadd.f32 %v1445_v52, %v7543_v17  ;;  %3658 = vmatpush.bf16.msrb.mxu0 %v6276_v40  ;;  %v5889_v21 = vld [vmem:[#allocation8 + $0x408] sm:$0xf0]  ;;  %v6249_v17 = vld [vmem:[#allocation8 + $0x6d8] sm:$0xf0] }
 0x1a5   :  { %3628 = vmatpush.bf16.msrb.mxu3 %v6108_v20  ;;  %v5892_v55 = vor.u32 %v6811_v59, %v5889_v21  ;;  %v6901_v20 = vld [vmem:[#allocation8 + $0x6c4] sm:$0xf]  ;;  %v6225_v59 = vld [vmem:[#allocation8 + $0x6a8] sm:$0xf0] }
 0x1a6   :  { %8821 = vst [vmem:[#allocation51_spill] sm:$0xff] %v7764_v34  ;;  %v1504_v24 = vadd.f32 %v1503_v50, %v1475_v60  ;;  %v8728_v52 = vmax.f32 %v7764_v34, 0.0  ;;  %v6847_v34 = vld [vmem:[#allocation8 + $0x514] sm:$0xf] }
 0x1a7   :  { %v1534_v1 = vpop.f32.mrf.mxu1  ;;  %3600 = vmatpush.bf16.msrb.mxu2 %v5892_v55  ;;  %v6889_v55 = vld [vmem:[#allocation8 + $0x664] sm:$0xf] }
 0x1a8   :  { %v1505_v13 = vpop.f32.mrf.mxu0  ;;  %v7771_v60 = vadd.f32 %v1532_v41, %v1504_v24 }
 0x1a9   :  { %3629 = vmatpush.bf16.msrb.mxu3 %v6084_v0  ;;  %v6805_v0 = vld [vmem:[#allocation8 + $0x3c4] sm:$0xf] }
 0x1aa   :  { %8823 = vst [vmem:[#allocation53_spill] sm:$0xff] %v7771_v60  ;;  %v8727_v41 = vmax.f32 %v7771_v60, 0.0  ;;  %v5841_v60 = vld [vmem:[#allocation8 + $0x3a8] sm:$0xf0] }
 0x1ab   :  { %v1447_v32 = vpop.f32.mrf.mxu2  ;;  %v1476_v7 = vpop.f32.mrf.mxu3 }
 0x1ac   :  { %v7766_v53 = vadd.f32 %v1447_v32, %v1419_v42  ;;  %v1477_v36 = vadd.f32 %v1476_v7, %v7756_v28  ;;  %v6252_v42 = vor.u32 %v6901_v20, %v6249_v17  ;;  %v6895_v32 = vld [vmem:[#allocation8 + $0x694] sm:$0xf]  ;;  %v6853_v20 = vld [vmem:[#allocation8 + $0x544] sm:$0xf]  ;;  %v1395_v17 = vadd.f32 %v7617_v35, %v7512_v2 }
 0x1ad   :  { %v6228_v21 = vor.u32 %v6895_v32, %v6225_v59  ;;  %v6955_v32 = vld [vmem:[#allocation8 + $0x874] sm:$0xf] }
 0x1ae   :  { %8822 = vst [vmem:[#allocation52_spill] sm:$0xff] %v7766_v53  ;;  %v8725_v50 = vmax.f32 %v7766_v53, 0.0  ;;  %v1506_v11 = vadd.f32 %v1505_v13, %v1477_v36  ;;  %3659 = vmatpush.bf16.msrb.mxu0 %v6252_v42  ;;  %v6204_v36 = vor.u32 %v6889_v55, %v6201_v18  ;;  %v5868_v42 = vor.u32 %v6805_v0, %v5865_v48  ;;  %v6465_v55 = vld [vmem:[#allocation8 + $0x888] sm:$0xf0]  ;;  %v6883_v18 = vld [vmem:[#allocation8 + $0x634] sm:$0xf] }
 0x1af   :  { %v7773_v40 = vpop.f32.mrf.mxu1  ;;  %v1424_v35 = vadd.f32 %v7622_v31, %v1395_v17  ;;  %v6441_v31 = vld [vmem:[#allocation8 + $0x858] sm:$0xf0]  ;;  %v6877_v17 = vld [vmem:[#allocation8 + $0x604] sm:$0xf] }
 0x1b0   :  { %v1508_v26 = vpop.f32.mrf.mxu0  ;;  %v7779_v43 = vpack.c.bf16 %v8725_v50, %v8728_v52  ;;  %v7781_v7 = vadd.f32 %v1534_v1, %v1506_v11  ;;  %v6057_v11 = vld [vmem:[#allocation8 + $0x558] sm:$0xf0]  ;;  %v6177_v50 = vld [vmem:[#allocation8 + $0x648] sm:$0xf0]  ;;  %3601 = vmatpush.bf16.msrb.mxu2 %v5868_v42 }
 0x1b1   :  { %v6180_v52 = vor.u32 %v6883_v18, %v6177_v50  ;;  %v6033_v42 = vld [vmem:[#allocation8 + $0x528] sm:$0xf0]  ;;  %v6943_v18 = vld [vmem:[#allocation8 + $0x814] sm:$0xf] }
 0x1b2   :  { %8824 = vst [vmem:[#allocation54_spill] sm:$0xff] %v7781_v7  ;;  %3490 = vmatmul.bf16.vlgmr.msra.gmra.mxu2 %v7779_v43  ;;  %v8726_v13 = vmax.f32 %v7781_v7, 0.0  ;;  %3660 = vmatpush.bf16.msrb.mxu0 %v6228_v21  ;;  %v6060_v21 = vor.u32 %v6853_v20, %v6057_v11  ;;  %v6799_v7 = vld [vmem:[#allocation8 + $0x394] sm:$0xf] }
 0x1b3   :  { %3553 = vmatmul.bf16.gmra.mxu0 %v7578_v27  ;;  %v1450_v24 = vpop.f32.mrf.mxu2  ;;  %v1479_v57 = vpop.f32.mrf.mxu3  ;;  %v5844_v53 = vor.u32 %v6799_v7, %v5841_v60 }
 0x1b4   :  { %3577 = vmatmul.bf16.vlgmr.msra.gmra.mxu1 %v7529_v46  ;;  %v7792_v1 = vpack.c.bf16 %v8726_v13, %v8727_v41  ;;  %v1480_v59 = vadd.f32 %v1479_v57, %v7756_v28  ;;  %v6468_v41 = vor.u32 %v6955_v32, %v6465_v55  ;;  %3630 = vmatpush.bf16.msrb.mxu3 %v6060_v21  ;;  %v6949_v32 = vld [vmem:[#allocation8 + $0x844] sm:$0xf] }
 0x1b5   :  { %v7800_v0 = vadd.f32 %v1450_v24, %v7602_v22  ;;  %v6153_v22 = vld [vmem:[#allocation8 + $0x618] sm:$0xf0]  ;;  %3602 = vmatpush.bf16.msrb.mxu2 %v5844_v53 }
 0x1b6   :  { %3519 = vmatmul.bf16.vlgmr.msra.gmra.mxu3 %v7792_v1  ;;  %3661 = vmatpush.bf16.msrb.mxu0 %v6204_v36  ;;  %v1509_v48 = vadd.f32 %v1508_v26, %v1480_v59  ;;  %v6036_v36 = vor.u32 %v6847_v34, %v6033_v42  ;;  %v6444_v59 = vor.u32 %v6949_v32, %v6441_v31  ;;  %v5817_v42 = vld [vmem:[#allocation8 + $0x378] sm:$0xf0]  ;;  %v6841_v32 = vld [vmem:[#allocation8 + $0x4e4] sm:$0xf] }
 0x1b7   :  { %v1539_v13 = vpop.f32.mrf.mxu1  ;;  %8825 = vst [vmem:[#allocation55_spill] sm:$0xff] %v7800_v0  ;;  %3687 = vmatpush.bf16.msrb.mxu1 %v6468_v41  ;;  %v8736_v41 = vmax.f32 %v7800_v0, 0.0  ;;  %v6156_v21 = vor.u32 %v6877_v17, %v6153_v22  ;;  %v6009_v17 = vld [vmem:[#allocation8 + $0x4f8] sm:$0xf0]  ;;  %v6787_v22 = vld [vmem:[#allocation8 + $0x334] sm:$0xf] }
 0x1b8   :  { %v1510_v44 = vpop.f32.mrf.mxu0  ;;  %v7808_v60 = vadd.f32 %v7773_v40, %v1509_v48  ;;  %3631 = vmatpush.bf16.msrb.mxu3 %v6036_v36 }
 0x1ba   :  { %3662 = vmatpush.bf16.msrb.mxu0 %v6180_v52  ;;  %8827 = vst [vmem:[#allocation57_spill] sm:$0xff] %v7808_v60  ;;  %v8734_v40 = vmax.f32 %v7808_v60, 0.0 }
 0x1bb   :  { %v1452_v57 = vpop.f32.mrf.mxu2  ;;  %v1481_v11 = vpop.f32.mrf.mxu3  ;;  %3688 = vmatpush.bf16.msrb.mxu1 %v6444_v59 }
 0x1bc   :  { %v7802_v20 = vadd.f32 %v1452_v57, %v1424_v35  ;;  %v1482_v50 = vadd.f32 %v1481_v11, %v7756_v28  ;;  %v6417_v35 = vld [vmem:[#allocation8 + $0x828] sm:$0xf0]  ;;  %v6793_v11 = vld [vmem:[#allocation8 + $0x364] sm:$0xf] }
 0x1bd   :  { %v6420_v57 = vor.u32 %v6943_v18, %v6417_v35  ;;  %v5820_v31 = vor.u32 %v6793_v11, %v5817_v42  ;;  %v6835_v18 = vld [vmem:[#allocation8 + $0x4b4] sm:$0xf]  ;;  %v5985_v35 = vld [vmem:[#allocation8 + $0x4c8] sm:$0xf0] }
 0x1be   :  { %8826 = vst [vmem:[#allocation56_spill] sm:$0xff] %v7802_v20  ;;  %v8735_v26 = vmax.f32 %v7802_v20, 0.0  ;;  %v1511_v7 = vadd.f32 %v1510_v44, %v1482_v50  ;;  %3663 = vmatpush.bf16.msrb.mxu0 %v6156_v21  ;;  %v1400_v50 = vadd.f32 %v7683_v38, %v7512_v2  ;;  %v6012_v21 = vor.u32 %v6841_v32, %v6009_v17  ;;  %v6369_v32 = vld [vmem:[#allocation8 + $0x7c8] sm:$0xf0] }
 0x1bf   :  { %v1542_v53 = vpop.f32.mrf.mxu1  ;;  %3689 = vmatpush.bf16.msrb.mxu1 %v6420_v57  ;;  %3603 = vmatpush.bf16.msrb.mxu2 %v5820_v31 }
 0x1c0   :  { %v1513_v24 = vpop.f32.mrf.mxu0  ;;  %v7814_v34 = vpack.c.bf16 %v8735_v26, %v8736_v41  ;;  %v7816_v52 = vadd.f32 %v1539_v13, %v1511_v7  ;;  %v5793_v7 = vld [vmem:[#allocation8 + $0x348] sm:$0xf0]  ;;  %v6393_v26 = vld [vmem:[#allocation8 + $0x7f8] sm:$0xf0]  ;;  %3632 = vmatpush.bf16.msrb.mxu3 %v6012_v21  ;;  %v5988_v41 = vor.u32 %v6835_v18, %v5985_v35  ;;  %v1429_v11 = vadd.f32 %v7685_v56, %v1400_v50  ;;  %v6829_v50 = vld [vmem:[#allocation8 + $0x484] sm:$0xf] }
 0x1c2   :  { %8828 = vst [vmem:[#allocation58_spill] sm:$0xff] %v7816_v52  ;;  %3495 = vmatmul.bf16.gmra.mxu2 %v7814_v34  ;;  %v8733_v44 = vmax.f32 %v7816_v52, 0.0  ;;  %v6931_v52 = vld [vmem:[#allocation8 + $0x7b4] sm:$0xf] }
 0x1c3   :  { %3558 = vmatmul.bf16.gmra.mxu0 %v7641_v4  ;;  %v1455_v55 = vpop.f32.mrf.mxu2  ;;  %v1484_v48 = vpop.f32.mrf.mxu3 }
 0x1c4   :  { %3582 = vmatmul.bf16.gmra.mxu1 %v7586_v33  ;;  %v7827_v13 = vpack.c.bf16 %v8733_v44, %v8734_v40  ;;  %v1485_v59 = vadd.f32 %v1484_v48, %v7756_v28  ;;  %v5796_v44 = vor.u32 %v6787_v22, %v5793_v7  ;;  %v6937_v40 = vld [vmem:[#allocation8 + $0x7e4] sm:$0xf]  ;;  %v7835_v57 = vadd.f32 %v1455_v55, %v7665_v8 }
 0x1c5   :  { %v6396_v38 = vor.u32 %v6937_v40, %v6393_v26  ;;  %v6372_v22 = vor.u32 %v6931_v52, %v6369_v32  ;;  %3633 = vmatpush.bf16.msrb.mxu3 %v5988_v41  ;;  %v6781_v26 = vld [vmem:[#allocation8 + $0x304] sm:$0xf]  ;;  %v5769_v40 = vld [vmem:[#allocation8 + $0x318] sm:$0xf0] }
 0x1c6   :  { %3524 = vmatmul.bf16.gmra.mxu3 %v7827_v13  ;;  %8829 = vst [vmem:[#allocation59_spill] sm:$0xff] %v7835_v57  ;;  %v1514_v42 = vadd.f32 %v1513_v24, %v1485_v59  ;;  %3604 = vmatpush.bf16.msrb.mxu2 %v5796_v44  ;;  %v8744_v56 = vmax.f32 %v7835_v57, 0.0  ;;  %v5772_v55 = vor.u32 %v6781_v26, %v5769_v40  ;;  %v5961_v59 = vld [vmem:[#allocation8 + $0x498] sm:$0xf0]  ;;  %v6925_v44 = vld [vmem:[#allocation8 + $0x784] sm:$0xf] }
 0x1c7   :  { %3690 = vmatpush.bf16.msrb.mxu1 %v6396_v38  ;;  %v1544_v17 = vpop.f32.mrf.mxu1  ;;  %v5964_v35 = vor.u32 %v6829_v50, %v5961_v59  ;;  %v6345_v52 = vld [vmem:[#allocation8 + $0x798] sm:$0xf0]  ;;  %v6731_v26 = vld [vmem:[#allocation8 + $0x16c] sm:$0xf0]  ;;  %v5751_v50 = vld [vmem:[#allocation8 + $0x2d8] sm:$0xf] }
 0x1c8   :  { %v1515_v36 = vpop.f32.mrf.mxu0  ;;  %v7842_v7 = vadd.f32 %v1542_v53, %v1514_v42  ;;  %v6348_v38 = vor.u32 %v6925_v44, %v6345_v52  ;;  %v6779_v59 = vld [vmem:[#allocation8 + $0x2ec] sm:$0xf0] }
 0x1c9   :  { %3634 = vmatpush.bf16.msrb.mxu3 %v5964_v35 }
 0x1ca   :  { %8831 = vst [vmem:[#allocation61_spill] sm:$0xff] %v7842_v7  ;;  %3605 = vmatpush.bf16.msrb.mxu2 %v5772_v55  ;;  %v8740_v53 = vmax.f32 %v7842_v7, 0.0  ;;  %v6713_v7 = vld [vmem:[#allocation8 + $0xdc] sm:$0xf0] }
 0x1cb   :  { %v1457_v48 = vpop.f32.mrf.mxu2  ;;  %v1486_v31 = vpop.f32.mrf.mxu3  ;;  %3691 = vmatpush.bf16.msrb.mxu1 %v6372_v22 }
 0x1cc   :  { %v7837_v60 = vadd.f32 %v1457_v48, %v1429_v11  ;;  %v1487_v21 = vadd.f32 %v1486_v31, %v7756_v28 }
 0x1ce   :  { %8830 = vst [vmem:[#allocation60_spill] sm:$0xff] %v7837_v60  ;;  %v8743_v8 = vmax.f32 %v7837_v60, 0.0  ;;  %v1516_v18 = vadd.f32 %v1515_v36, %v1487_v21  ;;  %v5559_v21 = vld [vmem:[#allocation8 + $0x158] sm:$0xf] }
 0x1cf   :  { %3692 = vmatpush.bf16.msrb.mxu1 %v6348_v38  ;;  %v1547_v31 = vpop.f32.mrf.mxu1  ;;  %v5560_v55 = vor.u32 %v6731_v26, %v5559_v21 }
 0x1d0   :  { %v1518_v24 = vpop.f32.mrf.mxu0  ;;  %v7848_v41 = vpack.c.bf16 %v8743_v8, %v8744_v56  ;;  %v7850_v11 = vadd.f32 %v1544_v17, %v1516_v18  ;;  %v1405_v17 = vadd.f32 %v7737_v58, %v7512_v2  ;;  %v5752_v18 = vor.u32 %v6779_v59, %v5751_v50  ;;  %v5535_v50 = vld [vmem:[#allocation8 + $0x128] sm:$0xf]  ;;  %v5943_v59 = vld [vmem:[#allocation8 + $0x458] sm:$0xf]  ;;  %v6869_v56 = vld [vmem:[#allocation8 + $0x5bc] sm:$0xf0] }
 0x1d1   :  { %3714 = vmatpush.bf16.msra.mxu2 %v5560_v55  ;;  %v6111_v8 = vld [vmem:[#allocation8 + $0x5a8] sm:$0xf] }
 0x1d2   :  { %8832 = vst [vmem:[#allocation62_spill] sm:$0xff] %v7850_v11  ;;  %3500 = vmatmul.bf16.gmra.mxu2 %v7848_v41  ;;  %v8739_v36 = vmax.f32 %v7850_v11, 0.0  ;;  %v1434_v35 = vadd.f32 %v7739_v63, %v1405_v17  ;;  %3743 = vmatpush.bf16.msra.mxu3 %v5752_v18  ;;  %v6725_v63 = vld [vmem:[#allocation8 + $0x13c] sm:$0xf0] }
 0x1d3   :  { %3563 = vmatmul.bf16.gmra.mxu0 %v7704_v62  ;;  %v1460_v42 = vpop.f32.mrf.mxu2  ;;  %v1489_v48 = vpop.f32.mrf.mxu3 }
 0x1d4   :  { %3587 = vmatmul.bf16.gmra.mxu1 %v7651_v29  ;;  %v7861_v32 = vpack.c.bf16 %v8739_v36, %v8740_v53  ;;  %v1490_v40 = vadd.f32 %v1489_v48, %v7756_v28  ;;  %v7869_v44 = vadd.f32 %v1460_v42, %v7724_v51  ;;  %v7874_v36 = vld [vmem:[#allocation10] sm:$0x3f]  ;;  %v5536_v42 = vor.u32 %v6725_v63, %v5535_v50 }
 0x1d5   :  { %v7947_v0 = vperm.slane %v7874_v36, 1 }
 0x1d6   :  { %3529 = vmatmul.bf16.gmra.mxu3 %v7861_v32  ;;  %8833 = vst [vmem:[#allocation63_spill] sm:$0xff] %v7869_v44  ;;  %v1519_v2 = vadd.f32 %v1518_v24, %v1490_v40  ;;  %v8742_v21 = vmax.f32 %v7869_v44, 0.0  ;;  %v5727_v24 = vld [vmem:[#allocation8 + $0x2a8] sm:$0xf]  ;;  %v6773_v40 = vld [vmem:[#allocation8 + $0x2bc] sm:$0xf0]  ;;  %3715 = vmatpush.bf16.msra.mxu2 %v5536_v42 }
 0x1d7   :  { %v1549_v18 = vpop.f32.mrf.mxu1  ;;  %v6791_v44 = vld [vmem:[#allocation8 + $0x34c] sm:$0xf0] }
 0x1d8   :  { %v1520_v22 = vpop.f32.mrf.mxu0  ;;  %v7878_v17 = vadd.f32 %v1547_v31, %v1519_v2  ;;  %v6875_v2 = vld [vmem:[#allocation8 + $0x5ec] sm:$0xf0] }
 0x1da   :  { %8835 = vst [vmem:[#allocation65_spill] sm:$0xff] %v7878_v17  ;;  %v8748_v50 = vmax.f32 %v7878_v17, 0.0  ;;  %v5895_v17 = vld [vmem:[#allocation8 + $0x3f8] sm:$0xf] }
 0x1db   :  { %v1462_v58 = vpop.f32.mrf.mxu2  ;;  %v1491_v38 = vpop.f32.mrf.mxu3 }
 0x1dc   :  { %v7871_v52 = vadd.f32 %v1462_v58, %v1434_v35  ;;  %v1492_v48 = vadd.f32 %v1491_v38, %v7756_v28  ;;  %v7887_v35 = vperm.slane %v7874_v36, 0  ;;  %v5728_v58 = vor.u32 %v6773_v40, %v5727_v24  ;;  %v6827_v38 = vld [vmem:[#allocation8 + $0x46c] sm:$0xf0]  ;;  %v5919_v24 = vld [vmem:[#allocation8 + $0x428] sm:$0xf] }
 0x1dd   :  { %v5944_v31 = vor.u32 %v6827_v38, %v5943_v59  ;;  %v6821_v40 = vld [vmem:[#allocation8 + $0x43c] sm:$0xf0] }
 0x1de   :  { %8834 = vst [vmem:[#allocation64_spill] sm:$0xff] %v7871_v52  ;;  %v8741_v26 = vmax.f32 %v7871_v52, 0.0  ;;  %v1521_v51 = vadd.f32 %v1520_v22, %v1492_v48  ;;  %v6135_v22 = vld [vmem:[#allocation8 + $0x5d8] sm:$0xf]  ;;  %3744 = vmatpush.bf16.msra.mxu3 %v5728_v58  ;;  %v5920_v42 = vor.u32 %v6821_v40, %v5919_v24  ;;  %v5679_v52 = vld [vmem:[#allocation8 + $0x248] sm:$0xf] }
 0x1df   :  { %v6136_v48 = vor.u32 %v6875_v2, %v6135_v22  ;;  %3772 = vmatpush.bf16.msra.mxu0 %v5944_v31  ;;  %v5511_v22 = vld [vmem:[#allocation8 + $0xf8] sm:$0xf]  ;;  %v6719_v31 = vld [vmem:[#allocation8 + $0x10c] sm:$0xf0] }
 0x1e0   :  { %v3433_v55 = vpop.f32.mrf.mxu0  ;;  %v7884_v28 = vpack.c.bf16 %v8741_v26, %v8742_v21  ;;  %v7889_v53 = vadd.f32 %v1549_v18, %v1521_v51  ;;  %v5512_v2 = vor.u32 %v6719_v31, %v5511_v22  ;;  %v6767_v21 = vld [vmem:[#allocation8 + $0x28c] sm:$0xf0]  ;;  %v5487_v31 = vld [vmem:[#allocation8 + $0xc8] sm:$0xf] }
 0x1e1   :  { %3801 = vmatpush.bf16.msra.mxu1 %v6136_v48 }
 0x1e2   :  { %8836 = vst [vmem:[#allocation66_spill] sm:$0xff] %v7889_v53  ;;  %3505 = vmatmul.bf16.gmra.mxu2 %v7884_v28  ;;  %v8747_v63 = vmax.f32 %v7889_v53, 0.0  ;;  %v6815_v53 = vld [vmem:[#allocation8 + $0x40c] sm:$0xf0] }
 0x1e3   :  { %3664 = vmatmul.bf16.vlgmr.msrb.gmra.mxu0 %v7779_v43  ;;  %v3375_v26 = vpop.f32.mrf.mxu2  ;;  %v3404_v18 = vpop.f32.mrf.mxu3  ;;  %3716 = vmatpush.bf16.msra.mxu2 %v5512_v2  ;;  %v5896_v48 = vor.u32 %v6815_v53, %v5895_v17  ;;  %v6863_v2 = vld [vmem:[#allocation8 + $0x58c] sm:$0xf0] }
 0x1e4   :  { %v3376_v51 = vadd.f32 %v3375_v26, %v7887_v35  ;;  %3592 = vmatmul.bf16.gmra.mxu1 %v7712_v19  ;;  %v7901_v59 = vpack.c.bf16 %v8747_v63, %v8748_v50  ;;  %3773 = vmatpush.bf16.msra.mxu0 %v5920_v42  ;;  %v5703_v26 = vld [vmem:[#allocation8 + $0x278] sm:$0xf]  ;;  %v6112_v63 = vor.u32 %v6869_v56, %v6111_v8  ;;  %v6809_v50 = vld [vmem:[#allocation8 + $0x3dc] sm:$0xf0] }
 0x1e5   :  { %v5704_v40 = vor.u32 %v6767_v21, %v5703_v26  ;;  %v6761_v21 = vld [vmem:[#allocation8 + $0x25c] sm:$0xf0]  ;;  %v6803_v26 = vld [vmem:[#allocation8 + $0x3ac] sm:$0xf0] }
 0x1e6   :  { %v3405_v58 = vadd.f32 %v3404_v18, %v3376_v51  ;;  %3534 = vmatmul.bf16.gmra.mxu3 %v7901_v59  ;;  %3802 = vmatpush.bf16.msra.mxu1 %v6112_v63  ;;  %v5871_v18 = vld [vmem:[#allocation8 + $0x3c8] sm:$0xf]  ;;  %v5680_v8 = vor.u32 %v6761_v21, %v5679_v52  ;;  %v6087_v63 = vld [vmem:[#allocation8 + $0x578] sm:$0xf] }
 0x1e7   :  { %3745 = vmatpush.bf16.msra.mxu3 %v5704_v40  ;;  %v5872_v22 = vor.u32 %v6809_v50, %v5871_v18  ;;  %v6797_v18 = vld [vmem:[#allocation8 + $0x37c] sm:$0xf0] }
 0x1e8   :  { %v7903_v38 = vpop.f32.mrf.mxu0  ;;  %v3434_v24 = vadd.f32 %v3433_v55, %v3405_v58  ;;  %3774 = vmatpush.bf16.msra.mxu0 %v5896_v48  ;;  %v5488_v55 = vor.u32 %v6713_v7, %v5487_v31  ;;  %v5847_v58 = vld [vmem:[#allocation8 + $0x398] sm:$0xf]  ;;  %v6088_v7 = vor.u32 %v6863_v2, %v6087_v63  ;;  %v5823_v48 = vld [vmem:[#allocation8 + $0x368] sm:$0xf]  ;;  %v6857_v2 = vld [vmem:[#allocation8 + $0x55c] sm:$0xf0] }
 0x1e9   :  { %v5848_v53 = vor.u32 %v6803_v26, %v5847_v58  ;;  %v5824_v31 = vor.u32 %v6797_v18, %v5823_v48  ;;  %v6707_v58 = vld [vmem:[#allocation8 + $0xac] sm:$0xf0] }
 0x1ea   :  { %3717 = vmatpush.bf16.msra.mxu2 %v5488_v55  ;;  %3803 = vmatpush.bf16.msra.mxu1 %v6088_v7 }
 0x1eb   :  { %v3377_v51 = vpop.f32.mrf.mxu2  ;;  %v3406_v11 = vpop.f32.mrf.mxu3  ;;  %3746 = vmatpush.bf16.msra.mxu3 %v5680_v8  ;;  %v5655_v8 = vld [vmem:[#allocation8 + $0x218] sm:$0xf] }
 0x1ec   :  { %3775 = vmatpush.bf16.msra.mxu0 %v5872_v22  ;;  %v3378_v56 = vadd.f32 %v3377_v51, %v7887_v35 }
 0x1ee   :  { %v3407_v22 = vadd.f32 %v3406_v11, %v3378_v56 }
 0x1f0   :  { %v3438_v42 = vpop.f32.mrf.mxu0  ;;  %3776 = vmatpush.bf16.msra.mxu0 %v5848_v53  ;;  %v6755_v53 = vld [vmem:[#allocation8 + $0x22c] sm:$0xf0]  ;;  %v3436_v11 = vadd.f32 %v7903_v38, %v3407_v22  ;;  %v6701_v22 = vld [vmem:[#allocation8 + $0x7c] sm:$0xf0] }
 0x1f1   :  { %v3462_v17 = vpop.f32.mrf.mxu1  ;;  %v5656_v63 = vor.u32 %v6755_v53, %v5655_v8  ;;  %v5631_v8 = vld [vmem:[#allocation8 + $0x1e8] sm:$0xf]  ;;  %v6749_v53 = vld [vmem:[#allocation8 + $0x1fc] sm:$0xf0] }
 0x1f2   :  { %v7908_v50 = vadd.f32 %v3462_v17, %v3434_v24  ;;  %3606 = vmatmul.bf16.vlgmr.msrb.gmra.mxu2 %v7535_v47  ;;  %v5463_v24 = vld [vmem:[#allocation8 + $0x98] sm:$0xf]  ;;  %v6063_v17 = vld [vmem:[#allocation8 + $0x548] sm:$0xf] }
 0x1f3   :  { %3669 = vmatmul.bf16.gmra.mxu0 %v7814_v34  ;;  %v3380_v40 = vpop.f32.mrf.mxu2  ;;  %v3409_v51 = vpop.f32.mrf.mxu3  ;;  %v5464_v26 = vor.u32 %v6707_v58, %v5463_v24  ;;  %v6064_v7 = vor.u32 %v6857_v2, %v6063_v17  ;;  %3747 = vmatpush.bf16.msra.mxu3 %v5656_v63  ;;  %v6785_v24 = vld [vmem:[#allocation8 + $0x31c] sm:$0xf0]  ;;  %v6851_v63 = vld [vmem:[#allocation8 + $0x52c] sm:$0xf0] }
 0x1f4   :  { %v3381_v52 = vadd.f32 %v3380_v40, %v7887_v35  ;;  %3693 = vmatmul.bf16.vlgmr.msrb.gmra.mxu1 %v7792_v1  ;;  %3777 = vmatpush.bf16.msra.mxu0 %v5824_v31  ;;  %v5799_v40 = vld [vmem:[#allocation8 + $0x338] sm:$0xf]  ;;  %v5775_v31 = vld [vmem:[#allocation8 + $0x308] sm:$0xf] }
 0x1f5   :  { %3718 = vmatpush.bf16.msra.mxu2 %v5464_v26  ;;  %v5800_v18 = vor.u32 %v6791_v44, %v5799_v40  ;;  %3804 = vmatpush.bf16.msra.mxu1 %v6064_v7  ;;  %v5776_v60 = vor.u32 %v6785_v24, %v5775_v31  ;;  %v5632_v44 = vor.u32 %v6749_v53, %v5631_v8  ;;  %v6695_v31 = vld [vmem:[#allocation8 + $0x4c] sm:$0xf0]  ;;  %v6015_v8 = vld [vmem:[#allocation8 + $0x4e8] sm:$0xf] }
 0x1f6   :  { %v3410_v55 = vadd.f32 %v3409_v51, %v3381_v52  ;;  %3635 = vmatmul.bf16.vlgmr.msrb.gmra.mxu3 %v7610_v3 }
 0x1f7   :  { %3748 = vmatpush.bf16.msra.mxu3 %v5632_v44 }
 0x1f8   :  { %v3440_v21 = vpop.f32.mrf.mxu0  ;;  %v3439_v56 = vadd.f32 %v3438_v42, %v3410_v55  ;;  %3778 = vmatpush.bf16.msra.mxu0 %v5800_v18  ;;  %v5439_v42 = vld [vmem:[#allocation8 + $0x68] sm:$0xf] }
 0x1f9   :  { %v3464_v48 = vpop.f32.mrf.mxu1  ;;  %v5440_v55 = vor.u32 %v6701_v22, %v5439_v42 }
 0x1fa   :  { %v7915_v52 = vadd.f32 %v3464_v48, %v3436_v11  ;;  %v6039_v11 = vld [vmem:[#allocation8 + $0x518] sm:$0xf] }
 0x1fb   :  { %v3382_v51 = vpop.f32.mrf.mxu2  ;;  %v3411_v58 = vpop.f32.mrf.mxu3  ;;  %3719 = vmatpush.bf16.msra.mxu2 %v5440_v55  ;;  %v6040_v40 = vor.u32 %v6851_v63, %v6039_v11  ;;  %v6743_v55 = vld [vmem:[#allocation8 + $0x1cc] sm:$0xf0] }
 0x1fc   :  { %3779 = vmatpush.bf16.msra.mxu0 %v5776_v60  ;;  %v3383_v26 = vadd.f32 %v3382_v51, %v7887_v35  ;;  %v5415_v51 = vld [vmem:[#allocation8 + $0x38] sm:$0xf] }
 0x1fd   :  { %3805 = vmatpush.bf16.msra.mxu1 %v6040_v40  ;;  %v5416_v24 = vor.u32 %v6695_v31, %v5415_v51  ;;  %v6689_v40 = vld [vmem:[#allocation8 + $0x1c] sm:$0xf0]  ;;  %v6839_v31 = vld [vmem:[#allocation8 + $0x4cc] sm:$0xf0] }
 0x1fe   :  { %v3412_v7 = vadd.f32 %v3411_v58, %v3383_v26  ;;  %v6845_v26 = vld [vmem:[#allocation8 + $0x4fc] sm:$0xf0] }
 0x1ff   :  { %3720 = vmatpush.bf16.msra.mxu2 %v5416_v24  ;;  %v6016_v11 = vor.u32 %v6845_v26, %v6015_v8 }
 0x200   :  { %v3443_v38 = vpop.f32.mrf.mxu0  ;;  %v3441_v53 = vadd.f32 %v3440_v21, %v3412_v7  ;;  %v5583_v21 = vld [vmem:[#allocation8 + $0x188] sm:$0xf] }
 0x201   :  { %v3467_v17 = vpop.f32.mrf.mxu1  ;;  %3806 = vmatpush.bf16.msra.mxu1 %v6016_v11  ;;  %v5967_v7 = vld [vmem:[#allocation8 + $0x488] sm:$0xf]  ;;  %v6327_v11 = vld [vmem:[#allocation8 + $0x758] sm:$0xf] }
 0x202   :  { %v7919_v2 = vadd.f32 %v3467_v17, %v3439_v56  ;;  %3611 = vmatmul.bf16.gmra.mxu2 %v7592_v6  ;;  %v5607_v56 = vld [vmem:[#allocation8 + $0x1b8] sm:$0xf] }
 0x203   :  { %3674 = vmatmul.bf16.gmra.mxu0 %v7848_v41  ;;  %v3385_v48 = vpop.f32.mrf.mxu2  ;;  %v3414_v18 = vpop.f32.mrf.mxu3  ;;  %v5608_v58 = vor.u32 %v6743_v55, %v5607_v56  ;;  %v6833_v55 = vld [vmem:[#allocation8 + $0x49c] sm:$0xf0] }
 0x204   :  { %v3386_v60 = vadd.f32 %v3385_v48, %v7887_v35  ;;  %3698 = vmatmul.bf16.gmra.mxu1 %v7827_v13  ;;  %v5391_v48 = vld [vmem:[#allocation8 + $0x8] sm:$0xf] }
 0x205   :  { %3749 = vmatpush.bf16.msra.mxu3 %v5608_v58 }
 0x206   :  { %v3415_v42 = vadd.f32 %v3414_v18, %v3386_v60  ;;  %3640 = vmatmul.bf16.gmra.mxu3 %v7674_v5  ;;  %v5392_v60 = vor.u32 %v6689_v40, %v5391_v48  ;;  %v5991_v18 = vld [vmem:[#allocation8 + $0x4b8] sm:$0xf]  ;;  %v6923_v48 = vld [vmem:[#allocation8 + $0x76c] sm:$0xf0] }
 0x207   :  { %v5992_v57 = vor.u32 %v6839_v31, %v5991_v18  ;;  %v6971_v31 = vld [vmem:[#allocation8 + $0x8ec] sm:$0xf0] }
 0x208   :  { %v3445_v22 = vpop.f32.mrf.mxu0  ;;  %v3444_v44 = vadd.f32 %v3443_v38, %v3415_v42  ;;  %3721 = vmatpush.bf16.msra.mxu2 %v5392_v60  ;;  %v6737_v38 = vld [vmem:[#allocation8 + $0x19c] sm:$0xf0] }
 0x209   :  { %v3469_v17 = vpop.f32.mrf.mxu1  ;;  %3807 = vmatpush.bf16.msra.mxu1 %v5992_v57  ;;  %v5584_v56 = vor.u32 %v6737_v38, %v5583_v21 }
 0x20a   :  { %v7925_v63 = vadd.f32 %v3469_v17, %v3441_v53  ;;  %v5968_v53 = vor.u32 %v6833_v55, %v5967_v7 }
 0x20b   :  { %v3387_v51 = vpop.f32.mrf.mxu2  ;;  %v3416_v24 = vpop.f32.mrf.mxu3  ;;  %3750 = vmatpush.bf16.msra.mxu3 %v5584_v56 }
 0x20c   :  { %v3388_v42 = vadd.f32 %v3387_v51, %v7887_v35  ;;  %v6328_v51 = vor.u32 %v6923_v48, %v6327_v11  ;;  %v6303_v48 = vld [vmem:[#allocation8 + $0x728] sm:$0xf] }
 0x20d   :  { %3808 = vmatpush.bf16.msra.mxu1 %v5968_v53  ;;  %v5561_v53 = vld [vmem:[#allocation8 + $0x170] sm:$0xf0] }
 0x20e   :  { %v3417_v17 = vadd.f32 %v3416_v24, %v3388_v42  ;;  %3830 = vmatpush.bf16.msrb.mxu2 %v6328_v51  ;;  %v6495_v51 = vld [vmem:[#allocation8 + $0x8a8] sm:$0xf] }
 0x210   :  { %v3448_v20 = vpop.f32.mrf.mxu0  ;;  %v3446_v21 = vadd.f32 %v3445_v22, %v3417_v17  ;;  %v6965_v17 = vld [vmem:[#allocation8 + $0x8bc] sm:$0xf0] }
 0x211   :  { %v3472_v8 = vpop.f32.mrf.mxu1 }
 0x212   :  { %v7929_v58 = vadd.f32 %v3472_v8, %v3444_v44  ;;  %3616 = vmatmul.bf16.gmra.mxu2 %v7657_v14  ;;  %v6519_v44 = vld [vmem:[#allocation8 + $0x8d8] sm:$0xf]  ;;  %v6728_v8 = vld [vmem:[#allocation8 + $0x15c] sm:$0xf] }
 0x213   :  { %3679 = vmatmul.bf16.gmra.mxu0 %v7884_v28  ;;  %v3390_v26 = vpop.f32.mrf.mxu2  ;;  %v3419_v40 = vpop.f32.mrf.mxu3  ;;  %v6520_v7 = vor.u32 %v6971_v31, %v6519_v44  ;;  %v5753_v44 = vld [vmem:[#allocation8 + $0x2f0] sm:$0xf0] }
 0x214   :  { %v3391_v57 = vadd.f32 %v3390_v26, %v7887_v35  ;;  %3703 = vmatmul.bf16.gmra.mxu1 %v7861_v32 }
 0x215   :  { %3859 = vmatpush.bf16.msrb.mxu3 %v6520_v7 }
 0x216   :  { %v3420_v60 = vadd.f32 %v3419_v40, %v3391_v57  ;;  %3645 = vmatmul.bf16.gmra.mxu3 %v7732_v54  ;;  %v5564_v57 = vor.u32 %v6728_v8, %v5561_v53  ;;  %v6917_v40 = vld [vmem:[#allocation8 + $0x73c] sm:$0xf0]  ;;  %v6716_v53 = vld [vmem:[#allocation8 + $0xfc] sm:$0xf] }
 0x218   :  { %v3450_v18 = vpop.f32.mrf.mxu0  ;;  %v3449_v38 = vadd.f32 %v3448_v20, %v3420_v60  ;;  %v6304_v20 = vor.u32 %v6917_v40, %v6303_v48  ;;  %3888 = vmatpush.bf16.msrb.mxu0 %v5564_v57  ;;  %v6776_v60 = vld [vmem:[#allocation8 + $0x2dc] sm:$0xf]  ;;  %v5513_v57 = vld [vmem:[#allocation8 + $0x110] sm:$0xf0] }
 0x219   :  { %v3474_v56 = vpop.f32.mrf.mxu1  ;;  %v5756_v7 = vor.u32 %v6776_v60, %v5753_v44  ;;  %v5516_v48 = vor.u32 %v6716_v53, %v5513_v57  ;;  %v6471_v60 = vld [vmem:[#allocation8 + $0x878] sm:$0xf]  ;;  %v6704_v53 = vld [vmem:[#allocation8 + $0x9c] sm:$0xf]  ;;  %v5465_v57 = vld [vmem:[#allocation8 + $0xb0] sm:$0xf0] }
 0x21a   :  { %v7935_v24 = vadd.f32 %v3474_v56, %v3446_v21  ;;  %v6496_v21 = vor.u32 %v6965_v17, %v6495_v51  ;;  %v5537_v56 = vld [vmem:[#allocation8 + $0x140] sm:$0xf0]  ;;  %3831 = vmatpush.bf16.msrb.mxu2 %v6304_v20  ;;  %v6279_v51 = vld [vmem:[#allocation8 + $0x6f8] sm:$0xf]  ;;  %v6911_v17 = vld [vmem:[#allocation8 + $0x70c] sm:$0xf0] }
 0x21b   :  { %v3392_v42 = vpop.f32.mrf.mxu2  ;;  %v3421_v31 = vpop.f32.mrf.mxu3  ;;  %3917 = vmatpush.bf16.msrb.mxu1 %v5756_v7  ;;  %v6770_v20 = vld [vmem:[#allocation8 + $0x2ac] sm:$0xf] }
 0x21c   :  { %v3393_v26 = vadd.f32 %v3392_v42, %v7887_v35  ;;  %v6722_v35 = vld [vmem:[#allocation8 + $0x12c] sm:$0xf]  ;;  %3860 = vmatpush.bf16.msrb.mxu3 %v6496_v21 }
 0x21d   :  { %v5540_v8 = vor.u32 %v6722_v35, %v5537_v56  ;;  %v5729_v35 = vld [vmem:[#allocation8 + $0x2c0] sm:$0xf0]  ;;  %v6710_v56 = vld [vmem:[#allocation8 + $0xcc] sm:$0xf] }
 0x21e   :  { %v3422_v42 = vadd.f32 %v3421_v31, %v3393_v26  ;;  %v6280_v26 = vor.u32 %v6911_v17, %v6279_v51  ;;  %v6959_v31 = vld [vmem:[#allocation8 + $0x88c] sm:$0xf0]  ;;  %v5732_v7 = vor.u32 %v6770_v20, %v5729_v35  ;;  %v6255_v51 = vld [vmem:[#allocation8 + $0x6c8] sm:$0xf]  ;;  %v6905_v17 = vld [vmem:[#allocation8 + $0x6dc] sm:$0xf0] }
 0x21f   :  { %3889 = vmatpush.bf16.msrb.mxu0 %v5540_v8  ;;  %v6472_v21 = vor.u32 %v6959_v31, %v6471_v60  ;;  %v5489_v8 = vld [vmem:[#allocation8 + $0xe0] sm:$0xf0]  ;;  %v6447_v60 = vld [vmem:[#allocation8 + $0x848] sm:$0xf]  ;;  %v6256_v36 = vor.u32 %v6905_v17, %v6255_v51  ;;  %v6764_v20 = vld [vmem:[#allocation8 + $0x27c] sm:$0xf] }
 0x220   :  { %v3549_v55 = vpop.f32.mrf.mxu0  ;;  %3832 = vmatpush.bf16.msrb.mxu2 %v6280_v26  ;;  %3918 = vmatpush.bf16.msrb.mxu1 %v5732_v7  ;;  %v6953_v26 = vld [vmem:[#allocation8 + $0x85c] sm:$0xf0]  ;;  %v5705_v35 = vld [vmem:[#allocation8 + $0x290] sm:$0xf0] }
 0x221   :  { %v3477_v11 = vpop.f32.mrf.mxu1  ;;  %3861 = vmatpush.bf16.msrb.mxu3 %v6472_v21  ;;  %v6448_v21 = vor.u32 %v6953_v26, %v6447_v60  ;;  %v5708_v7 = vor.u32 %v6764_v20, %v5705_v35  ;;  %v6231_v60 = vld [vmem:[#allocation8 + $0x698] sm:$0xf]  ;;  %v6899_v26 = vld [vmem:[#allocation8 + $0x6ac] sm:$0xf0] }
 0x222   :  { %v7939_v22 = vadd.f32 %v3477_v11, %v3449_v38  ;;  %3621 = vmatmul.bf16.gmra.mxu2 %v7718_v61  ;;  %v3451_v11 = vadd.f32 %v3450_v18, %v3422_v42  ;;  %v5492_v18 = vor.u32 %v6710_v56, %v5489_v8  ;;  %v6698_v56 = vld [vmem:[#allocation8 + $0x6c] sm:$0xf]  ;;  %v6423_v20 = vld [vmem:[#allocation8 + $0x818] sm:$0xf] }
 0x223   :  { %3780 = vmatmul.bf16.vlgmr.msra.gmra.mxu0 %v7535_v47 }
 0x224   :  { %3708 = vmatmul.bf16.gmra.mxu1 %v7901_v59  ;;  %3890 = vmatpush.bf16.msrb.mxu0 %v5516_v48 }
 0x225   :  { %3833 = vmatpush.bf16.msrb.mxu2 %v6256_v36  ;;  %3862 = vmatpush.bf16.msrb.mxu3 %v6448_v21  ;;  %v6232_v21 = vor.u32 %v6899_v26, %v6231_v60  ;;  %v6893_v60 = vld [vmem:[#allocation8 + $0x67c] sm:$0xf0]  ;;  %v6399_v26 = vld [vmem:[#allocation8 + $0x7e8] sm:$0xf] }
 0x226   :  { %3650 = vmatmul.bf16.gmra.mxu3 %v7754_v30  ;;  %3919 = vmatpush.bf16.msrb.mxu1 %v5708_v7  ;;  %v6947_v7 = vld [vmem:[#allocation8 + $0x82c] sm:$0xf0] }
 0x228   :  { %v3551_v38 = vpop.f32.mrf.mxu0  ;;  %3891 = vmatpush.bf16.msrb.mxu0 %v5492_v18 }
 0x229   :  { %v3479_v40 = vpop.f32.mrf.mxu1  ;;  %3834 = vmatpush.bf16.msrb.mxu2 %v6232_v21  ;;  %v6752_v21 = vld [vmem:[#allocation8 + $0x21c] sm:$0xf] }
 0x22a   :  { %v7944_v44 = vadd.f32 %v3479_v40, %v3451_v11  ;;  %v3550_v11 = vadd.f32 %v3549_v55, %v7947_v0  ;;  %v5468_v40 = vor.u32 %v6704_v53, %v5465_v57  ;;  %v5441_v55 = vld [vmem:[#allocation8 + $0x80] sm:$0xf0] }
 0x22b   :  { %v5444_v8 = vor.u32 %v6698_v56, %v5441_v55  ;;  %v6758_v56 = vld [vmem:[#allocation8 + $0x24c] sm:$0xf] }
 0x22c   :  { %3892 = vmatpush.bf16.msrb.mxu0 %v5468_v40  ;;  %v3552_v40 = vadd.f32 %v3551_v38, %v7947_v0 }
 0x230   :  { %v3554_v42 = vpop.f32.mrf.mxu0  ;;  %3893 = vmatpush.bf16.msrb.mxu0 %v5444_v8  ;;  %v6424_v8 = vor.u32 %v6947_v7, %v6423_v20  ;;  %v5657_v7 = vld [vmem:[#allocation8 + $0x230] sm:$0xf0] }
 0x231   :  { %v3578_v48 = vpop.f32.mrf.mxu1 }
 0x232   :  { %v7951_v31 = vadd.f32 %v3578_v48, %v3550_v11  ;;  %3722 = vmatmul.bf16.vlgmr.msra.gmra.mxu2 %v7523_v39  ;;  %v6692_v11 = vld [vmem:[#allocation8 + $0x3c] sm:$0xf]  ;;  %v5417_v48 = vld [vmem:[#allocation8 + $0x50] sm:$0xf0]  ;;  %3863 = vmatpush.bf16.msrb.mxu3 %v6424_v8 }
 0x233   :  { %3785 = vmatmul.bf16.gmra.mxu0 %v7592_v6  ;;  %v5420_v51 = vor.u32 %v6692_v11, %v5417_v48  ;;  %v6686_v6 = vld [vmem:[#allocation8 + $0xc] sm:$0xf] }
 0x234   :  { %3809 = vmatmul.bf16.vlgmr.msra.gmra.mxu1 %v7610_v3  ;;  %v5393_v3 = vld [vmem:[#allocation8 + $0x20] sm:$0xf0] }
 0x235   :  { %v3491_v18 = vpop.f32.mrf.mxu2  ;;  %3894 = vmatpush.bf16.msrb.mxu0 %v5420_v51  ;;  %v5396_v38 = vor.u32 %v6686_v6, %v5393_v3  ;;  %v6941_v3 = vld [vmem:[#allocation8 + $0x7fc] sm:$0xf0] }
 0x236   :  { %v3492_v53 = vadd.f32 %v3491_v18, %v7908_v50  ;;  %3751 = vmatmul.bf16.vlgmr.msra.gmra.mxu3 %v7529_v46  ;;  %v5681_v50 = vld [vmem:[#allocation8 + $0x260] sm:$0xf0] }
 0x237   :  { %v5684_v18 = vor.u32 %v6758_v56, %v5681_v50  ;;  %v6400_v56 = vor.u32 %v6941_v3, %v6399_v26  ;;  %v5660_v50 = vor.u32 %v6752_v21, %v5657_v7  ;;  %v6375_v26 = vld [vmem:[#allocation8 + $0x7b8] sm:$0xf]  ;;  %v6935_v21 = vld [vmem:[#allocation8 + $0x7cc] sm:$0xf0] }
 0x238   :  { %v3556_v57 = vpop.f32.mrf.mxu0 }
 0x239   :  { %v3580_v17 = vpop.f32.mrf.mxu1  ;;  %v3520_v36 = vpop.f32.mrf.mxu3  ;;  %3920 = vmatpush.bf16.msrb.mxu1 %v5684_v18  ;;  %3895 = vmatpush.bf16.msrb.mxu0 %v5396_v38  ;;  %v6746_v38 = vld [vmem:[#allocation8 + $0x1ec] sm:$0xf] }
 0x23a   :  { %v7958_v35 = vadd.f32 %v3580_v17, %v3552_v40  ;;  %v7960_v55 = vadd.f32 %v3520_v36, %v3492_v53  ;;  %v3555_v17 = vadd.f32 %v3554_v42, %v7947_v0  ;;  %v6207_v53 = vld [vmem:[#allocation8 + $0x668] sm:$0xf]  ;;  %3864 = vmatpush.bf16.msrb.mxu3 %v6400_v56  ;;  %v6740_v56 = vld [vmem:[#allocation8 + $0x1bc] sm:$0xf] }
 0x23b   :  { %v6208_v6 = vor.u32 %v6893_v60, %v6207_v53  ;;  %v6183_v53 = vld [vmem:[#allocation8 + $0x638] sm:$0xf]  ;;  %v6887_v60 = vld [vmem:[#allocation8 + $0x64c] sm:$0xf0] }
 0x23d   :  { %v3493_v11 = vpop.f32.mrf.mxu2  ;;  %3835 = vmatpush.bf16.msrb.mxu2 %v6208_v6  ;;  %3921 = vmatpush.bf16.msrb.mxu1 %v5660_v50  ;;  %v6184_v6 = vor.u32 %v6887_v60, %v6183_v53  ;;  %v5609_v50 = vld [vmem:[#allocation8 + $0x1d0] sm:$0xf0]  ;;  %v6351_v60 = vld [vmem:[#allocation8 + $0x788] sm:$0xf] }
 0x23e   :  { %v3494_v48 = vadd.f32 %v3493_v11, %v7915_v52  ;;  %v5633_v11 = vld [vmem:[#allocation8 + $0x200] sm:$0xf0] }
 0x240   :  { %v3559_v40 = vpop.f32.mrf.mxu0 }
 0x241   :  { %v3583_v51 = vpop.f32.mrf.mxu1  ;;  %v3522_v20 = vpop.f32.mrf.mxu3  ;;  %3836 = vmatpush.bf16.msrb.mxu2 %v6184_v6 }
 0x242   :  { %v7965_v36 = vadd.f32 %v3583_v51, %v3555_v17  ;;  %3727 = vmatmul.bf16.gmra.mxu2 %v7578_v27  ;;  %v7968_v52 = vadd.f32 %v3522_v20, %v3494_v48  ;;  %v3557_v17 = vadd.f32 %v3556_v57, %v7947_v0  ;;  %v5636_v51 = vor.u32 %v6746_v38, %v5633_v11  ;;  %v6159_v57 = vld [vmem:[#allocation8 + $0x608] sm:$0xf]  ;;  %v6881_v38 = vld [vmem:[#allocation8 + $0x61c] sm:$0xf0] }
 0x243   :  { %3790 = vmatmul.bf16.gmra.mxu0 %v7657_v14  ;;  %v6160_v47 = vor.u32 %v6881_v38, %v6159_v57  ;;  %v6872_v57 = vld [vmem:[#allocation8 + $0x5dc] sm:$0xf] }
 0x244   :  { %3814 = vmatmul.bf16.gmra.mxu1 %v7674_v5 }
 0x245   :  { %v3496_v42 = vpop.f32.mrf.mxu2  ;;  %3922 = vmatpush.bf16.msrb.mxu1 %v5636_v51  ;;  %v3560_v51 = vadd.f32 %v3559_v40, %v7947_v0  ;;  %3837 = vmatpush.bf16.msrb.mxu2 %v6160_v47 }
 0x246   :  { %v3497_v8 = vadd.f32 %v3496_v42, %v7919_v2  ;;  %3756 = vmatmul.bf16.gmra.mxu3 %v7586_v33  ;;  %v6376_v2 = vor.u32 %v6935_v21, %v6375_v26  ;;  %v5612_v42 = vor.u32 %v6740_v56, %v5609_v50  ;;  %v6929_v26 = vld [vmem:[#allocation8 + $0x79c] sm:$0xf0]  ;;  %v6824_v50 = vld [vmem:[#allocation8 + $0x45c] sm:$0xf] }
 0x248   :  { %v3561_v18 = vpop.f32.mrf.mxu0  ;;  %3865 = vmatpush.bf16.msrb.mxu3 %v6376_v2 }
 0x249   :  { %v3585_v48 = vpop.f32.mrf.mxu1  ;;  %v3525_v20 = vpop.f32.mrf.mxu3  ;;  %3923 = vmatpush.bf16.msrb.mxu1 %v5612_v42  ;;  %v3562_v2 = vadd.f32 %v3561_v18, %v7947_v0  ;;  %v5945_v42 = vld [vmem:[#allocation8 + $0x470] sm:$0xf0]  ;;  %v6920_v18 = vld [vmem:[#allocation8 + $0x75c] sm:$0xf] }
 0x24a   :  { %v7974_v3 = vadd.f32 %v3585_v48, %v3557_v17  ;;  %v7976_v7 = vadd.f32 %v3525_v20, %v3497_v8  ;;  %v6734_v17 = vld [vmem:[#allocation8 + $0x18c] sm:$0xf]  ;;  %v5585_v48 = vld [vmem:[#allocation8 + $0x1a0] sm:$0xf0] }
 0x24b   :  { %v5588_v8 = vor.u32 %v6734_v17, %v5585_v48  ;;  %v6137_v48 = vld [vmem:[#allocation8 + $0x5f0] sm:$0xf0] }
 0x24d   :  { %v3498_v14 = vpop.f32.mrf.mxu2  ;;  %3924 = vmatpush.bf16.msrb.mxu1 %v5588_v8  ;;  %v6140_v8 = vor.u32 %v6872_v57, %v6137_v48 }
 0x24e   :  { %v3499_v11 = vadd.f32 %v3498_v14, %v7925_v63  ;;  %v6352_v14 = vor.u32 %v6929_v26, %v6351_v60  ;;  %v6329_v26 = vld [vmem:[#allocation8 + $0x770] sm:$0xf0] }
 0x250   :  { %v3564_v5 = vpop.f32.mrf.mxu0  ;;  %3866 = vmatpush.bf16.msrb.mxu3 %v6352_v14  ;;  %v6332_v14 = vor.u32 %v6920_v18, %v6329_v26  ;;  %v6113_v18 = vld [vmem:[#allocation8 + $0x5c0] sm:$0xf0]  ;;  %v6968_v26 = vld [vmem:[#allocation8 + $0x8dc] sm:$0xf] }
 0x251   :  { %v3588_v53 = vpop.f32.mrf.mxu1  ;;  %v3527_v20 = vpop.f32.mrf.mxu3 }
 0x252   :  { %v7981_v6 = vadd.f32 %v3588_v53, %v3560_v51  ;;  %3732 = vmatmul.bf16.gmra.mxu2 %v7641_v4  ;;  %v7984_v63 = vadd.f32 %v3527_v20, %v3499_v11  ;;  %v5948_v11 = vor.u32 %v6824_v50, %v5945_v42  ;;  %v3565_v20 = vadd.f32 %v3564_v5, %v7947_v0  ;;  %v6914_v50 = vld [vmem:[#allocation8 + $0x72c] sm:$0xf]  ;;  %v5921_v5 = vld [vmem:[#allocation8 + $0x440] sm:$0xf0] }
 0x253   :  { %3795 = vmatmul.bf16.gmra.mxu0 %v7718_v61  ;;  %v5897_v61 = vld [vmem:[#allocation8 + $0x410] sm:$0xf0] }
 0x254   :  { %3819 = vmatmul.bf16.gmra.mxu1 %v7732_v54  ;;  %3946 = vmatpush.bf16.msra.mxu2 %v5948_v11 }
 0x255   :  { %v3501_v40 = vpop.f32.mrf.mxu2  ;;  %3975 = vmatpush.bf16.msra.mxu3 %v6140_v8  ;;  %4004 = vmatpush.bf16.msra.mxu0 %v6332_v14  ;;  %v6908_v14 = vld [vmem:[#allocation8 + $0x6fc] sm:$0xf] }
 0x256   :  { %v3502_v47 = vadd.f32 %v3501_v40, %v7929_v58  ;;  %3761 = vmatmul.bf16.gmra.mxu3 %v7651_v29 }
 0x258   :  { %v3566_v21 = vpop.f32.mrf.mxu0 }
 0x259   :  { %v3590_v56 = vpop.f32.mrf.mxu1  ;;  %v3530_v38 = vpop.f32.mrf.mxu3 }
 0x25a   :  { %v7990_v17 = vadd.f32 %v3590_v56, %v3562_v2  ;;  %v7992_v51 = vadd.f32 %v3530_v38, %v3502_v47  ;;  %v6818_v38 = vld [vmem:[#allocation8 + $0x42c] sm:$0xf] }
 0x25b   :  { %v5924_v8 = vor.u32 %v6818_v38, %v5921_v5  ;;  %v6257_v5 = vld [vmem:[#allocation8 + $0x6e0] sm:$0xf0] }
 0x25d   :  { %v3503_v53 = vpop.f32.mrf.mxu2  ;;  %3947 = vmatpush.bf16.msra.mxu2 %v5924_v8 }
 0x25e   :  { %v3504_v58 = vadd.f32 %v3503_v53, %v7935_v24  ;;  %v6305_v24 = vld [vmem:[#allocation8 + $0x740] sm:$0xf0]  ;;  %v6866_v53 = vld [vmem:[#allocation8 + $0x5ac] sm:$0xf] }
 0x25f   :  { %v6308_v42 = vor.u32 %v6914_v50, %v6305_v24 }
 0x260   :  { %v7995_v60 = vpop.f32.mrf.mxu0 }
 0x261   :  { %v3593_v40 = vpop.f32.mrf.mxu1  ;;  %v3532_v2 = vpop.f32.mrf.mxu3  ;;  %4005 = vmatpush.bf16.msra.mxu0 %v6308_v42  ;;  %v6902_v42 = vld [vmem:[#allocation8 + $0x6cc] sm:$0xf] }
 0x262   :  { %v7999_v56 = vadd.f32 %v3593_v40, %v3565_v20  ;;  %3737 = vmatmul.bf16.gmra.mxu2 %v7704_v62  ;;  %v8002_v47 = vadd.f32 %v3532_v2, %v3504_v58  ;;  %v6116_v58 = vor.u32 %v6866_v53, %v6113_v18  ;;  %v6521_v20 = vld [vmem:[#allocation8 + $0x8f0] sm:$0xf0]  ;;  %v3567_v2 = vadd.f32 %v3566_v21, %v7947_v0 }
 0x263   :  { %3896 = vmatmul.bf16.vlgmr.msrb.gmra.mxu0 %v7523_v39  ;;  %v6281_v40 = vld [vmem:[#allocation8 + $0x710] sm:$0xf0]  ;;  %v6524_v50 = vor.u32 %v6968_v26, %v6521_v20  ;;  %v6260_v53 = vor.u32 %v6902_v42, %v6257_v5  ;;  %v6860_v26 = vld [vmem:[#allocation8 + $0x57c] sm:$0xf]  ;;  %v6962_v20 = vld [vmem:[#allocation8 + $0x8ac] sm:$0xf] }
 0x264   :  { %3824 = vmatmul.bf16.gmra.mxu1 %v7754_v30  ;;  %v6284_v24 = vor.u32 %v6908_v14, %v6281_v40  ;;  %3976 = vmatpush.bf16.msra.mxu3 %v6116_v58  ;;  %v6812_v30 = vld [vmem:[#allocation8 + $0x3fc] sm:$0xf]  ;;  %v6089_v58 = vld [vmem:[#allocation8 + $0x590] sm:$0xf0]  ;;  %v6497_v14 = vld [vmem:[#allocation8 + $0x8c0] sm:$0xf0] }
 0x265   :  { %v3506_v57 = vpop.f32.mrf.mxu2  ;;  %4033 = vmatpush.bf16.msra.mxu1 %v6524_v50  ;;  %v5900_v8 = vor.u32 %v6812_v30, %v5897_v61  ;;  %v6896_v40 = vld [vmem:[#allocation8 + $0x69c] sm:$0xf]  ;;  %v6890_v30 = vld [vmem:[#allocation8 + $0x66c] sm:$0xf] }
 0x266   :  { %v3507_v11 = vadd.f32 %v3506_v57, %v7939_v22  ;;  %3766 = vmatmul.bf16.gmra.mxu3 %v7712_v19  ;;  %4006 = vmatpush.bf16.msra.mxu0 %v6284_v24 }
 0x267   :  { %3948 = vmatpush.bf16.msra.mxu2 %v5900_v8 }
 0x268   :  { %v8006_v48 = vpop.f32.mrf.mxu0 }
 0x269   :  { %v3595_v39 = vpop.f32.mrf.mxu1  ;;  %v3535_v22 = vpop.f32.mrf.mxu3 }
 0x26a   :  { %v8010_v57 = vadd.f32 %v3595_v39, %v3567_v2  ;;  %v8012_v38 = vadd.f32 %v3535_v22, %v3507_v11  ;;  %4007 = vmatpush.bf16.msra.mxu0 %v6260_v53  ;;  %v6092_v39 = vor.u32 %v6860_v26, %v6089_v58  ;;  %v6233_v11 = vld [vmem:[#allocation8 + $0x6b0] sm:$0xf0]  ;;  %v6500_v2 = vor.u32 %v6962_v20, %v6497_v14  ;;  %v6806_v53 = vld [vmem:[#allocation8 + $0x3cc] sm:$0xf]  ;;  %v6956_v14 = vld [vmem:[#allocation8 + $0x87c] sm:$0xf] }
 0x26b   :  { %v6236_v50 = vor.u32 %v6896_v40, %v6233_v11  ;;  %v6854_v20 = vld [vmem:[#allocation8 + $0x54c] sm:$0xf]  ;;  %v6473_v40 = vld [vmem:[#allocation8 + $0x890] sm:$0xf0]  ;;  %v6884_v11 = vld [vmem:[#allocation8 + $0x63c] sm:$0xf] }
 0x26c   :  { %3977 = vmatpush.bf16.msra.mxu3 %v6092_v39  ;;  %4034 = vmatpush.bf16.msra.mxu1 %v6500_v2  ;;  %v6065_v39 = vld [vmem:[#allocation8 + $0x560] sm:$0xf0]  ;;  %v6185_v2 = vld [vmem:[#allocation8 + $0x650] sm:$0xf0] }
 0x26d   :  { %v3508_v18 = vpop.f32.mrf.mxu2 }
 0x26e   :  { %v3509_v0 = vadd.f32 %v3508_v18, %v7944_v44  ;;  %4008 = vmatpush.bf16.msra.mxu0 %v6236_v50  ;;  %v6209_v44 = vld [vmem:[#allocation8 + $0x680] sm:$0xf0]  ;;  %v6476_v50 = vor.u32 %v6956_v14, %v6473_v40  ;;  %v6848_v14 = vld [vmem:[#allocation8 + $0x51c] sm:$0xf] }
 0x26f   :  { %v6212_v42 = vor.u32 %v6890_v30, %v6209_v44  ;;  %v5873_v18 = vld [vmem:[#allocation8 + $0x3e0] sm:$0xf0] }
 0x270   :  { %v8015_v21 = vpop.f32.mrf.mxu0  ;;  %v5876_v58 = vor.u32 %v6806_v53, %v5873_v18  ;;  %4035 = vmatpush.bf16.msra.mxu1 %v6476_v50  ;;  %v6161_v53 = vld [vmem:[#allocation8 + $0x620] sm:$0xf0]  ;;  %v4410_v18 = vmax.f32 %v7960_v55, 0.0 }
 0x271   :  { %v3694_v24 = vpop.f32.mrf.mxu1  ;;  %v3537_v22 = vpop.f32.mrf.mxu3  ;;  %v6449_v50 = vld [vmem:[#allocation8 + $0x860] sm:$0xf0] }
 0x272   :  { %3838 = vmatmul.bf16.vlgmr.msrb.gmra.mxu2 %v7779_v43  ;;  %v8019_v61 = vadd.f32 %v3537_v22, %v3509_v0  ;;  %v6068_v0 = vor.u32 %v6854_v20, %v6065_v39  ;;  %4009 = vmatpush.bf16.msra.mxu0 %v6212_v42  ;;  %v6188_v22 = vor.u32 %v6884_v11, %v6185_v2  ;;  %v6950_v2 = vld [vmem:[#allocation8 + $0x84c] sm:$0xf] }
 0x273   :  { %3901 = vmatmul.bf16.gmra.mxu0 %v7578_v27  ;;  %3949 = vmatpush.bf16.msra.mxu2 %v5876_v58  ;;  %v8027_v27 = vld [vmem:[#allocation11] sm:$0x3f]  ;;  %v5849_v58 = vld [vmem:[#allocation8 + $0x3b0] sm:$0xf0]  ;;  %v6452_v55 = vor.u32 %v6950_v2, %v6449_v50 }
 0x274   :  { %3925 = vmatmul.bf16.vlgmr.msrb.gmra.mxu1 %v7529_v46  ;;  %3978 = vmatpush.bf16.msra.mxu3 %v6068_v0  ;;  %8837 = vst [vmem:[#allocation67_spill] sm:$0xff] %v8027_v27  ;;  %v6800_v46 = vld [vmem:[#allocation8 + $0x39c] sm:$0xf] }
 0x275   :  { %v3607_v5 = vpop.f32.mrf.mxu2  ;;  %v5852_v11 = vor.u32 %v6800_v46, %v5849_v58  ;;  %4036 = vmatpush.bf16.msra.mxu1 %v6452_v55  ;;  %v6425_v58 = vld [vmem:[#allocation8 + $0x830] sm:$0xf0]  ;;  %v5825_v55 = vld [vmem:[#allocation8 + $0x380] sm:$0xf0] }
 0x276   :  { %v3608_v8 = vadd.f32 %v3607_v5, %v7951_v31  ;;  %3867 = vmatmul.bf16.vlgmr.msrb.gmra.mxu3 %v7792_v1  ;;  %4010 = vmatpush.bf16.msra.mxu0 %v6188_v22  ;;  %v6878_v5 = vld [vmem:[#allocation8 + $0x60c] sm:$0xf] }
 0x277   :  { %v6164_v20 = vor.u32 %v6878_v5, %v6161_v53  ;;  %3950 = vmatpush.bf16.msra.mxu2 %v5852_v11  ;;  %v8838_v5 = vmax.f32 %v7356_v12, 0.0 }
 0x278   :  { %v8023_v26 = vpop.f32.mrf.mxu0 }
 0x279   :  { %v3696_v30 = vpop.f32.mrf.mxu1  ;;  %v3636_v44 = vpop.f32.mrf.mxu3 }
 0x27a   :  { %v3637_v31 = vadd.f32 %v3636_v44, %v3608_v8  ;;  %v6041_v8 = vld [vmem:[#allocation8 + $0x530] sm:$0xf0]  ;;  %4011 = vmatpush.bf16.msra.mxu0 %v6164_v20 }
 0x27b   :  { %v6044_v44 = vor.u32 %v6848_v14, %v6041_v8  ;;  %v4416_v14 = vmax.f32 %v7968_v52, 0.0 }
 0x27c   :  { %v3666_v42 = vadd.f32 %v7995_v60, %v3637_v31  ;;  %v4458_v60 = vadd.f32 %v4410_v18, %v8838_v5  ;;  %v8036_v31 = vperm.slane %v8027_v27, 0  ;;  %v6944_v18 = vld [vmem:[#allocation8 + $0x81c] sm:$0xf]  ;;  %v6842_v5 = vld [vmem:[#allocation8 + $0x4ec] sm:$0xf] }
 0x27d   :  { %v3609_v39 = vpop.f32.mrf.mxu2  ;;  %3979 = vmatpush.bf16.msra.mxu3 %v6044_v44  ;;  %v6428_v11 = vor.u32 %v6944_v18, %v6425_v58  ;;  %v6794_v44 = vld [vmem:[#allocation8 + $0x36c] sm:$0xf]  ;;  %v6401_v18 = vld [vmem:[#allocation8 + $0x800] sm:$0xf0] }
 0x27e   :  { %v3610_v40 = vadd.f32 %v3609_v39, %v7958_v35  ;;  %v3695_v22 = vadd.f32 %v3694_v24, %v3666_v42  ;;  %v8039_v35 = vperm.slane %v8027_v27, 1  ;;  %v8839_v24 = vld [vmem:[#allocation17_spill] sm:$0xff]  ;;  %v4520_v8 = vmul.f32 %v8036_v31, %v4458_v60  ;;  %v6932_v27 = vld [vmem:[#allocation8 + $0x7bc] sm:$0xf] }
 0x27f   :  { %v8840_v20 = vmax.f32 %v8839_v24, 0.0  ;;  %v6017_v24 = vld [vmem:[#allocation8 + $0x500] sm:$0xf0]  ;;  %4037 = vmatpush.bf16.msra.mxu1 %v6428_v11  ;;  %v6938_v60 = vld [vmem:[#allocation8 + $0x7ec] sm:$0xf] }
 0x280   :  { %v8031_v0 = vpop.f32.mrf.mxu0  ;;  %v4411_v53 = vmax.f32 %v3695_v22, 0.0 }
 0x281   :  { %v3699_v46 = vpop.f32.mrf.mxu1  ;;  %v3638_v39 = vpop.f32.mrf.mxu3 }
 0x282   :  { %3843 = vmatmul.bf16.gmra.mxu2 %v7814_v34  ;;  %v4459_v42 = vadd.f32 %v4411_v53, %v8840_v20  ;;  %v3639_v12 = vadd.f32 %v3638_v39, %v3610_v40  ;;  %v5828_v39 = vor.u32 %v6794_v44, %v5825_v55  ;;  %v6020_v20 = vor.u32 %v6842_v5, %v6017_v24  ;;  %v5801_v44 = vld [vmem:[#allocation8 + $0x350] sm:$0xf0] }
 0x283   :  { %3906 = vmatmul.bf16.gmra.mxu0 %v7641_v4 }
 0x284   :  { %3930 = vmatmul.bf16.gmra.mxu1 %v7586_v33  ;;  %v4521_v2 = vmul.f32 %v8039_v35, %v4459_v42  ;;  %v3668_v50 = vadd.f32 %v8006_v48, %v3639_v12  ;;  %3951 = vmatpush.bf16.msra.mxu2 %v5828_v39  ;;  %v6404_v48 = vor.u32 %v6938_v60, %v6401_v18  ;;  %v8841_v12 = vld [vmem:[#allocation18_spill] sm:$0xff]  ;;  %v6836_v18 = vld [vmem:[#allocation8 + $0x4bc] sm:$0xf] }
 0x285   :  { %v3612_v22 = vpop.f32.mrf.mxu2  ;;  %v8842_v58 = vmax.f32 %v8841_v12, 0.0  ;;  %3980 = vmatpush.bf16.msra.mxu3 %v6020_v20  ;;  %v5993_v12 = vld [vmem:[#allocation8 + $0x4d0] sm:$0xf0] }
 0x286   :  { %v3613_v53 = vadd.f32 %v3612_v22, %v7965_v36  ;;  %v3697_v52 = vadd.f32 %v3696_v30, %v3668_v50  ;;  %3872 = vmatmul.bf16.gmra.mxu3 %v7827_v13  ;;  %v8054_v42 = vadd.f32 %v4521_v2, %v4520_v8  ;;  %v6788_v22 = vld [vmem:[#allocation8 + $0x33c] sm:$0xf]  ;;  %4038 = vmatpush.bf16.msra.mxu1 %v6404_v48  ;;  %v6377_v8 = vld [vmem:[#allocation8 + $0x7d0] sm:$0xf0]  ;;  %v4422_v2 = vmax.f32 %v7976_v7, 0.0 }
 0x287   :  { %v4464_v4 = vadd.f32 %v4416_v14, %v8842_v58  ;;  %v5804_v11 = vor.u32 %v6788_v22, %v5801_v44  ;;  %v8843_v30 = vld [vmem:[#allocation19_spill] sm:$0xff]  ;;  %v6380_v39 = vor.u32 %v6932_v27, %v6377_v8  ;;  %v6782_v48 = vld [vmem:[#allocation8 + $0x30c] sm:$0xf]  ;;  %v5777_v22 = vld [vmem:[#allocation8 + $0x320] sm:$0xf0] }
 0x288   :  { %v8051_v40 = vpop.f32.mrf.mxu0  ;;  %v4417_v33 = vmax.f32 %v3697_v52, 0.0  ;;  %v8844_v50 = vmax.f32 %v8843_v30, 0.0  ;;  %v5780_v44 = vor.u32 %v6782_v48, %v5777_v22  ;;  %v6926_v27 = vld [vmem:[#allocation8 + $0x78c] sm:$0xf] }
 0x289   :  { %v3701_v36 = vpop.f32.mrf.mxu1  ;;  %v3641_v55 = vpop.f32.mrf.mxu3  ;;  %3952 = vmatpush.bf16.msra.mxu2 %v5804_v11  ;;  %v4526_v14 = vmul.f32 %v8036_v31, %v4464_v4 }
 0x28a   :  { %v4465_v5 = vadd.f32 %v4417_v33, %v8844_v50  ;;  %v3642_v24 = vadd.f32 %v3641_v55, %v3613_v53  ;;  %v5996_v53 = vor.u32 %v6836_v18, %v5993_v12  ;;  %4039 = vmatpush.bf16.msra.mxu1 %v6380_v39  ;;  %v6353_v55 = vld [vmem:[#allocation8 + $0x7a0] sm:$0xf0]  ;;  %v8846_v39 = vmax.f32 %v7375_v37, 0.0 }
 0x28b   :  { %v6356_v11 = vor.u32 %v6926_v27, %v6353_v55  ;;  %v8848_v27 = vmax.f32 %v7382_v10, 0.0  ;;  %v6780_v10 = vld [vmem:[#allocation8 + $0x2f4] sm:$0xf0] }
 0x28c   :  { %v4527_v52 = vmul.f32 %v8039_v35, %v4465_v5  ;;  %v3671_v20 = vadd.f32 %v8015_v21, %v3642_v24  ;;  %3981 = vmatpush.bf16.msra.mxu3 %v5996_v53  ;;  %v8845_v21 = vmax.f32 %v7372_v9, 0.0  ;;  %v6830_v5 = vld [vmem:[#allocation8 + $0x48c] sm:$0xf]  ;;  %v5969_v24 = vld [vmem:[#allocation8 + $0x4a0] sm:$0xf0] }
 0x28d   :  { %v3614_v60 = vpop.f32.mrf.mxu2  ;;  %3953 = vmatpush.bf16.msra.mxu2 %v5780_v44 }
 0x28e   :  { %v3615_v58 = vadd.f32 %v3614_v60, %v7974_v3  ;;  %v3700_v7 = vadd.f32 %v3699_v46, %v3671_v20  ;;  %v8067_v4 = vadd.f32 %v4527_v52, %v4526_v14  ;;  %v4470_v30 = vadd.f32 %v4422_v2, %v8845_v21  ;;  %4040 = vmatpush.bf16.msra.mxu1 %v6356_v11 }
 0x28f   :  { %v5972_v46 = vor.u32 %v6830_v5, %v5969_v24  ;;  %v4428_v2 = vmax.f32 %v7984_v63, 0.0  ;;  %v4434_v11 = vmax.f32 %v7992_v51, 0.0  ;;  %v6732_v5 = vld [vmem:[#allocation8 + $0x174] sm:$0xf0] }
 0x290   :  { %v8065_v33 = vpop.f32.mrf.mxu0  ;;  %v4423_v50 = vmax.f32 %v3700_v7, 0.0  ;;  %v4532_v9 = vmul.f32 %v8036_v31, %v4470_v30 }
 0x291   :  { %v3704_v3 = vpop.f32.mrf.mxu1  ;;  %v3643_v8 = vpop.f32.mrf.mxu3  ;;  %3982 = vmatpush.bf16.msra.mxu3 %v5972_v46 }
 0x292   :  { %3848 = vmatmul.bf16.gmra.mxu2 %v7848_v41  ;;  %v4471_v14 = vadd.f32 %v4423_v50, %v8846_v39  ;;  %v3644_v52 = vadd.f32 %v3643_v8, %v3615_v58  ;;  %v8847_v58 = vmax.f32 %v7378_v45, 0.0  ;;  %v5567_v50 = vld [vmem:[#allocation8 + $0x160] sm:$0xf]  ;;  %v5543_v39 = vld [vmem:[#allocation8 + $0x130] sm:$0xf] }
 0x293   :  { %3911 = vmatmul.bf16.gmra.mxu0 %v7704_v62  ;;  %v5759_v45 = vld [vmem:[#allocation8 + $0x2e0] sm:$0xf]  ;;  %v5568_v46 = vor.u32 %v6732_v5, %v5567_v50  ;;  %v4440_v50 = vmax.f32 %v8002_v47, 0.0  ;;  %v6768_v47 = vld [vmem:[#allocation8 + $0x294] sm:$0xf0] }
 0x294   :  { %3935 = vmatmul.bf16.gmra.mxu1 %v7651_v29  ;;  %v4533_v20 = vmul.f32 %v8039_v35, %v4471_v14  ;;  %v3673_v60 = vadd.f32 %v8023_v26, %v3644_v52  ;;  %v4476_v22 = vadd.f32 %v4428_v2, %v8847_v58  ;;  %v6726_v14 = vld [vmem:[#allocation8 + $0x144] sm:$0xf0]  ;;  %v5760_v51 = vor.u32 %v6780_v10, %v5759_v45 }
 0x295   :  { %v3617_v18 = vpop.f32.mrf.mxu2  ;;  %v6774_v2 = vld [vmem:[#allocation8 + $0x2c4] sm:$0xf0]  ;;  %4062 = vmatpush.bf16.msrb.mxu2 %v5568_v46 }
 0x296   :  { %v3618_v12 = vadd.f32 %v3617_v18, %v7981_v6  ;;  %v3702_v53 = vadd.f32 %v3701_v36, %v3673_v60  ;;  %3877 = vmatmul.bf16.gmra.mxu3 %v7861_v32  ;;  %v8084_v37 = vadd.f32 %v4533_v20, %v4532_v9  ;;  %v4538_v6 = vmul.f32 %v8036_v31, %v4476_v22  ;;  %v5735_v9 = vld [vmem:[#allocation8 + $0x2b0] sm:$0xf]  ;;  %v5951_v20 = vld [vmem:[#allocation8 + $0x460] sm:$0xf]  ;;  %v6828_v18 = vld [vmem:[#allocation8 + $0x474] sm:$0xf0] }
 0x297   :  { %4091 = vmatpush.bf16.msrb.mxu3 %v5760_v51  ;;  %v5736_v22 = vor.u32 %v6774_v2, %v5735_v9  ;;  %v5711_v51 = vld [vmem:[#allocation8 + $0x280] sm:$0xf]  ;;  %v6119_v9 = vld [vmem:[#allocation8 + $0x5b0] sm:$0xf] }
 0x298   :  { %v8081_v48 = vpop.f32.mrf.mxu0  ;;  %v4429_v7 = vmax.f32 %v3702_v53, 0.0 }
 0x299   :  { %v3706_v44 = vpop.f32.mrf.mxu1  ;;  %v3646_v63 = vpop.f32.mrf.mxu3 }
 0x29a   :  { %v4477_v55 = vadd.f32 %v4429_v7, %v8848_v27  ;;  %v3647_v26 = vadd.f32 %v3646_v63, %v3618_v12  ;;  %v8849_v12 = vmax.f32 %v7388_v15, 0.0  ;;  %v6143_v7 = vld [vmem:[#allocation8 + $0x5e0] sm:$0xf]  ;;  %v6876_v63 = vld [vmem:[#allocation8 + $0x5f4] sm:$0xf0] }
 0x29b   :  { %v5927_v15 = vld [vmem:[#allocation8 + $0x430] sm:$0xf]  ;;  %4092 = vmatpush.bf16.msrb.mxu3 %v5736_v22 }
 0x29c   :  { %v4539_v36 = vmul.f32 %v8039_v35, %v4477_v55  ;;  %v3676_v21 = vadd.f32 %v8031_v0, %v3647_v26  ;;  %v5544_v0 = vor.u32 %v6726_v14, %v5543_v39  ;;  %v4482_v53 = vadd.f32 %v4434_v11, %v8849_v12  ;;  %v6822_v11 = vld [vmem:[#allocation8 + $0x444] sm:$0xf0] }
 0x29d   :  { %v3619_v30 = vpop.f32.mrf.mxu2  ;;  %v6144_v55 = vor.u32 %v6876_v63, %v6143_v7  ;;  %v8850_v26 = vmax.f32 %v7391_v23, 0.0  ;;  %v5519_v23 = vld [vmem:[#allocation8 + $0x100] sm:$0xf]  ;;  %v8851_v12 = vmax.f32 %v7394_v25, 0.0  ;;  %v8852_v7 = vmax.f32 %v7398_v49, 0.0 }
 0x29e   :  { %v3620_v24 = vadd.f32 %v3619_v30, %v7990_v17  ;;  %v3705_v52 = vadd.f32 %v3704_v3, %v3676_v21  ;;  %v8097_v60 = vadd.f32 %v4539_v36, %v4538_v6  ;;  %v5952_v3 = vor.u32 %v6828_v18, %v5951_v20  ;;  %4063 = vmatpush.bf16.msrb.mxu2 %v5544_v0  ;;  %v6870_v20 = vld [vmem:[#allocation8 + $0x5c4] sm:$0xf0]  ;;  %v5903_v0 = vld [vmem:[#allocation8 + $0x400] sm:$0xf]  ;;  %v6816_v18 = vld [vmem:[#allocation8 + $0x414] sm:$0xf0] }
 0x29f   :  { %v5928_v21 = vor.u32 %v6822_v11, %v5927_v15  ;;  %v4544_v30 = vmul.f32 %v8036_v31, %v4482_v53  ;;  %4149 = vmatpush.bf16.msrb.mxu1 %v6144_v55  ;;  %v6120_v22 = vor.u32 %v6870_v20, %v6119_v9  ;;  %v5879_v55 = vld [vmem:[#allocation8 + $0x3d0] sm:$0xf]  ;;  %v4446_v25 = vmax.f32 %v8012_v38, 0.0  ;;  %v6804_v38 = vld [vmem:[#allocation8 + $0x3b4] sm:$0xf0] }
 0x2a0   :  { %v8095_v8 = vpop.f32.mrf.mxu0  ;;  %v4435_v17 = vmax.f32 %v3705_v52, 0.0  ;;  %4120 = vmatpush.bf16.msrb.mxu0 %v5952_v3  ;;  %v6864_v20 = vld [vmem:[#allocation8 + $0x594] sm:$0xf0] }
 0x2a1   :  { %v8102_v58 = vpop.f32.mrf.mxu1  ;;  %v3648_v27 = vpop.f32.mrf.mxu3 }
 0x2a2   :  { %3853 = vmatmul.bf16.gmra.mxu2 %v7884_v28  ;;  %v4483_v6 = vadd.f32 %v4435_v17, %v8850_v26  ;;  %v3649_v36 = vadd.f32 %v3648_v27, %v3620_v24  ;;  %v6720_v24 = vld [vmem:[#allocation8 + $0x114] sm:$0xf0]  ;;  %v6810_v26 = vld [vmem:[#allocation8 + $0x3e4] sm:$0xf0] }
 0x2a3   :  { %4012 = vmatmul.bf16.vlgmr.msra.gmra.mxu0 %v7779_v43  ;;  %v5520_v14 = vor.u32 %v6720_v24, %v5519_v23  ;;  %4150 = vmatpush.bf16.msrb.mxu1 %v6120_v22  ;;  %v6762_v23 = vld [vmem:[#allocation8 + $0x264] sm:$0xf0] }
 0x2a4   :  { %3940 = vmatmul.bf16.gmra.mxu1 %v7712_v19  ;;  %v4545_v5 = vmul.f32 %v8039_v35, %v4483_v6  ;;  %v3678_v45 = vadd.f32 %v8051_v40, %v3649_v36  ;;  %4121 = vmatpush.bf16.msrb.mxu0 %v5928_v21  ;;  %v5712_v40 = vor.u32 %v6768_v47, %v5711_v51  ;;  %v8853_v51 = vmax.f32 %v7404_v16, 0.0  ;;  %v6798_v16 = vld [vmem:[#allocation8 + $0x384] sm:$0xf0] }
 0x2a5   :  { %v3622_v46 = vpop.f32.mrf.mxu2  ;;  %4064 = vmatpush.bf16.msrb.mxu2 %v5520_v14  ;;  %v5880_v6 = vor.u32 %v6810_v26, %v5879_v55  ;;  %v5855_v14 = vld [vmem:[#allocation8 + $0x3a0] sm:$0xf] }
 0x2a6   :  { %v3623_v10 = vadd.f32 %v3622_v46, %v7999_v56  ;;  %v3707_v52 = vadd.f32 %v3706_v44, %v3678_v45  ;;  %3882 = vmatmul.bf16.gmra.mxu3 %v7901_v59  ;;  %v8116_v2 = vadd.f32 %v4545_v5, %v4544_v30  ;;  %v4488_v56 = vadd.f32 %v4440_v50, %v8851_v12  ;;  %v5495_v30 = vld [vmem:[#allocation8 + $0xd0] sm:$0xf]  ;;  %v6714_v50 = vld [vmem:[#allocation8 + $0xe4] sm:$0xf0]  ;;  %v8145_v26 = vld [vmem:[#allocation10] sm:$0x3f] }
 0x2a7   :  { %v5904_v44 = vor.u32 %v6816_v18, %v5903_v0  ;;  %4093 = vmatpush.bf16.msrb.mxu3 %v5712_v40  ;;  %v5496_v45 = vor.u32 %v6714_v50, %v5495_v30  ;;  %v5687_v46 = vld [vmem:[#allocation8 + $0x250] sm:$0xf]  ;;  %v4494_v47 = vadd.f32 %v4446_v25, %v8853_v51  ;;  %v6095_v40 = vld [vmem:[#allocation8 + $0x580] sm:$0xf]  ;;  %v8855_v12 = vld [vmem:[#allocation20_spill] sm:$0xff] }
 0x2a8   :  { %v8113_v39 = vpop.f32.mrf.mxu0  ;;  %v4441_v53 = vmax.f32 %v3707_v52, 0.0  ;;  %v4550_v36 = vmul.f32 %v8036_v31, %v4488_v56  ;;  %v8854_v0 = vld [vmem:[#allocation27_spill] sm:$0xff]  ;;  %v6096_v18 = vor.u32 %v6864_v20, %v6095_v40  ;;  %v8856_v56 = vmax.f32 %v8855_v12, 0.0 }
 0x2a9   :  { %v3711_v17 = vpop.f32.mrf.mxu1  ;;  %v3651_v3 = vpop.f32.mrf.mxu3  ;;  %4122 = vmatpush.bf16.msrb.mxu0 %v5904_v44  ;;  %4065 = vmatpush.bf16.msrb.mxu2 %v5496_v45  ;;  %v5831_v44 = vld [vmem:[#allocation8 + $0x370] sm:$0xf]  ;;  %v5471_v25 = vld [vmem:[#allocation8 + $0xa0] sm:$0xf] }
 0x2aa   :  { %v4489_v63 = vadd.f32 %v4441_v53, %v8852_v7  ;;  %v3652_v27 = vadd.f32 %v3651_v3, %v3623_v10  ;;  %v5688_v10 = vor.u32 %v6762_v23, %v5687_v46  ;;  %v4452_v3 = vmax.f32 %v8019_v61, 0.0  ;;  %4151 = vmatpush.bf16.msrb.mxu1 %v6096_v18  ;;  %v8857_v30 = vld [vmem:[#allocation35_spill] sm:$0xff]  ;;  %v6071_v45 = vld [vmem:[#allocation8 + $0x550] sm:$0xf] }
 0x2ab   :  { %v5832_v7 = vor.u32 %v6798_v16, %v5831_v44  ;;  %v5663_v50 = vld [vmem:[#allocation8 + $0x220] sm:$0xf]  ;;  %v8858_v46 = vld [vmem:[#allocation21_spill] sm:$0xff] }
 0x2ac   :  { %v4551_v15 = vmul.f32 %v8039_v35, %v4489_v63  ;;  %v3681_v11 = vadd.f32 %v8065_v33, %v3652_v27  ;;  %v5856_v33 = vor.u32 %v6804_v38, %v5855_v14  ;;  %4094 = vmatpush.bf16.msrb.mxu3 %v5688_v10  ;;  %v4556_v63 = vmul.f32 %v8036_v31, %v4494_v47  ;;  %v6858_v14 = vld [vmem:[#allocation8 + $0x564] sm:$0xf0]  ;;  %v5807_v38 = vld [vmem:[#allocation8 + $0x340] sm:$0xf] }
 0x2ad   :  { %v3624_v21 = vpop.f32.mrf.mxu2  ;;  %4123 = vmatpush.bf16.msrb.mxu0 %v5880_v6  ;;  %v8148_v6 = vperm.slane %v8145_v26, 2  ;;  %v8859_v23 = vmax.f32 %v8858_v46, 0.0 }
 0x2ae   :  { %v3625_v49 = vadd.f32 %v3624_v21, %v8010_v57  ;;  %v3710_v24 = vadd.f32 %v8102_v58, %v3681_v11  ;;  %v8130_v52 = vadd.f32 %v4551_v15, %v4550_v36  ;;  %v6708_v15 = vld [vmem:[#allocation8 + $0xb4] sm:$0xf0] }
 0x2af   :  { %v5472_v61 = vor.u32 %v6708_v15, %v5471_v25  ;;  %v5639_v15 = vld [vmem:[#allocation8 + $0x1f0] sm:$0xf] }
 0x2b0   :  { %v8127_v5 = vpop.f32.mrf.mxu0  ;;  %v4447_v9 = vmax.f32 %v3710_v24, 0.0  ;;  %v4500_v24 = vadd.f32 %v4452_v3, %v8859_v23  ;;  %v8862_v23 = vld [vmem:[#allocation34_spill] sm:$0xff] }
 0x2b1   :  { %v8135_v57 = vpop.f32.mrf.mxu1  ;;  %v3653_v58 = vpop.f32.mrf.mxu3  ;;  %4124 = vmatpush.bf16.msrb.mxu0 %v5856_v33  ;;  %4066 = vmatpush.bf16.msrb.mxu2 %v5472_v61  ;;  %v6792_v33 = vld [vmem:[#allocation8 + $0x354] sm:$0xf0]  ;;  %v6750_v61 = vld [vmem:[#allocation8 + $0x204] sm:$0xf0] }
 0x2b2   :  { %3954 = vmatmul.bf16.vlgmr.msra.gmra.mxu2 %v8854_v0  ;;  %v4495_v53 = vadd.f32 %v4447_v9, %v8856_v56  ;;  %v3654_v22 = vadd.f32 %v3653_v58, %v3625_v49  ;;  %v6756_v49 = vld [vmem:[#allocation8 + $0x234] sm:$0xf0]  ;;  %v6072_v9 = vor.u32 %v6858_v14, %v6071_v45  ;;  %v5808_v40 = vor.u32 %v6792_v33, %v5807_v38  ;;  %v5423_v38 = vld [vmem:[#allocation8 + $0x40] sm:$0xf] }
 0x2b3   :  { %4017 = vmatmul.bf16.gmra.mxu0 %v7814_v34  ;;  %v5664_v10 = vor.u32 %v6756_v49, %v5663_v50  ;;  %v8860_v58 = vld [vmem:[#allocation22_spill] sm:$0xff]  ;;  %v4562_v16 = vmul.f32 %v8036_v31, %v4500_v24  ;;  %v5640_v31 = vor.u32 %v6750_v61, %v5639_v15  ;;  %v6047_v49 = vld [vmem:[#allocation8 + $0x520] sm:$0xf] }
 0x2b4   :  { %4041 = vmatmul.bf16.vlgmr.msra.gmra.mxu1 %v7792_v1  ;;  %v4557_v27 = vmul.f32 %v8039_v35, %v4495_v53  ;;  %v3683_v55 = vadd.f32 %v8081_v48, %v3654_v22  ;;  %v8861_v18 = vmax.f32 %v8860_v58, 0.0  ;;  %v5783_v53 = vld [vmem:[#allocation8 + $0x310] sm:$0xf]  ;;  %v6786_v22 = vld [vmem:[#allocation8 + $0x324] sm:$0xf0] }
 0x2b5   :  { %v3723_v36 = vpop.f32.mrf.mxu2  ;;  %4125 = vmatpush.bf16.msrb.mxu0 %v5832_v7  ;;  %4095 = vmatpush.bf16.msrb.mxu3 %v5664_v10  ;;  %v5784_v44 = vor.u32 %v6786_v22, %v5783_v53  ;;  %v6852_v45 = vld [vmem:[#allocation8 + $0x534] sm:$0xf0]  ;;  %v6023_v58 = vld [vmem:[#allocation8 + $0x4f0] sm:$0xf] }
 0x2b6   :  { %v3712_v21 = vadd.f32 %v3711_v17, %v3683_v55  ;;  %3983 = vmatmul.bf16.vlgmr.msra.gmra.mxu3 %v8857_v30  ;;  %v8153_v48 = vadd.f32 %v4557_v27, %v4556_v63  ;;  %v3724_v47 = vadd.f32 %v3723_v36, %v8148_v6  ;;  %4152 = vmatpush.bf16.msrb.mxu1 %v6072_v9  ;;  %v5447_v27 = vld [vmem:[#allocation8 + $0x70] sm:$0xf]  ;;  %v6702_v55 = vld [vmem:[#allocation8 + $0x84] sm:$0xf0]  ;;  %v6696_v33 = vld [vmem:[#allocation8 + $0x54] sm:$0xf0] }
 0x2b7   :  { %v5448_v25 = vor.u32 %v6702_v55, %v5447_v27  ;;  %v6048_v24 = vor.u32 %v6852_v45, %v6047_v49  ;;  %v8863_v9 = vld [vmem:[#allocation42_spill] sm:$0xff]  ;;  %v5975_v49 = vld [vmem:[#allocation8 + $0x490] sm:$0xf] }
 0x2b8   :  { %v8150_v11 = vpop.f32.mrf.mxu0  ;;  %v4453_v51 = vmax.f32 %v3712_v21, 0.0 }
 0x2b9   :  { %v3812_v17 = vpop.f32.mrf.mxu1  ;;  %v3752_v20 = vpop.f32.mrf.mxu3  ;;  %4126 = vmatpush.bf16.msrb.mxu0 %v5808_v40  ;;  %4067 = vmatpush.bf16.msrb.mxu2 %v5448_v25  ;;  %v5615_v40 = vld [vmem:[#allocation8 + $0x1c0] sm:$0xf]  ;;  %v5399_v25 = vld [vmem:[#allocation8 + $0x10] sm:$0xf] }
 0x2ba   :  { %v4501_v12 = vadd.f32 %v4453_v51, %v8861_v18  ;;  %v3753_v56 = vadd.f32 %v3752_v20, %v3724_v47  ;;  %4096 = vmatpush.bf16.msrb.mxu3 %v5640_v31  ;;  %4153 = vmatpush.bf16.msrb.mxu1 %v6048_v24  ;;  %v5424_v47 = vor.u32 %v6696_v33, %v5423_v38  ;;  %v6744_v20 = vld [vmem:[#allocation8 + $0x1d4] sm:$0xf0]  ;;  %v5591_v31 = vld [vmem:[#allocation8 + $0x190] sm:$0xf]  ;;  %v6834_v24 = vld [vmem:[#allocation8 + $0x4a4] sm:$0xf0] }
 0x2bb   :  { %v8864_v38 = vld [vmem:[#allocation41_spill] sm:$0xff] }
 0x2bc   :  { %v4563_v3 = vmul.f32 %v8039_v35, %v4501_v12  ;;  %v3782_v7 = vadd.f32 %v8095_v8, %v3753_v56  ;;  %v5616_v12 = vor.u32 %v6744_v20, %v5615_v40  ;;  %v6846_v56 = vld [vmem:[#allocation8 + $0x504] sm:$0xf0]  ;;  %v6335_v40 = vld [vmem:[#allocation8 + $0x760] sm:$0xf]  ;;  %v6924_v20 = vld [vmem:[#allocation8 + $0x774] sm:$0xf0] }
 0x2bd   :  { %v3725_v63 = vpop.f32.mrf.mxu2  ;;  %4127 = vmatpush.bf16.msrb.mxu0 %v5784_v44  ;;  %4068 = vmatpush.bf16.msrb.mxu2 %v5424_v47  ;;  %v6024_v22 = vor.u32 %v6846_v56, %v6023_v58  ;;  %v6527_v56 = vld [vmem:[#allocation8 + $0x8e0] sm:$0xf] }
 0x2be   :  { %v8166_v21 = vadd.f32 %v8135_v57, %v3782_v7  ;;  %v8168_v50 = vadd.f32 %v4563_v3, %v4562_v16  ;;  %v3726_v35 = vadd.f32 %v3725_v63, %v8148_v6  ;;  %4097 = vmatpush.bf16.msrb.mxu3 %v5616_v12  ;;  %v5999_v3 = vld [vmem:[#allocation8 + $0x4c0] sm:$0xf]  ;;  %v6840_v7 = vld [vmem:[#allocation8 + $0x4d4] sm:$0xf0]  ;;  %v6336_v12 = vor.u32 %v6924_v20, %v6335_v40  ;;  %v6723_v20 = vld [vmem:[#allocation8 + $0x134] sm:$0xf] }
 0x2bf   :  { %4154 = vmatpush.bf16.msrb.mxu1 %v6024_v22  ;;  %v6000_v63 = vor.u32 %v6840_v7, %v5999_v3 }
 0x2c0   :  { %v8163_v36 = vpop.f32.mrf.mxu0 }
 0x2c1   :  { %v3815_v8 = vpop.f32.mrf.mxu1  ;;  %v3754_v46 = vpop.f32.mrf.mxu3 }
 0x2c2   :  { %3959 = vmatmul.bf16.gmra.mxu2 %v8862_v23  ;;  %v3755_v10 = vadd.f32 %v3754_v46, %v3726_v35  ;;  %v6738_v35 = vld [vmem:[#allocation8 + $0x1a4] sm:$0xf0] }
 0x2c3   :  { %4022 = vmatmul.bf16.gmra.mxu0 %v7848_v41  ;;  %4155 = vmatpush.bf16.msrb.mxu1 %v6000_v63  ;;  %v5592_v46 = vor.u32 %v6738_v35, %v5591_v31 }
 0x2c4   :  { %4046 = vmatmul.bf16.gmra.mxu1 %v7827_v13  ;;  %v3784_v57 = vadd.f32 %v8113_v39, %v3755_v10 }
 0x2c5   :  { %v3728_v14 = vpop.f32.mrf.mxu2  ;;  %4098 = vmatpush.bf16.msrb.mxu3 %v5592_v46  ;;  %v6918_v46 = vld [vmem:[#allocation8 + $0x744] sm:$0xf0] }
 0x2c6   :  { %3988 = vmatmul.bf16.gmra.mxu3 %v8863_v9  ;;  %v8178_v18 = vadd.f32 %v3812_v17, %v3784_v57  ;;  %v3729_v53 = vadd.f32 %v3728_v14, %v8148_v6  ;;  %v6690_v17 = vld [vmem:[#allocation8 + $0x24] sm:$0xf0]  ;;  %v5976_v57 = vor.u32 %v6834_v24, %v5975_v49  ;;  %v6311_v49 = vld [vmem:[#allocation8 + $0x730] sm:$0xf] }
 0x2c7   :  { %v5400_v61 = vor.u32 %v6690_v17, %v5399_v25  ;;  %v6729_v25 = vld [vmem:[#allocation8 + $0x164] sm:$0xf]  ;;  %v5569_v17 = vld [vmem:[#allocation8 + $0x178] sm:$0xf0]  ;;  %v6503_v24 = vld [vmem:[#allocation8 + $0x8b0] sm:$0xf] }
 0x2c8   :  { %v8175_v51 = vpop.f32.mrf.mxu0  ;;  %4156 = vmatpush.bf16.msrb.mxu1 %v5976_v57  ;;  %v5572_v31 = vor.u32 %v6729_v25, %v5569_v17  ;;  %v8865_v57 = vld [vmem:[#allocation47_spill] sm:$0xff] }
 0x2c9   :  { %v3817_v39 = vpop.f32.mrf.mxu1  ;;  %v3757_v44 = vpop.f32.mrf.mxu3  ;;  %4069 = vmatpush.bf16.msrb.mxu2 %v5400_v61 }
 0x2ca   :  { %v3758_v16 = vadd.f32 %v3757_v44, %v3729_v53  ;;  %v6972_v53 = vld [vmem:[#allocation8 + $0x8f4] sm:$0xf0]  ;;  %4236 = vmatpush.bf16.msra.mxu0 %v5572_v31 }
 0x2cb   :  { %v6528_v44 = vor.u32 %v6972_v53, %v6527_v56 }
 0x2cc   :  { %v3787_v27 = vadd.f32 %v8127_v5, %v3758_v16 }
 0x2cd   :  { %v3730_v55 = vpop.f32.mrf.mxu2  ;;  %4178 = vmatpush.bf16.msra.mxu2 %v6336_v12  ;;  %4207 = vmatpush.bf16.msra.mxu3 %v6528_v44  ;;  %v5545_v12 = vld [vmem:[#allocation8 + $0x148] sm:$0xf0] }
 0x2ce   :  { %v8184_v45 = vadd.f32 %v3815_v8, %v3787_v27  ;;  %v3731_v10 = vadd.f32 %v3730_v55, %v8148_v6  ;;  %v5548_v56 = vor.u32 %v6723_v20, %v5545_v12 }
 0x2d0   :  { %v8182_v15 = vpop.f32.mrf.mxu0  ;;  %4237 = vmatpush.bf16.msra.mxu0 %v5548_v56 }
 0x2d1   :  { %v3820_v5 = vpop.f32.mrf.mxu1  ;;  %v3759_v14 = vpop.f32.mrf.mxu3 }
 0x2d2   :  { %3964 = vmatmul.bf16.gmra.mxu2 %v8864_v38  ;;  %v3760_v33 = vadd.f32 %v3759_v14, %v3731_v10  ;;  %v6966_v14 = vld [vmem:[#allocation8 + $0x8c4] sm:$0xf0] }
 0x2d3   :  { %4027 = vmatmul.bf16.gmra.mxu0 %v7884_v28 }
 0x2d4   :  { %4051 = vmatmul.bf16.gmra.mxu1 %v7861_v32  ;;  %v3789_v8 = vadd.f32 %v8150_v11, %v3760_v33  ;;  %v6777_v33 = vld [vmem:[#allocation8 + $0x2e4] sm:$0xf] }
 0x2d5   :  { %v3733_v47 = vpop.f32.mrf.mxu2 }
 0x2d6   :  { %3993 = vmatmul.bf16.gmra.mxu3 %v7732_v54  ;;  %v8194_v22 = vadd.f32 %v3817_v39, %v3789_v8  ;;  %v3734_v16 = vadd.f32 %v3733_v47, %v8148_v6  ;;  %v5761_v8 = vld [vmem:[#allocation8 + $0x2f8] sm:$0xf0] }
 0x2d7   :  { %v5764_v40 = vor.u32 %v6777_v33, %v5761_v8 }
 0x2d8   :  { %v8191_v58 = vpop.f32.mrf.mxu0 }
 0x2d9   :  { %v3822_v3 = vpop.f32.mrf.mxu1  ;;  %v3762_v7 = vpop.f32.mrf.mxu3  ;;  %4265 = vmatpush.bf16.msra.mxu1 %v5764_v40  ;;  %v5497_v40 = vld [vmem:[#allocation8 + $0xe8] sm:$0xf0] }
 0x2da   :  { %v3763_v11 = vadd.f32 %v3762_v7, %v3734_v16  ;;  %v8866_v7 = vld [vmem:[#allocation50_spill] sm:$0xff] }
 0x2dc   :  { %v3792_v63 = vadd.f32 %v8163_v36, %v3763_v11  ;;  %v6312_v36 = vor.u32 %v6918_v46, %v6311_v49  ;;  %v6717_v11 = vld [vmem:[#allocation8 + $0x104] sm:$0xf]  ;;  %v6912_v49 = vld [vmem:[#allocation8 + $0x714] sm:$0xf0]  ;;  %v6479_v46 = vld [vmem:[#allocation8 + $0x880] sm:$0xf] }
 0x2dd   :  { %v3735_v27 = vpop.f32.mrf.mxu2 }
 0x2de   :  { %v8200_v61 = vadd.f32 %v3820_v5, %v3792_v63  ;;  %v3736_v39 = vadd.f32 %v3735_v27, %v8148_v6  ;;  %v6504_v5 = vor.u32 %v6966_v14, %v6503_v24  ;;  %4179 = vmatpush.bf16.msra.mxu2 %v6312_v36  ;;  %v5521_v63 = vld [vmem:[#allocation8 + $0x118] sm:$0xf0]  ;;  %v6771_v36 = vld [vmem:[#allocation8 + $0x2b4] sm:$0xf]  ;;  %v5737_v14 = vld [vmem:[#allocation8 + $0x2c8] sm:$0xf0] }
 0x2df   :  { %v5524_v25 = vor.u32 %v6717_v11, %v5521_v63  ;;  %v5473_v11 = vld [vmem:[#allocation8 + $0xb8] sm:$0xf0] }
 0x2e0   :  { %v8198_v55 = vpop.f32.mrf.mxu0  ;;  %4208 = vmatpush.bf16.msra.mxu3 %v6504_v5  ;;  %v6711_v5 = vld [vmem:[#allocation8 + $0xd4] sm:$0xf] }
 0x2e1   :  { %v3825_v35 = vpop.f32.mrf.mxu1  ;;  %v3764_v10 = vpop.f32.mrf.mxu3  ;;  %4238 = vmatpush.bf16.msra.mxu0 %v5524_v25  ;;  %v5500_v20 = vor.u32 %v6711_v5, %v5497_v40  ;;  %v5449_v5 = vld [vmem:[#allocation8 + $0x88] sm:$0xf0] }
 0x2e2   :  { %3969 = vmatmul.bf16.gmra.mxu2 %v8865_v57  ;;  %v3765_v47 = vadd.f32 %v3764_v10, %v3736_v39  ;;  %v6287_v39 = vld [vmem:[#allocation8 + $0x700] sm:$0xf]  ;;  %v6960_v10 = vld [vmem:[#allocation8 + $0x894] sm:$0xf0] }
 0x2e3   :  { %4128 = vmatmul.bf16.vlgmr.msrb.gmra.mxu0 %v8854_v0  ;;  %v6288_v24 = vor.u32 %v6912_v49, %v6287_v39  ;;  %v6480_v8 = vor.u32 %v6960_v10, %v6479_v46  ;;  %v6906_v49 = vld [vmem:[#allocation8 + $0x6e4] sm:$0xf0]  ;;  %v6455_v46 = vld [vmem:[#allocation8 + $0x850] sm:$0xf] }
 0x2e4   :  { %4056 = vmatmul.bf16.gmra.mxu1 %v7901_v59  ;;  %v3794_v53 = vadd.f32 %v8175_v51, %v3765_v47  ;;  %v5740_v47 = vor.u32 %v6771_v36, %v5737_v14  ;;  %v8867_v10 = vld [vmem:[#allocation25_spill] sm:$0xff]  ;;  %v6765_v14 = vld [vmem:[#allocation8 + $0x284] sm:$0xf] }
 0x2e5   :  { %v3738_v44 = vpop.f32.mrf.mxu2  ;;  %4180 = vmatpush.bf16.msra.mxu2 %v6288_v24  ;;  %4209 = vmatpush.bf16.msra.mxu3 %v6480_v8 }
 0x2e6   :  { %3998 = vmatmul.bf16.gmra.mxu3 %v8866_v7  ;;  %v8210_v27 = vadd.f32 %v3822_v3, %v3794_v53  ;;  %v3739_v17 = vadd.f32 %v3738_v44, %v8148_v6  ;;  %v8214_v3 = vperm.slane %v8145_v26, 3  ;;  %4266 = vmatpush.bf16.msra.mxu1 %v5740_v47  ;;  %v6705_v44 = vld [vmem:[#allocation8 + $0xa4] sm:$0xf] }
 0x2e7   :  { %4239 = vmatpush.bf16.msra.mxu0 %v5500_v20 }
 0x2e8   :  { %v8207_v16 = vpop.f32.mrf.mxu0  ;;  %v3898_v25 = vadd.f32 %v8198_v55, %v8214_v3 }
 0x2e9   :  { %v3827_v31 = vpop.f32.mrf.mxu1  ;;  %v3767_v51 = vpop.f32.mrf.mxu3 }
 0x2ea   :  { %v3768_v33 = vadd.f32 %v3767_v51, %v3739_v17  ;;  %v5476_v17 = vor.u32 %v6705_v44, %v5473_v11  ;;  %v8868_v11 = vld [vmem:[#allocation26_spill] sm:$0xff] }
 0x2ec   :  { %v3797_v12 = vadd.f32 %v8182_v15, %v3768_v33  ;;  %v6263_v15 = vld [vmem:[#allocation8 + $0x6d0] sm:$0xf]  ;;  %v5713_v33 = vld [vmem:[#allocation8 + $0x298] sm:$0xf0]  ;;  %4240 = vmatpush.bf16.msra.mxu0 %v5476_v17 }
 0x2ed   :  { %v3740_v56 = vpop.f32.mrf.mxu2  ;;  %v6264_v36 = vor.u32 %v6906_v49, %v6263_v15  ;;  %v5716_v47 = vor.u32 %v6765_v14, %v5713_v33  ;;  %v5425_v17 = vld [vmem:[#allocation8 + $0x58] sm:$0xf0]  ;;  %v6948_v14 = vld [vmem:[#allocation8 + $0x834] sm:$0xf0]  ;;  %v6759_v33 = vld [vmem:[#allocation8 + $0x254] sm:$0xf] }
 0x2ee   :  { %v8219_v63 = vadd.f32 %v3825_v35, %v3797_v12  ;;  %v3741_v26 = vadd.f32 %v3740_v56, %v8148_v6  ;;  %v6954_v35 = vld [vmem:[#allocation8 + $0x864] sm:$0xf0]  ;;  %v6699_v6 = vld [vmem:[#allocation8 + $0x74] sm:$0xf] }
 0x2ef   :  { %v6456_v8 = vor.u32 %v6954_v35, %v6455_v46  ;;  %4181 = vmatpush.bf16.msra.mxu2 %v6264_v36  ;;  %v5452_v40 = vor.u32 %v6699_v6, %v5449_v5  ;;  %4267 = vmatpush.bf16.msra.mxu1 %v5716_v47  ;;  %v6900_v46 = vld [vmem:[#allocation8 + $0x6b4] sm:$0xf0]  ;;  %v6687_v6 = vld [vmem:[#allocation8 + $0x14] sm:$0xf]  ;;  %v5401_v5 = vld [vmem:[#allocation8 + $0x28] sm:$0xf0] }
 0x2f0   :  { %v8217_v53 = vpop.f32.mrf.mxu0 }
 0x2f1   :  { %v3926_v39 = vpop.f32.mrf.mxu1  ;;  %v3769_v51 = vpop.f32.mrf.mxu3  ;;  %4210 = vmatpush.bf16.msra.mxu3 %v6456_v8  ;;  %4241 = vmatpush.bf16.msra.mxu0 %v5452_v40 }
 0x2f2   :  { %v8225_v24 = vadd.f32 %v3926_v39, %v3898_v25  ;;  %4070 = vmatmul.bf16.vlgmr.msrb.gmra.mxu2 %v8867_v10  ;;  %v3770_v55 = vadd.f32 %v3769_v51, %v3741_v26  ;;  %v6693_v25 = vld [vmem:[#allocation8 + $0x44] sm:$0xf]  ;;  %v3900_v39 = vadd.f32 %v8207_v16, %v8214_v3  ;;  %v6431_v51 = vld [vmem:[#allocation8 + $0x820] sm:$0xf]  ;;  %v5404_v16 = vor.u32 %v6687_v6, %v5401_v5  ;;  %v5665_v6 = vld [vmem:[#allocation8 + $0x238] sm:$0xf0] }
 0x2f3   :  { %4133 = vmatmul.bf16.gmra.mxu0 %v8862_v23  ;;  %v5428_v15 = vor.u32 %v6693_v25, %v5425_v17  ;;  %v6432_v47 = vor.u32 %v6948_v14, %v6431_v51  ;;  %v6407_v14 = vld [vmem:[#allocation8 + $0x7f0] sm:$0xf] }
 0x2f4   :  { %4157 = vmatmul.bf16.vlgmr.msrb.gmra.mxu1 %v8857_v30  ;;  %v3799_v20 = vadd.f32 %v8191_v58, %v3770_v55  ;;  %v6239_v58 = vld [vmem:[#allocation8 + $0x6a0] sm:$0xf]  ;;  %v5689_v55 = vld [vmem:[#allocation8 + $0x268] sm:$0xf0] }
 0x2f5   :  { %v3839_v12 = vpop.f32.mrf.mxu2  ;;  %4242 = vmatpush.bf16.msra.mxu0 %v5428_v15  ;;  %4211 = vmatpush.bf16.msra.mxu3 %v6432_v47  ;;  %v8870_v15 = vld [vmem:[#allocation24_spill] sm:$0xff] }
 0x2f6   :  { %v3840_v56 = vadd.f32 %v3839_v12, %v8166_v21  ;;  %4099 = vmatmul.bf16.vlgmr.msrb.gmra.mxu3 %v8868_v11  ;;  %v8234_v26 = vadd.f32 %v3827_v31, %v3799_v20  ;;  %v6240_v21 = vor.u32 %v6900_v46, %v6239_v58  ;;  %v5692_v31 = vor.u32 %v6759_v33, %v5689_v55  ;;  %v8869_v20 = vld [vmem:[#allocation67_spill] sm:$0xff]  ;;  %v6942_v47 = vld [vmem:[#allocation8 + $0x804] sm:$0xf0] }
 0x2f7   :  { %v8241_v12 = vperm.slane %v8869_v20, 2  ;;  %v3903_v58 = vadd.f32 %v8217_v53, %v8214_v3 }
 0x2f8   :  { %v8231_v44 = vpop.f32.mrf.mxu0  ;;  %4182 = vmatpush.bf16.msra.mxu2 %v6240_v21  ;;  %4268 = vmatpush.bf16.msra.mxu1 %v5692_v31  ;;  %v6894_v21 = vld [vmem:[#allocation8 + $0x684] sm:$0xf0]  ;;  %v6753_v31 = vld [vmem:[#allocation8 + $0x224] sm:$0xf] }
 0x2f9   :  { %v3928_v49 = vpop.f32.mrf.mxu1  ;;  %v3868_v36 = vpop.f32.mrf.mxu3  ;;  %4243 = vmatpush.bf16.msra.mxu0 %v5404_v16  ;;  %v6408_v16 = vor.u32 %v6942_v47, %v6407_v14  ;;  %v5668_v53 = vor.u32 %v6753_v31, %v5665_v6  ;;  %v6888_v47 = vld [vmem:[#allocation8 + $0x654] sm:$0xf0]  ;;  %v6383_v31 = vld [vmem:[#allocation8 + $0x7c0] sm:$0xf] }
 0x2fa   :  { %v8238_v35 = vadd.f32 %v3928_v49, %v3900_v39  ;;  %v3869_v8 = vadd.f32 %v3868_v36, %v3840_v56  ;;  %v8871_v56 = vmax.f32 %v8870_v15, 0.0  ;;  %v6215_v36 = vld [vmem:[#allocation8 + $0x670] sm:$0xf] }
 0x2fb   :  { %4212 = vmatpush.bf16.msra.mxu3 %v6408_v16  ;;  %v6936_v16 = vld [vmem:[#allocation8 + $0x7d4] sm:$0xf0] }
 0x2fc   :  { %v4412_v40 = vmax.f32 %v3869_v8, 0.0  ;;  %v6216_v8 = vor.u32 %v6894_v21, %v6215_v36  ;;  %4269 = vmatpush.bf16.msra.mxu1 %v5668_v53  ;;  %v8875_v36 = vld [vmem:[#allocation33_spill] sm:$0xff] }
 0x2fd   :  { %v3841_v25 = vpop.f32.mrf.mxu2  ;;  %v5641_v21 = vld [vmem:[#allocation8 + $0x208] sm:$0xf0] }
 0x2fe   :  { %v3842_v17 = vadd.f32 %v3841_v25, %v8178_v18  ;;  %v4460_v49 = vadd.f32 %v4412_v40, %v8871_v56  ;;  %v8872_v18 = vld [vmem:[#allocation31_spill] sm:$0xff]  ;;  %4183 = vmatpush.bf16.msra.mxu2 %v6216_v8 }
 0x2ff   :  { %v6191_v8 = vld [vmem:[#allocation8 + $0x640] sm:$0xf] }
 0x300   :  { %v8244_v39 = vpop.f32.mrf.mxu0  ;;  %v4522_v46 = vmul.f32 %v8241_v12, %v4460_v49  ;;  %v8873_v49 = vld [vmem:[#allocation23_spill] sm:$0xff] }
 0x301   :  { %v3931_v51 = vpop.f32.mrf.mxu1  ;;  %v3870_v33 = vpop.f32.mrf.mxu3 }
 0x302   :  { %v8252_v55 = vadd.f32 %v3931_v51, %v3903_v58  ;;  %4075 = vmatmul.bf16.gmra.mxu2 %v8872_v18  ;;  %v3871_v5 = vadd.f32 %v3870_v33, %v3842_v17  ;;  %v8256_v40 = vadd.f32 %v8054_v42, %v4522_v46  ;;  %v8874_v58 = vmax.f32 %v8873_v49, 0.0  ;;  %v6747_v17 = vld [vmem:[#allocation8 + $0x1f4] sm:$0xf]  ;;  %v5617_v49 = vld [vmem:[#allocation8 + $0x1d8] sm:$0xf0] }
 0x303   :  { %4138 = vmatmul.bf16.gmra.mxu0 %v8864_v38  ;;  %v3905_v42 = vadd.f32 %v8231_v44, %v8214_v3  ;;  %v5644_v46 = vor.u32 %v6747_v17, %v5641_v21  ;;  %v6167_v21 = vld [vmem:[#allocation8 + $0x610] sm:$0xf]  ;;  %v6882_v38 = vld [vmem:[#allocation8 + $0x624] sm:$0xf0] }
 0x304   :  { %4162 = vmatmul.bf16.gmra.mxu1 %v8863_v9  ;;  %v4418_v20 = vmax.f32 %v3871_v5, 0.0  ;;  %v6192_v5 = vor.u32 %v6888_v47, %v6191_v8  ;;  %v6168_v8 = vor.u32 %v6882_v38, %v6167_v21 }
 0x305   :  { %v3844_v25 = vpop.f32.mrf.mxu2  ;;  %4270 = vmatpush.bf16.msra.mxu1 %v5644_v46  ;;  %v8876_v46 = vld [vmem:[#allocation29_spill] sm:$0xff] }
 0x306   :  { %v3845_v15 = vadd.f32 %v3844_v25, %v8184_v45  ;;  %v4466_v51 = vadd.f32 %v4418_v20, %v8874_v58  ;;  %4104 = vmatmul.bf16.gmra.mxu3 %v8875_v36  ;;  %v6384_v20 = vor.u32 %v6936_v16, %v6383_v31  ;;  %v6741_v25 = vld [vmem:[#allocation8 + $0x1c4] sm:$0xf]  ;;  %4184 = vmatpush.bf16.msra.mxu2 %v6192_v5  ;;  %v6735_v31 = vld [vmem:[#allocation8 + $0x194] sm:$0xf] }
 0x307   :  { %v5620_v44 = vor.u32 %v6741_v25, %v5617_v49  ;;  %v8878_v25 = vld [vmem:[#allocation39_spill] sm:$0xff] }
 0x308   :  { %v3909_v56 = vpop.f32.mrf.mxu0  ;;  %v4528_v14 = vmul.f32 %v8241_v12, %v4466_v51  ;;  %4213 = vmatpush.bf16.msra.mxu3 %v6384_v20 }
 0x309   :  { %v3933_v33 = vpop.f32.mrf.mxu1  ;;  %v3873_v6 = vpop.f32.mrf.mxu3  ;;  %4271 = vmatpush.bf16.msra.mxu1 %v5620_v44 }
 0x30a   :  { %v8266_v45 = vadd.f32 %v3933_v33, %v3905_v42  ;;  %v3874_v53 = vadd.f32 %v3873_v6, %v3845_v15  ;;  %v8269_v58 = vadd.f32 %v8067_v4, %v4528_v14  ;;  %v8877_v15 = vmax.f32 %v8876_v46, 0.0  ;;  %v5593_v6 = vld [vmem:[#allocation8 + $0x1a8] sm:$0xf0]  ;;  %4185 = vmatpush.bf16.msra.mxu2 %v6168_v8  ;;  %v8879_v46 = vld [vmem:[#allocation28_spill] sm:$0xff] }
 0x30b   :  { %v3908_v4 = vadd.f32 %v8244_v39, %v8214_v3  ;;  %v5596_v14 = vor.u32 %v6735_v31, %v5593_v6  ;;  %v3910_v31 = vadd.f32 %v3909_v56, %v8214_v3 }
 0x30c   :  { %v4424_v51 = vmax.f32 %v3874_v53, 0.0  ;;  %v6359_v53 = vld [vmem:[#allocation8 + $0x790] sm:$0xf] }
 0x30d   :  { %v3846_v17 = vpop.f32.mrf.mxu2  ;;  %4272 = vmatpush.bf16.msra.mxu1 %v5596_v14  ;;  %v6873_v14 = vld [vmem:[#allocation8 + $0x5e4] sm:$0xf] }
 0x30e   :  { %v3847_v42 = vadd.f32 %v3846_v17, %v8194_v22  ;;  %v4472_v47 = vadd.f32 %v4424_v51, %v8877_v15  ;;  %v6930_v22 = vld [vmem:[#allocation8 + $0x7a4] sm:$0xf0]  ;;  %v8880_v15 = vmax.f32 %v8879_v46, 0.0  ;;  %v8881_v46 = vld [vmem:[#allocation37_spill] sm:$0xff] }
 0x30f   :  { %v6360_v49 = vor.u32 %v6930_v22, %v6359_v53  ;;  %v6145_v22 = vld [vmem:[#allocation8 + $0x5f8] sm:$0xf0] }
 0x310   :  { %v3912_v33 = vpop.f32.mrf.mxu0  ;;  %v4534_v5 = vmul.f32 %v8241_v12, %v4472_v47 }
 0x311   :  { %v3936_v16 = vpop.f32.mrf.mxu1  ;;  %v3875_v20 = vpop.f32.mrf.mxu3  ;;  %4214 = vmatpush.bf16.msra.mxu3 %v6360_v49 }
 0x312   :  { %v8278_v38 = vadd.f32 %v3936_v16, %v3908_v4  ;;  %4080 = vmatmul.bf16.gmra.mxu2 %v8878_v25  ;;  %v3876_v44 = vadd.f32 %v3875_v20, %v3847_v42  ;;  %v8282_v51 = vadd.f32 %v8084_v37, %v4534_v5  ;;  %v6825_v37 = vld [vmem:[#allocation8 + $0x464] sm:$0xf]  ;;  %v5953_v4 = vld [vmem:[#allocation8 + $0x478] sm:$0xf0]  ;;  %v6148_v20 = vor.u32 %v6873_v14, %v6145_v22  ;;  %v6867_v22 = vld [vmem:[#allocation8 + $0x5b4] sm:$0xf] }
 0x313   :  { %4143 = vmatmul.bf16.gmra.mxu0 %v8865_v57  ;;  %v5956_v53 = vor.u32 %v6825_v37, %v5953_v4  ;;  %v3913_v37 = vadd.f32 %v3912_v33, %v8214_v3 }
 0x314   :  { %4167 = vmatmul.bf16.gmra.mxu1 %v7732_v54  ;;  %v4430_v39 = vmax.f32 %v3876_v44, 0.0 }
 0x315   :  { %v3849_v17 = vpop.f32.mrf.mxu2  ;;  %4294 = vmatpush.bf16.msrb.mxu2 %v5956_v53  ;;  %4323 = vmatpush.bf16.msrb.mxu3 %v6148_v20  ;;  %v5929_v53 = vld [vmem:[#allocation8 + $0x448] sm:$0xf0] }
 0x316   :  { %v3850_v21 = vadd.f32 %v3849_v17, %v8200_v61  ;;  %v4478_v47 = vadd.f32 %v4430_v39, %v8880_v15  ;;  %4109 = vmatmul.bf16.gmra.mxu3 %v7651_v29  ;;  %v8882_v15 = vmax.f32 %v8881_v46, 0.0  ;;  %v6121_v20 = vld [vmem:[#allocation8 + $0x5c8] sm:$0xf0] }
 0x318   :  { %v3914_v8 = vpop.f32.mrf.mxu0  ;;  %v4540_v42 = vmul.f32 %v8241_v12, %v4478_v47 }
 0x319   :  { %v3938_v6 = vpop.f32.mrf.mxu1  ;;  %v3878_v5 = vpop.f32.mrf.mxu3 }
 0x31a   :  { %v8291_v16 = vadd.f32 %v3938_v6, %v3910_v31  ;;  %v3879_v61 = vadd.f32 %v3878_v5, %v3850_v21  ;;  %v8294_v49 = vadd.f32 %v8097_v60, %v4540_v42  ;;  %v6921_v31 = vld [vmem:[#allocation8 + $0x764] sm:$0xf]  ;;  %v6337_v6 = vld [vmem:[#allocation8 + $0x778] sm:$0xf0]  ;;  %v6819_v5 = vld [vmem:[#allocation8 + $0x434] sm:$0xf] }
 0x31b   :  { %v6340_v21 = vor.u32 %v6921_v31, %v6337_v6  ;;  %v5932_v33 = vor.u32 %v6819_v5, %v5929_v53  ;;  %v6915_v31 = vld [vmem:[#allocation8 + $0x734] sm:$0xf]  ;;  %v6313_v6 = vld [vmem:[#allocation8 + $0x748] sm:$0xf0]  ;;  %v6289_v5 = vld [vmem:[#allocation8 + $0x718] sm:$0xf0] }
 0x31c   :  { %v4436_v44 = vmax.f32 %v3879_v61, 0.0 }
 0x31d   :  { %v3851_v39 = vpop.f32.mrf.mxu2  ;;  %4352 = vmatpush.bf16.msrb.mxu0 %v6340_v21  ;;  %4295 = vmatpush.bf16.msrb.mxu2 %v5932_v33  ;;  %v6316_v21 = vor.u32 %v6915_v31, %v6313_v6  ;;  %v6097_v6 = vld [vmem:[#allocation8 + $0x598] sm:$0xf0] }
 0x31e   :  { %v3852_v56 = vadd.f32 %v3851_v39, %v8210_v27  ;;  %v4484_v47 = vadd.f32 %v4436_v44, %v8882_v15  ;;  %v6969_v44 = vld [vmem:[#allocation8 + $0x8e4] sm:$0xf]  ;;  %v6124_v15 = vor.u32 %v6867_v22, %v6121_v20 }
 0x320   :  { %v8297_v17 = vpop.f32.mrf.mxu0  ;;  %v4546_v4 = vmul.f32 %v8241_v12, %v4484_v47  ;;  %4324 = vmatpush.bf16.msrb.mxu3 %v6124_v15 }
 0x321   :  { %v3941_v60 = vpop.f32.mrf.mxu1  ;;  %v3880_v42 = vpop.f32.mrf.mxu3  ;;  %4353 = vmatpush.bf16.msrb.mxu0 %v6316_v21 }
 0x322   :  { %v8304_v14 = vadd.f32 %v3941_v60, %v3913_v37  ;;  %4085 = vmatmul.bf16.gmra.mxu2 %v7704_v62  ;;  %v3881_v27 = vadd.f32 %v3880_v42, %v3852_v56  ;;  %v8308_v61 = vadd.f32 %v8116_v2, %v4546_v4  ;;  %v8883_v2 = vld [vmem:[#allocation36_spill] sm:$0xff] }
 0x323   :  { %4244 = vmatmul.bf16.vlgmr.msra.gmra.mxu0 %v8867_v10  ;;  %v6529_v10 = vld [vmem:[#allocation8 + $0x8f8] sm:$0xf0]  ;;  %v8884_v4 = vmax.f32 %v8883_v2, 0.0  ;;  %v6909_v42 = vld [vmem:[#allocation8 + $0x704] sm:$0xf] }
 0x324   :  { %4172 = vmatmul.bf16.gmra.mxu1 %v8866_v7  ;;  %v4442_v39 = vmax.f32 %v3881_v27, 0.0  ;;  %v6532_v47 = vor.u32 %v6969_v44, %v6529_v10  ;;  %v3915_v27 = vadd.f32 %v3914_v8, %v8214_v3  ;;  %v6292_v53 = vor.u32 %v6909_v42, %v6289_v5  ;;  %v6813_v10 = vld [vmem:[#allocation8 + $0x404] sm:$0xf]  ;;  %v6963_v2 = vld [vmem:[#allocation8 + $0x8b4] sm:$0xf] }
 0x325   :  { %v3854_v46 = vpop.f32.mrf.mxu2  ;;  %v6505_v3 = vld [vmem:[#allocation8 + $0x8c8] sm:$0xf0] }
 0x326   :  { %v3855_v56 = vadd.f32 %v3854_v46, %v8219_v63  ;;  %v4490_v60 = vadd.f32 %v4442_v39, %v8884_v4  ;;  %4114 = vmatmul.bf16.gmra.mxu3 %v7712_v19  ;;  %4381 = vmatpush.bf16.msrb.mxu1 %v6532_v47  ;;  %v5905_v46 = vld [vmem:[#allocation8 + $0x418] sm:$0xf0]  ;;  %v6861_v39 = vld [vmem:[#allocation8 + $0x584] sm:$0xf]  ;;  %v6508_v4 = vor.u32 %v6963_v2, %v6505_v3  ;;  %v6265_v42 = vld [vmem:[#allocation8 + $0x6e8] sm:$0xf0] }
 0x327   :  { %v5908_v47 = vor.u32 %v6813_v10, %v5905_v46  ;;  %4354 = vmatpush.bf16.msrb.mxu0 %v6292_v53  ;;  %v6100_v21 = vor.u32 %v6861_v39, %v6097_v6  ;;  %v6241_v10 = vld [vmem:[#allocation8 + $0x6b8] sm:$0xf0]  ;;  %v6807_v6 = vld [vmem:[#allocation8 + $0x3d4] sm:$0xf]  ;;  %v5881_v2 = vld [vmem:[#allocation8 + $0x3e8] sm:$0xf0] }
 0x328   :  { %v8312_v37 = vpop.f32.mrf.mxu0  ;;  %v4552_v22 = vmul.f32 %v8241_v12, %v4490_v60  ;;  %v6903_v60 = vld [vmem:[#allocation8 + $0x6d4] sm:$0xf] }
 0x329   :  { %v3943_v63 = vpop.f32.mrf.mxu1  ;;  %v3883_v20 = vpop.f32.mrf.mxu3  ;;  %4296 = vmatpush.bf16.msrb.mxu2 %v5908_v47  ;;  %4325 = vmatpush.bf16.msrb.mxu3 %v6100_v21  ;;  %v6855_v3 = vld [vmem:[#allocation8 + $0x554] sm:$0xf]  ;;  %v6957_v21 = vld [vmem:[#allocation8 + $0x884] sm:$0xf] }
 0x32a   :  { %v8319_v44 = vadd.f32 %v3943_v63, %v3915_v27  ;;  %v3884_v33 = vadd.f32 %v3883_v20, %v3855_v56  ;;  %v8322_v31 = vadd.f32 %v8130_v52, %v4552_v22  ;;  %v6268_v27 = vor.u32 %v6903_v60, %v6265_v42  ;;  %v8885_v63 = vld [vmem:[#allocation44_spill] sm:$0xff]  ;;  %4382 = vmatpush.bf16.msrb.mxu1 %v6508_v4  ;;  %v6481_v4 = vld [vmem:[#allocation8 + $0x898] sm:$0xf0] }
 0x32b   :  { %v8886_v52 = vmax.f32 %v8885_v63, 0.0  ;;  %v6897_v20 = vld [vmem:[#allocation8 + $0x6a4] sm:$0xf]  ;;  %v6891_v63 = vld [vmem:[#allocation8 + $0x674] sm:$0xf] }
 0x32c   :  { %v4448_v8 = vmax.f32 %v3884_v33, 0.0  ;;  %4355 = vmatpush.bf16.msrb.mxu0 %v6268_v27  ;;  %v6244_v53 = vor.u32 %v6897_v20, %v6241_v10  ;;  %v6484_v27 = vor.u32 %v6957_v21, %v6481_v4  ;;  %v8887_v20 = vld [vmem:[#allocation43_spill] sm:$0xff] }
 0x32d   :  { %v3856_v15 = vpop.f32.mrf.mxu2  ;;  %v8888_v10 = vmax.f32 %v8887_v20, 0.0  ;;  %v6169_v20 = vld [vmem:[#allocation8 + $0x628] sm:$0xf0] }
 0x32e   :  { %v3857_v5 = vadd.f32 %v3856_v15, %v8234_v26  ;;  %v4496_v22 = vadd.f32 %v4448_v8, %v8886_v52  ;;  %v5884_v8 = vor.u32 %v6807_v6, %v5881_v2  ;;  %v6073_v15 = vld [vmem:[#allocation8 + $0x568] sm:$0xf0]  ;;  %4383 = vmatpush.bf16.msrb.mxu1 %v6484_v27 }
 0x32f   :  { %v6076_v42 = vor.u32 %v6855_v3, %v6073_v15  ;;  %v6217_v52 = vld [vmem:[#allocation8 + $0x688] sm:$0xf0]  ;;  %v6801_v3 = vld [vmem:[#allocation8 + $0x3a4] sm:$0xf]  ;;  %v5857_v15 = vld [vmem:[#allocation8 + $0x3b8] sm:$0xf0] }
 0x330   :  { %v8325_v56 = vpop.f32.mrf.mxu0  ;;  %v4558_v33 = vmul.f32 %v8241_v12, %v4496_v22  ;;  %4356 = vmatpush.bf16.msrb.mxu0 %v6244_v53  ;;  %4297 = vmatpush.bf16.msrb.mxu2 %v5884_v8  ;;  %v6193_v53 = vld [vmem:[#allocation8 + $0x658] sm:$0xf0]  ;;  %v6849_v8 = vld [vmem:[#allocation8 + $0x524] sm:$0xf]  ;;  %v5860_v4 = vor.u32 %v6801_v3, %v5857_v15  ;;  %v6457_v27 = vld [vmem:[#allocation8 + $0x868] sm:$0xf0] }
 0x331   :  { %v4042_v46 = vpop.f32.mrf.mxu1  ;;  %v3885_v39 = vpop.f32.mrf.mxu3  ;;  %4326 = vmatpush.bf16.msrb.mxu3 %v6076_v42  ;;  %v5833_v15 = vld [vmem:[#allocation8 + $0x388] sm:$0xf0] }
 0x332   :  { %4186 = vmatmul.bf16.vlgmr.msra.gmra.mxu2 %v7779_v43  ;;  %v8333_v26 = vadd.f32 %v8153_v48, %v4558_v33  ;;  %v3886_v47 = vadd.f32 %v3885_v39, %v3857_v5  ;;  %v6220_v5 = vor.u32 %v6891_v63, %v6217_v52  ;;  %v6885_v33 = vld [vmem:[#allocation8 + $0x644] sm:$0xf] }
 0x333   :  { %4249 = vmatmul.bf16.gmra.mxu0 %v8872_v18  ;;  %v6196_v39 = vor.u32 %v6885_v33, %v6193_v53 }
 0x334   :  { %4273 = vmatmul.bf16.vlgmr.msra.gmra.mxu1 %v8868_v11  ;;  %v4454_v60 = vmax.f32 %v3886_v47, 0.0  ;;  %4357 = vmatpush.bf16.msrb.mxu0 %v6220_v5 }
 0x335   :  { %v3955_v18 = vpop.f32.mrf.mxu2  ;;  %4298 = vmatpush.bf16.msrb.mxu2 %v5860_v4 }
 0x336   :  { %v3956_v48 = vadd.f32 %v3955_v18, %v8225_v24  ;;  %v4502_v11 = vadd.f32 %v4454_v60, %v8888_v10  ;;  %4215 = vmatmul.bf16.vlgmr.msra.gmra.mxu3 %v7792_v1  ;;  %v6049_v60 = vld [vmem:[#allocation8 + $0x538] sm:$0xf0]  ;;  %v6951_v18 = vld [vmem:[#allocation8 + $0x854] sm:$0xf] }
 0x337   :  { %v6052_v52 = vor.u32 %v6849_v8, %v6049_v60  ;;  %v6460_v5 = vor.u32 %v6951_v18, %v6457_v27  ;;  %v6843_v8 = vld [vmem:[#allocation8 + $0x4f4] sm:$0xf]  ;;  %v6945_v60 = vld [vmem:[#allocation8 + $0x824] sm:$0xf]  ;;  %v6433_v18 = vld [vmem:[#allocation8 + $0x838] sm:$0xf0] }
 0x338   :  { %v8337_v22 = vpop.f32.mrf.mxu0  ;;  %v4564_v47 = vmul.f32 %v8241_v12, %v4502_v11  ;;  %4358 = vmatpush.bf16.msrb.mxu0 %v6196_v39  ;;  %v6879_v12 = vld [vmem:[#allocation8 + $0x614] sm:$0xf] }
 0x339   :  { %v4044_v6 = vpop.f32.mrf.mxu1  ;;  %v3984_v2 = vpop.f32.mrf.mxu3  ;;  %v6172_v11 = vor.u32 %v6879_v12, %v6169_v20  ;;  %4327 = vmatpush.bf16.msrb.mxu3 %v6052_v52  ;;  %4384 = vmatpush.bf16.msrb.mxu1 %v6460_v5  ;;  %v6436_v52 = vor.u32 %v6945_v60, %v6433_v18 }
 0x33a   :  { %v3985_v24 = vadd.f32 %v3984_v2, %v3956_v48  ;;  %v8344_v21 = vadd.f32 %v8168_v50, %v4564_v47 }
 0x33c   :  { %v4014_v42 = vadd.f32 %v8297_v17, %v3985_v24  ;;  %4359 = vmatpush.bf16.msrb.mxu0 %v6172_v11  ;;  %v8351_v17 = vld [vmem:[#allocation11] sm:$0x3f]  ;;  %v6409_v11 = vld [vmem:[#allocation8 + $0x808] sm:$0xf0] }
 0x33d   :  { %v3957_v63 = vpop.f32.mrf.mxu2  ;;  %v8354_v39 = vperm.slane %v8351_v17, 3  ;;  %4385 = vmatpush.bf16.msrb.mxu1 %v6436_v52 }
 0x33e   :  { %v3958_v48 = vadd.f32 %v3957_v63, %v8238_v35  ;;  %v4043_v50 = vadd.f32 %v4042_v46, %v4014_v42  ;;  %v8889_v35 = vld [vmem:[#allocation30_spill] sm:$0xff] }
 0x33f   :  { %v8890_v2 = vmax.f32 %v8889_v35, 0.0  ;;  %v6795_v46 = vld [vmem:[#allocation8 + $0x374] sm:$0xf]  ;;  %v6789_v35 = vld [vmem:[#allocation8 + $0x344] sm:$0xf] }
 0x340   :  { %v8348_v10 = vpop.f32.mrf.mxu0  ;;  %v4413_v33 = vmax.f32 %v4043_v50, 0.0  ;;  %v5836_v4 = vor.u32 %v6795_v46, %v5833_v15 }
 0x341   :  { %v4047_v53 = vpop.f32.mrf.mxu1  ;;  %v3986_v47 = vpop.f32.mrf.mxu3 }
 0x342   :  { %4191 = vmatmul.bf16.gmra.mxu2 %v7814_v34  ;;  %v4461_v24 = vadd.f32 %v4413_v33, %v8890_v2  ;;  %v3987_v3 = vadd.f32 %v3986_v47, %v3958_v48  ;;  %v5809_v2 = vld [vmem:[#allocation8 + $0x358] sm:$0xf0] }
 0x343   :  { %4254 = vmatmul.bf16.gmra.mxu0 %v8878_v25  ;;  %v6025_v25 = vld [vmem:[#allocation8 + $0x508] sm:$0xf0]  ;;  %4299 = vmatpush.bf16.msrb.mxu2 %v5836_v4  ;;  %v6001_v4 = vld [vmem:[#allocation8 + $0x4d8] sm:$0xf0] }
 0x344   :  { %4278 = vmatmul.bf16.gmra.mxu1 %v8875_v36  ;;  %v4016_v27 = vadd.f32 %v8312_v37, %v3987_v3  ;;  %v6028_v63 = vor.u32 %v6843_v8, %v6025_v25  ;;  %v4523_v5 = vmul.f32 %v8354_v39, %v4461_v24  ;;  %v6939_v36 = vld [vmem:[#allocation8 + $0x7f4] sm:$0xf]  ;;  %v8891_v3 = vld [vmem:[#allocation32_spill] sm:$0xff] }
 0x345   :  { %v3960_v42 = vpop.f32.mrf.mxu2  ;;  %v6412_v37 = vor.u32 %v6939_v36, %v6409_v11  ;;  %v8892_v46 = vmax.f32 %v8891_v3, 0.0  ;;  %v6837_v8 = vld [vmem:[#allocation8 + $0x4c4] sm:$0xf]  ;;  %v5977_v3 = vld [vmem:[#allocation8 + $0x4a8] sm:$0xf0] }
 0x346   :  { %v3961_v12 = vadd.f32 %v3960_v42, %v8252_v55  ;;  %v4045_v48 = vadd.f32 %v4044_v6, %v4016_v27  ;;  %4220 = vmatmul.bf16.gmra.mxu3 %v7827_v13  ;;  %v8367_v50 = vadd.f32 %v8256_v40, %v4523_v5  ;;  %v5812_v55 = vor.u32 %v6789_v35, %v5809_v2  ;;  %v6933_v25 = vld [vmem:[#allocation8 + $0x7c4] sm:$0xf]  ;;  %v6385_v40 = vld [vmem:[#allocation8 + $0x7d8] sm:$0xf0]  ;;  %v6783_v42 = vld [vmem:[#allocation8 + $0x314] sm:$0xf] }
 0x347   :  { %4328 = vmatpush.bf16.msrb.mxu3 %v6028_v63  ;;  %4386 = vmatpush.bf16.msrb.mxu1 %v6412_v37  ;;  %v6004_v60 = vor.u32 %v6837_v8, %v6001_v4  ;;  %v5785_v63 = vld [vmem:[#allocation8 + $0x328] sm:$0xf0]  ;;  %v6388_v52 = vor.u32 %v6933_v25, %v6385_v40  ;;  %v6927_v37 = vld [vmem:[#allocation8 + $0x794] sm:$0xf] }
 0x348   :  { %v8363_v20 = vpop.f32.mrf.mxu0  ;;  %v4419_v33 = vmax.f32 %v4045_v48, 0.0  ;;  %4300 = vmatpush.bf16.msrb.mxu2 %v5812_v55  ;;  %v6831_v55 = vld [vmem:[#allocation8 + $0x494] sm:$0xf] }
 0x349   :  { %v4049_v47 = vpop.f32.mrf.mxu1  ;;  %v3989_v24 = vpop.f32.mrf.mxu3 }
 0x34a   :  { %v4467_v15 = vadd.f32 %v4419_v33, %v8892_v46  ;;  %v3990_v6 = vadd.f32 %v3989_v24, %v3961_v12  ;;  %v5788_v12 = vor.u32 %v6783_v42, %v5785_v63  ;;  %v6361_v33 = vld [vmem:[#allocation8 + $0x7a8] sm:$0xf0]  ;;  %v5980_v46 = vor.u32 %v6831_v55, %v5977_v3 }
 0x34b   :  { %4329 = vmatpush.bf16.msrb.mxu3 %v6004_v60  ;;  %4387 = vmatpush.bf16.msrb.mxu1 %v6388_v52  ;;  %v8895_v52 = vld [vmem:[#allocation40_spill] sm:$0xff]  ;;  %v8897_v55 = vld [vmem:[#allocation45_spill] sm:$0xff] }
 0x34c   :  { %v4019_v18 = vadd.f32 %v8325_v56, %v3990_v6  ;;  %v4529_v5 = vmul.f32 %v8354_v39, %v4467_v15  ;;  %4301 = vmatpush.bf16.msrb.mxu2 %v5788_v12  ;;  %v6364_v56 = vor.u32 %v6927_v37, %v6361_v33  ;;  %v8893_v15 = vld [vmem:[#allocation38_spill] sm:$0xff]  ;;  %v8898_v3 = vmax.f32 %v8897_v55, 0.0  ;;  %v8903_v55 = vld [vmem:[#allocation49_spill] sm:$0xff] }
 0x34d   :  { %v3962_v27 = vpop.f32.mrf.mxu2 }
 0x34e   :  { %v3963_v48 = vadd.f32 %v3962_v27, %v8266_v45  ;;  %v4048_v11 = vadd.f32 %v4047_v53, %v4019_v18  ;;  %v8377_v35 = vadd.f32 %v8269_v58, %v4529_v5  ;;  %v8894_v53 = vmax.f32 %v8893_v15, 0.0 }
 0x34f   :  { %4388 = vmatpush.bf16.msrb.mxu1 %v6364_v56  ;;  %4330 = vmatpush.bf16.msrb.mxu3 %v5980_v46 }
 0x350   :  { %v8374_v36 = vpop.f32.mrf.mxu0  ;;  %v4425_v2 = vmax.f32 %v4048_v11, 0.0 }
 0x351   :  { %v4052_v24 = vpop.f32.mrf.mxu1  ;;  %v3991_v45 = vpop.f32.mrf.mxu3 }
 0x352   :  { %4196 = vmatmul.bf16.gmra.mxu2 %v7848_v41  ;;  %v4473_v6 = vadd.f32 %v4425_v2, %v8894_v53  ;;  %v3992_v8 = vadd.f32 %v3991_v45, %v3963_v48 }
 0x353   :  { %4259 = vmatmul.bf16.gmra.mxu0 %v7704_v62 }
 0x354   :  { %4283 = vmatmul.bf16.gmra.mxu1 %v7651_v29  ;;  %v4021_v58 = vadd.f32 %v8337_v22, %v3992_v8  ;;  %v4535_v62 = vmul.f32 %v8354_v39, %v4473_v6  ;;  %v8896_v29 = vmax.f32 %v8895_v52, 0.0 }
 0x355   :  { %v3965_v4 = vpop.f32.mrf.mxu2 }
 0x356   :  { %v3966_v25 = vadd.f32 %v3965_v4, %v8278_v38  ;;  %v4050_v40 = vadd.f32 %v4049_v47, %v4021_v58  ;;  %4225 = vmatmul.bf16.gmra.mxu3 %v7861_v32  ;;  %v8389_v18 = vadd.f32 %v8282_v51, %v4535_v62  ;;  %v8899_v4 = vld [vmem:[#allocation46_spill] sm:$0xff] }
 0x357   :  { %v8900_v62 = vmax.f32 %v8899_v4, 0.0 }
 0x358   :  { %v4030_v60 = vpop.f32.mrf.mxu0  ;;  %v4431_v27 = vmax.f32 %v4050_v40, 0.0 }
 0x359   :  { %v4054_v42 = vpop.f32.mrf.mxu1  ;;  %v3994_v63 = vpop.f32.mrf.mxu3 }
 0x35a   :  { %v4479_v5 = vadd.f32 %v4431_v27, %v8896_v29  ;;  %v3995_v48 = vadd.f32 %v3994_v63, %v3966_v25 }
 0x35c   :  { %v4024_v22 = vadd.f32 %v8348_v10, %v3995_v48  ;;  %v4541_v11 = vmul.f32 %v8354_v39, %v4479_v5  ;;  %v8901_v48 = vld [vmem:[#allocation48_spill] sm:$0xff] }
 0x35d   :  { %v3967_v12 = vpop.f32.mrf.mxu2 }
 0x35e   :  { %v3968_v38 = vadd.f32 %v3967_v12, %v8291_v16  ;;  %v4053_v37 = vadd.f32 %v4052_v24, %v4024_v22  ;;  %v8397_v33 = vadd.f32 %v8294_v49, %v4541_v11  ;;  %v8902_v22 = vmax.f32 %v8901_v48, 0.0 }
 0x360   :  { %v4129_v47 = vpop.f32.mrf.mxu0  ;;  %v4437_v51 = vmax.f32 %v4053_v37, 0.0 }
 0x361   :  { %v4057_v56 = vpop.f32.mrf.mxu1  ;;  %v3996_v2 = vpop.f32.mrf.mxu3 }
 0x362   :  { %4201 = vmatmul.bf16.gmra.mxu2 %v7884_v28  ;;  %v4485_v10 = vadd.f32 %v4437_v51, %v8898_v3  ;;  %v3997_v45 = vadd.f32 %v3996_v2, %v3968_v38  ;;  %v8904_v3 = vmax.f32 %v8903_v55, 0.0 }
 0x363   :  { %4360 = vmatmul.bf16.vlgmr.msrb.gmra.mxu0 %v7779_v43 }
 0x364   :  { %4288 = vmatmul.bf16.gmra.mxu1 %v7712_v19  ;;  %v4026_v16 = vadd.f32 %v8363_v20, %v3997_v45  ;;  %v4547_v24 = vmul.f32 %v8354_v39, %v4485_v10 }
 0x365   :  { %v3970_v46 = vpop.f32.mrf.mxu2 }
 0x366   :  { %v3971_v49 = vadd.f32 %v3970_v46, %v8304_v14  ;;  %v4055_v53 = vadd.f32 %v4054_v42, %v4026_v16  ;;  %4230 = vmatmul.bf16.gmra.mxu3 %v7901_v59  ;;  %v8409_v43 = vadd.f32 %v8308_v61, %v4547_v24 }
 0x368   :  { %v4131_v15 = vpop.f32.mrf.mxu0  ;;  %v4443_v6 = vmax.f32 %v4055_v53, 0.0 }
 0x369   :  { %v4059_v8 = vpop.f32.mrf.mxu1  ;;  %v3999_v58 = vpop.f32.mrf.mxu3 }
 0x36a   :  { %v4491_v19 = vadd.f32 %v4443_v6, %v8900_v62  ;;  %v4000_v25 = vadd.f32 %v3999_v58, %v3971_v49 }
 0x36c   :  { %v4029_v20 = vadd.f32 %v8374_v36, %v4000_v25  ;;  %v4553_v27 = vmul.f32 %v8354_v39, %v4491_v19 }
 0x36d   :  { %v3972_v40 = vpop.f32.mrf.mxu2 }
 0x36e   :  { %v3973_v14 = vadd.f32 %v3972_v40, %v8319_v44  ;;  %v4058_v63 = vadd.f32 %v4057_v56, %v4029_v20  ;;  %v8417_v52 = vadd.f32 %v8322_v31, %v4553_v27  ;;  %v8424_v44 = vld [vmem:[#allocation10] sm:$0x3f] }
 0x36f   :  { %v8427_v38 = vperm.slane %v8424_v44, 4 }
 0x370   :  { %v4134_v42 = vpop.f32.mrf.mxu0  ;;  %v4449_v61 = vmax.f32 %v4058_v63, 0.0  ;;  %v8905_v63 = vld [vmem:[#allocation41_spill] sm:$0xff] }
 0x371   :  { %v4158_v29 = vpop.f32.mrf.mxu1  ;;  %v4001_v5 = vpop.f32.mrf.mxu3 }
 0x372   :  { %4302 = vmatmul.bf16.vlgmr.msrb.gmra.mxu2 %v8854_v0  ;;  %v4497_v36 = vadd.f32 %v4449_v61, %v8902_v22  ;;  %v4002_v12 = vadd.f32 %v4001_v5, %v3973_v14 }
 0x373   :  { %4365 = vmatmul.bf16.gmra.mxu0 %v7814_v34 }
 0x374   :  { %4389 = vmatmul.bf16.vlgmr.msrb.gmra.mxu1 %v7792_v1  ;;  %v4031_v11 = vadd.f32 %v4030_v60, %v4002_v12  ;;  %v4559_v37 = vmul.f32 %v8354_v39, %v4497_v36 }
 0x375   :  { %v4071_v31 = vpop.f32.mrf.mxu2 }
 0x376   :  { %v4060_v51 = vadd.f32 %v4059_v8, %v4031_v11  ;;  %4331 = vmatmul.bf16.vlgmr.msrb.gmra.mxu3 %v8857_v30  ;;  %v8432_v0 = vadd.f32 %v8333_v26, %v4559_v37  ;;  %v4072_v2 = vadd.f32 %v4071_v31, %v8427_v38 }
 0x378   :  { %v4136_v34 = vpop.f32.mrf.mxu0  ;;  %v4455_v56 = vmax.f32 %v4060_v51, 0.0 }
 0x379   :  { %v4160_v1 = vpop.f32.mrf.mxu1  ;;  %v4100_v60 = vpop.f32.mrf.mxu3 }
 0x37a   :  { %v4503_v10 = vadd.f32 %v4455_v56, %v8904_v3  ;;  %v4101_v45 = vadd.f32 %v4100_v60, %v4072_v2 }
 0x37c   :  { %v4130_v16 = vadd.f32 %v4129_v47, %v4101_v45  ;;  %v4565_v24 = vmul.f32 %v8354_v39, %v4503_v10 }
 0x37d   :  { %v4073_v46 = vpop.f32.mrf.mxu2 }
 0x37e   :  { %v8438_v53 = vadd.f32 %v4158_v29, %v4130_v16  ;;  %v8441_v30 = vadd.f32 %v8344_v21, %v4565_v24  ;;  %v4074_v26 = vadd.f32 %v4073_v46, %v8427_v38 }
 0x380   :  { %v4139_v49 = vpop.f32.mrf.mxu0 }
 0x381   :  { %v4163_v6 = vpop.f32.mrf.mxu1  ;;  %v4102_v8 = vpop.f32.mrf.mxu3 }
 0x382   :  { %4307 = vmatmul.bf16.gmra.mxu2 %v8862_v23  ;;  %v4103_v58 = vadd.f32 %v4102_v8, %v4074_v26 }
 0x383   :  { %4370 = vmatmul.bf16.gmra.mxu0 %v7848_v41 }
 0x384   :  { %4394 = vmatmul.bf16.gmra.mxu1 %v7827_v13  ;;  %v4132_v47 = vadd.f32 %v4131_v15, %v4103_v58 }
 0x385   :  { %v4076_v4 = vpop.f32.mrf.mxu2 }
 0x386   :  { %4336 = vmatmul.bf16.gmra.mxu3 %v8863_v9  ;;  %v8448_v62 = vadd.f32 %v4160_v1, %v4132_v47  ;;  %v4077_v21 = vadd.f32 %v4076_v4, %v8427_v38 }
 0x388   :  { %v4141_v39 = vpop.f32.mrf.mxu0 }
 0x389   :  { %v4165_v19 = vpop.f32.mrf.mxu1  ;;  %v4105_v25 = vpop.f32.mrf.mxu3 }
 0x38a   :  { %v4106_v20 = vadd.f32 %v4105_v25, %v4077_v21 }
 0x38c   :  { %v4135_v41 = vadd.f32 %v4134_v42, %v4106_v20  ;;  %v8487_v20 = vperm.slane %v8351_v17, 4 }
 0x38d   :  { %v4078_v40 = vpop.f32.mrf.mxu2 }
 0x38e   :  { %v8451_v14 = vadd.f32 %v4163_v6, %v4135_v41  ;;  %v4079_v23 = vadd.f32 %v4078_v40, %v8427_v38  ;;  %v8906_v40 = vld [vmem:[#allocation51_spill] sm:$0xff] }
 0x390   :  { %v4144_v27 = vpop.f32.mrf.mxu0 }
 0x391   :  { %v4168_v13 = vpop.f32.mrf.mxu1  ;;  %v4107_v15 = vpop.f32.mrf.mxu3 }
 0x392   :  { %4312 = vmatmul.bf16.gmra.mxu2 %v8905_v63  ;;  %v4108_v9 = vadd.f32 %v4107_v15, %v4079_v23 }
 0x393   :  { %4375 = vmatmul.bf16.gmra.mxu0 %v7884_v28 }
 0x394   :  { %4399 = vmatmul.bf16.gmra.mxu1 %v7861_v32  ;;  %v4137_v61 = vadd.f32 %v4136_v34, %v4108_v9 }
 0x395   :  { %v4081_v29 = vpop.f32.mrf.mxu2 }
 0x396   :  { %4341 = vmatmul.bf16.gmra.mxu3 %v7732_v54  ;;  %v4166_v42 = vadd.f32 %v4165_v19, %v4137_v61  ;;  %v4082_v48 = vadd.f32 %v4081_v29, %v8427_v38 }
 0x398   :  { %v4146_v5 = vpop.f32.mrf.mxu0 }
 0x399   :  { %v4170_v22 = vpop.f32.mrf.mxu1  ;;  %v4110_v36 = vpop.f32.mrf.mxu3 }
 0x39a   :  { %v4111_v12 = vadd.f32 %v4110_v36, %v4082_v48 }
 0x39c   :  { %v4140_v11 = vadd.f32 %v4139_v49, %v4111_v12 }
 0x39d   :  { %v4083_v28 = vpop.f32.mrf.mxu2 }
 0x39e   :  { %v8461_v37 = vadd.f32 %v4168_v13, %v4140_v11  ;;  %v4084_v51 = vadd.f32 %v4083_v28, %v8427_v38 }
 0x3a0   :  { %v8459_v31 = vpop.f32.mrf.mxu0 }
 0x3a1   :  { %v4173_v32 = vpop.f32.mrf.mxu1  ;;  %v4112_v34 = vpop.f32.mrf.mxu3 }
 0x3a2   :  { %4317 = vmatmul.bf16.gmra.mxu2 %v8865_v57  ;;  %v4113_v56 = vadd.f32 %v4112_v34, %v4084_v51 }
 0x3a4   :  { %4404 = vmatmul.bf16.gmra.mxu1 %v7901_v59  ;;  %v4142_v54 = vadd.f32 %v4141_v39, %v4113_v56 }
 0x3a5   :  { %v4086_v2 = vpop.f32.mrf.mxu2 }
 0x3a6   :  { %4346 = vmatmul.bf16.gmra.mxu3 %v8866_v7  ;;  %v8467_v1 = vadd.f32 %v4170_v22, %v4142_v54  ;;  %v4087_v55 = vadd.f32 %v4086_v2, %v8427_v38  ;;  %v8908_v22 = vld [vmem:[#allocation52_spill] sm:$0xff]  ;;  %v8910_v54 = vld [vmem:[#allocation55_spill] sm:$0xff] }
 0x3a7   :  { %v8911_v2 = vmax.f32 %v8910_v54, 0.0 }
 0x3a8   :  { %v8469_v60 = vpop.f32.mrf.mxu0 }
 0x3a9   :  { %v4175_v3 = vpop.f32.mrf.mxu1  ;;  %v4115_v10 = vpop.f32.mrf.mxu3 }
 0x3aa   :  { %v4116_v45 = vadd.f32 %v4115_v10, %v4087_v55 }
 0x3ac   :  { %v4145_v16 = vadd.f32 %v4144_v27, %v4116_v45  ;;  %v8907_v27 = vmax.f32 %v8906_v40, 0.0 }
 0x3ad   :  { %v4088_v46 = vpop.f32.mrf.mxu2 }
 0x3ae   :  { %v8472_v24 = vadd.f32 %v4173_v32, %v4145_v16  ;;  %v4089_v57 = vadd.f32 %v4088_v46, %v8427_v38 }
 0x3b0   :  { %v8477_v49 = vpop.f32.mrf.mxu0 }
 0x3b1   :  { %v8475_v59 = vpop.f32.mrf.mxu1  ;;  %v4117_v7 = vpop.f32.mrf.mxu3 }
 0x3b2   :  { %v4118_v26 = vadd.f32 %v4117_v7, %v4089_v57 }
 0x3b4   :  { %v4147_v6 = vadd.f32 %v4146_v5, %v4118_v26  ;;  %v8912_v26 = vld [vmem:[#allocation56_spill] sm:$0xff] }
 0x3b5   :  { %v4187_v8 = vpop.f32.mrf.mxu2 }
 0x3b6   :  { %v4188_v58 = vadd.f32 %v4187_v8, %v8438_v53  ;;  %v8480_v47 = vadd.f32 %v4175_v3, %v4147_v6 }
 0x3b8   :  { %v8484_v19 = vpop.f32.mrf.mxu0 }
 0x3b9   :  { %v8482_v4 = vpop.f32.mrf.mxu1  ;;  %v4216_v39 = vpop.f32.mrf.mxu3 }
 0x3ba   :  { %v4217_v21 = vadd.f32 %v4216_v39, %v4188_v58 }
 0x3bc   :  { %v4414_v25 = vmax.f32 %v4217_v21, 0.0 }
 0x3bd   :  { %v4189_v38 = vpop.f32.mrf.mxu2 }
 0x3be   :  { %v4190_v41 = vadd.f32 %v4189_v38, %v8448_v62  ;;  %v4462_v23 = vadd.f32 %v4414_v25, %v8907_v27  ;;  %v8909_v62 = vmax.f32 %v8908_v22, 0.0  ;;  %v8914_v27 = vld [vmem:[#allocation59_spill] sm:$0xff] }
 0x3c0   :  { %v4524_v53 = vmul.f32 %v8487_v20, %v4462_v23  ;;  %v8498_v5 = vpop.f32.mrf.mxu0 }
 0x3c1   :  { %v8492_v13 = vpop.f32.mrf.mxu1  ;;  %v4218_v15 = vpop.f32.mrf.mxu3 }
 0x3c2   :  { %v4219_v63 = vadd.f32 %v4218_v15, %v4190_v41  ;;  %v8496_v9 = vadd.f32 %v8367_v50, %v4524_v53 }
 0x3c4   :  { %v4420_v61 = vmax.f32 %v4219_v63, 0.0 }
 0x3c5   :  { %v4192_v29 = vpop.f32.mrf.mxu2 }
 0x3c6   :  { %v4193_v48 = vadd.f32 %v4192_v29, %v8451_v14  ;;  %v4468_v36 = vadd.f32 %v4420_v61, %v8909_v62 }
 0x3c8   :  { %v4530_v12 = vmul.f32 %v8487_v20, %v4468_v36  ;;  %v8511_v3 = vpop.f32.mrf.mxu0  ;;  %v8916_v36 = vld [vmem:[#allocation60_spill] sm:$0xff] }
 0x3c9   :  { %v8504_v11 = vpop.f32.mrf.mxu1  ;;  %v4221_v28 = vpop.f32.mrf.mxu3 }
 0x3ca   :  { %v4222_v51 = vadd.f32 %v4221_v28, %v4193_v48  ;;  %v8507_v32 = vadd.f32 %v8377_v35, %v4530_v12 }
 0x3cc   :  { %v4426_v50 = vmax.f32 %v4222_v51, 0.0 }
 0x3cd   :  { %v4194_v34 = vpop.f32.mrf.mxu2 }
 0x3ce   :  { %v4195_v56 = vadd.f32 %v4194_v34, %v4166_v42  ;;  %v4474_v55 = vadd.f32 %v4426_v50, %v8911_v2  ;;  %v8913_v42 = vmax.f32 %v8912_v26, 0.0 }
 0x3d0   :  { %v4536_v10 = vmul.f32 %v8487_v20, %v4474_v55  ;;  %v8525_v39 = vpop.f32.mrf.mxu0 }
 0x3d1   :  { %v8513_v14 = vpop.f32.mrf.mxu1  ;;  %v4223_v45 = vpop.f32.mrf.mxu3 }
 0x3d2   :  { %v4224_v16 = vadd.f32 %v4223_v45, %v4195_v56  ;;  %v8517_v46 = vadd.f32 %v8389_v18, %v4536_v10  ;;  %v8918_v10 = vld [vmem:[#allocation63_spill] sm:$0xff] }
 0x3d3   :  { %v8919_v45 = vmax.f32 %v8918_v10, 0.0 }
 0x3d4   :  { %v4432_v57 = vmax.f32 %v4224_v16, 0.0  ;;  %v8554_v16 = vperm.slane %v8424_v44, 5 }
 0x3d5   :  { %v4197_v35 = vpop.f32.mrf.mxu2 }
 0x3d6   :  { %v4198_v7 = vadd.f32 %v4197_v35, %v8461_v37  ;;  %v4480_v6 = vadd.f32 %v4432_v57, %v8913_v42  ;;  %v8915_v37 = vmax.f32 %v8914_v27, 0.0 }
 0x3d8   :  { %v4542_v8 = vmul.f32 %v8487_v20, %v4480_v6  ;;  %v8539_v48 = vpop.f32.mrf.mxu0 }
 0x3d9   :  { %v8523_v58 = vpop.f32.mrf.mxu1  ;;  %v4226_v21 = vpop.f32.mrf.mxu3 }
 0x3da   :  { %v4227_v25 = vadd.f32 %v4226_v21, %v4198_v7  ;;  %v8528_v38 = vadd.f32 %v8397_v33, %v4542_v8  ;;  %v8920_v21 = vld [vmem:[#allocation64_spill] sm:$0xff] }
 0x3dc   :  { %v4438_v18 = vmax.f32 %v4227_v25, 0.0  ;;  %v8921_v25 = vmax.f32 %v8920_v21, 0.0 }
 0x3dd   :  { %v4199_v41 = vpop.f32.mrf.mxu2 }
 0x3de   :  { %v4200_v40 = vadd.f32 %v4199_v41, %v8467_v1  ;;  %v4486_v23 = vadd.f32 %v4438_v18, %v8915_v37  ;;  %v8917_v1 = vmax.f32 %v8916_v36, 0.0 }
 0x3e0   :  { %v4548_v15 = vmul.f32 %v8487_v20, %v4486_v23  ;;  %v4361_v2 = vpop.f32.mrf.mxu0 }
 0x3e1   :  { %v8533_v53 = vpop.f32.mrf.mxu1  ;;  %v4228_v63 = vpop.f32.mrf.mxu3 }
 0x3e2   :  { %v4229_v61 = vadd.f32 %v4228_v63, %v4200_v40  ;;  %v8537_v29 = vadd.f32 %v8409_v43, %v4548_v15 }
 0x3e4   :  { %v4444_v33 = vmax.f32 %v4229_v61, 0.0 }
 0x3e5   :  { %v4202_v22 = vpop.f32.mrf.mxu2 }
 0x3e6   :  { %v4203_v62 = vadd.f32 %v4202_v22, %v8472_v24  ;;  %v4492_v12 = vadd.f32 %v4444_v33, %v8917_v1 }
 0x3e8   :  { %v4554_v28 = vmul.f32 %v8487_v20, %v4492_v12  ;;  %v4363_v44 = vpop.f32.mrf.mxu0  ;;  %v8922_v12 = vld [vmem:[#allocation53_spill] sm:$0xff] }
 0x3e9   :  { %v8545_v51 = vpop.f32.mrf.mxu1  ;;  %v4231_v50 = vpop.f32.mrf.mxu3 }
 0x3ea   :  { %v4232_v34 = vadd.f32 %v4231_v50, %v4203_v62  ;;  %v8548_v56 = vadd.f32 %v8417_v52, %v4554_v28  ;;  %v4246_v52 = vadd.f32 %v8459_v31, %v8554_v16  ;;  %v4248_v31 = vadd.f32 %v8469_v60, %v8554_v16 }
 0x3eb   :  { %v8573_v62 = vperm.slane %v8351_v17, 5  ;;  %v8923_v28 = vmax.f32 %v8922_v12, 0.0  ;;  %v4251_v60 = vadd.f32 %v8477_v49, %v8554_v16  ;;  %v4253_v49 = vadd.f32 %v8484_v19, %v8554_v16 }
 0x3ec   :  { %v4450_v43 = vmax.f32 %v4232_v34, 0.0  ;;  %v4256_v19 = vadd.f32 %v8498_v5, %v8554_v16  ;;  %v4258_v5 = vadd.f32 %v8511_v3, %v8554_v16  ;;  %v4261_v3 = vadd.f32 %v8525_v39, %v8554_v16 }
 0x3ed   :  { %v4204_v54 = vpop.f32.mrf.mxu2  ;;  %v4263_v39 = vadd.f32 %v8539_v48, %v8554_v16 }
 0x3ee   :  { %v4205_v55 = vadd.f32 %v4204_v54, %v8480_v47  ;;  %v4498_v24 = vadd.f32 %v4450_v43, %v8919_v45  ;;  %v4275_v47 = vadd.f32 %v8475_v59, %v4246_v52  ;;  %v4277_v59 = vadd.f32 %v8482_v4, %v4248_v31 }
 0x3ef   :  { %v4280_v54 = vadd.f32 %v8492_v13, %v4251_v60 }
 0x3f0   :  { %v4560_v57 = vmul.f32 %v8487_v20, %v4498_v24 }
 0x3f1   :  { %v4390_v35 = vpop.f32.mrf.mxu1  ;;  %v4233_v7 = vpop.f32.mrf.mxu3 }
 0x3f2   :  { %v4234_v26 = vadd.f32 %v4233_v7, %v4205_v55  ;;  %v8558_v42 = vadd.f32 %v8432_v0, %v4560_v57  ;;  %v8924_v57 = vld [vmem:[#allocation54_spill] sm:$0xff] }
 0x3f4   :  { %v4456_v6 = vmax.f32 %v4234_v26, 0.0 }
 0x3f5   :  { %v4303_v8 = vpop.f32.mrf.mxu2 }
 0x3f6   :  { %v4504_v18 = vadd.f32 %v4456_v6, %v8921_v25  ;;  %v4304_v40 = vadd.f32 %v4303_v8, %v4275_v47  ;;  %v4282_v47 = vadd.f32 %v8504_v11, %v4253_v49  ;;  %v4285_v11 = vadd.f32 %v8513_v14, %v4256_v19 }
 0x3f7   :  { %v4287_v14 = vadd.f32 %v8523_v58, %v4258_v5 }
 0x3f8   :  { %v4566_v41 = vmul.f32 %v8487_v20, %v4504_v18  ;;  %v4366_v20 = vpop.f32.mrf.mxu0 }
 0x3f9   :  { %v4332_v27 = vpop.f32.mrf.mxu3  ;;  %v4392_v37 = vpop.f32.mrf.mxu1 }
 0x3fa   :  { %v4333_v23 = vadd.f32 %v4332_v27, %v4304_v40  ;;  %v8567_v0 = vadd.f32 %v8441_v30, %v4566_v41  ;;  %v8926_v40 = vld [vmem:[#allocation57_spill] sm:$0xff] }
 0x3fb   :  { %v8927_v27 = vmax.f32 %v8926_v40, 0.0 }
 0x3fc   :  { %v4362_v15 = vadd.f32 %v4361_v2, %v4333_v23 }
 0x3fd   :  { %v4305_v63 = vpop.f32.mrf.mxu2 }
 0x3fe   :  { %v4391_v61 = vadd.f32 %v4390_v35, %v4362_v15  ;;  %v4306_v22 = vadd.f32 %v4305_v63, %v4277_v59  ;;  %v8925_v35 = vmax.f32 %v8924_v57, 0.0 }
 0x400   :  { %v4415_v33 = vmax.f32 %v4391_v61, 0.0  ;;  %v4368_v26 = vpop.f32.mrf.mxu0 }
 0x401   :  { %v4334_v36 = vpop.f32.mrf.mxu3  ;;  %v4395_v50 = vpop.f32.mrf.mxu1 }
 0x402   :  { %v4335_v1 = vadd.f32 %v4334_v36, %v4306_v22  ;;  %v4463_v30 = vadd.f32 %v4415_v33, %v8923_v28 }
 0x404   :  { %v4364_v34 = vadd.f32 %v4363_v44, %v4335_v1  ;;  %v4525_v4 = vmul.f32 %v8573_v62, %v4463_v30  ;;  %v8928_v1 = vld [vmem:[#allocation58_spill] sm:$0xff] }
 0x405   :  { %v4308_v43 = vpop.f32.mrf.mxu2  ;;  %v8929_v12 = vmax.f32 %v8928_v1, 0.0  ;;  %v8625_v1 = vld [vmem:[#allocation2] ss:$0 sm:$0xff] }
 0x406   :  { %v4393_v2 = vadd.f32 %v4392_v37, %v4364_v34  ;;  %v4572_v17 = vadd.f32 %v8496_v9, %v4525_v4  ;;  %v4309_v10 = vadd.f32 %v4308_v43, %v4280_v54 }
 0x408   :  { %v4421_v55 = vmax.f32 %v4393_v2, 0.0  ;;  %4573 = vadd.xlane.f32.xlu0 %v4572_v17  ;;  %v4371_v63 = vpop.f32.mrf.mxu0 }
 0x409   :  { %v4337_v45 = vpop.f32.mrf.mxu3  ;;  %v4397_v13 = vpop.f32.mrf.mxu1 }
 0x40a   :  { %v4338_v24 = vadd.f32 %v4337_v45, %v4309_v10  ;;  %v4469_v7 = vadd.f32 %v4421_v55, %v8925_v35  ;;  %v8930_v10 = vld [vmem:[#allocation61_spill] sm:$0xff] }
 0x40b   :  { %v8931_v45 = vmax.f32 %v8930_v10, 0.0 }
 0x40c   :  { %v4367_v52 = vadd.f32 %v4366_v20, %v4338_v24  ;;  %v4531_v8 = vmul.f32 %v8573_v62, %v4469_v7  ;;  %v4290_v7 = vadd.f32 %v8533_v53, %v4261_v3 }
 0x40d   :  { %v4310_v6 = vpop.f32.mrf.mxu2 }
 0x40e   :  { %v4396_v9 = vadd.f32 %v4395_v50, %v4367_v52  ;;  %v4579_v21 = vadd.f32 %v8507_v32, %v4531_v8  ;;  %v4311_v18 = vadd.f32 %v4310_v6, %v4282_v47  ;;  %v8932_v47 = vld [vmem:[#allocation62_spill] sm:$0xff] }
 0x410   :  { %v4427_v25 = vmax.f32 %v4396_v9, 0.0  ;;  %4580 = vadd.xlane.f32.xlu0 %v4579_v21  ;;  %v4373_v43 = vpop.f32.mrf.mxu0  ;;  %v8933_v9 = vmax.f32 %v8932_v47, 0.0 }
 0x411   :  { %v4339_v44 = vpop.f32.mrf.mxu3  ;;  %v4400_v61 = vpop.f32.mrf.mxu1 }
 0x412   :  { %v4340_v41 = vadd.f32 %v4339_v44, %v4311_v18  ;;  %v4475_v37 = vadd.f32 %v4427_v25, %v8927_v27 }
 0x414   :  { %v4369_v23 = vadd.f32 %v4368_v26, %v4340_v41  ;;  %v4537_v15 = vmul.f32 %v8573_v62, %v4475_v37  ;;  %v4292_v41 = vadd.f32 %v8545_v51, %v4263_v39 }
 0x415   :  { %v4313_v31 = vpop.f32.mrf.mxu2 }
 0x416   :  { %v4398_v59 = vadd.f32 %v4397_v13, %v4369_v23  ;;  %v4586_v32 = vadd.f32 %v8517_v46, %v4537_v15  ;;  %v4314_v22 = vadd.f32 %v4313_v31, %v4285_v11  ;;  %v8934_v31 = vld [vmem:[#allocation65_spill] sm:$0xff] }
 0x417   :  { %v8935_v15 = vmax.f32 %v8934_v31, 0.0 }
 0x418   :  { %v4433_v33 = vmax.f32 %v4398_v59, 0.0  ;;  %4587 = vadd.xlane.f32.xlu1 %v4586_v32  ;;  %v4376_v6 = vpop.f32.mrf.mxu0 }
 0x419   :  { %v4342_v20 = vpop.f32.mrf.mxu3  ;;  %v4402_v2 = vpop.f32.mrf.mxu1 }
 0x41a   :  { %v4343_v36 = vadd.f32 %v4342_v20, %v4314_v22  ;;  %v4481_v28 = vadd.f32 %v4433_v33, %v8929_v12  ;;  %v8936_v33 = vld [vmem:[#allocation66_spill] sm:$0xff] }
 0x41c   :  { %v4372_v30 = vadd.f32 %v4371_v63, %v4343_v36  ;;  %v4543_v60 = vmul.f32 %v8573_v62, %v4481_v28 }
 0x41d   :  { %v4315_v50 = vpop.f32.mrf.mxu2 }
 0x41e   :  { %v4401_v34 = vadd.f32 %v4400_v61, %v4372_v30  ;;  %v4593_v46 = vadd.f32 %v8528_v38, %v4543_v60  ;;  %v4316_v54 = vadd.f32 %v4315_v50, %v4287_v14 }
 0x420   :  { %v4439_v4 = vmax.f32 %v4401_v34, 0.0  ;;  %4594 = vadd.xlane.f32.xlu1 %v4593_v46  ;;  %v4378_v11 = vpop.f32.mrf.mxu0 }
 0x421   :  { %v4344_v17 = vpop.f32.mrf.mxu3  ;;  %v4405_v25 = vpop.f32.mrf.mxu1 }
 0x422   :  { %v4345_v55 = vadd.f32 %v4344_v17, %v4316_v54  ;;  %v4487_v24 = vadd.f32 %v4439_v4, %v8931_v45 }
 0x424   :  { %v4374_v57 = vadd.f32 %v4373_v43, %v4345_v55  ;;  %v4549_v58 = vmul.f32 %v8573_v62, %v4487_v24 }
 0x425   :  { %v4318_v35 = vpop.f32.mrf.mxu2 }
 0x426   :  { %v4403_v38 = vadd.f32 %v4402_v2, %v4374_v57  ;;  %v4600_v26 = vadd.f32 %v8537_v29, %v4549_v58  ;;  %v4319_v52 = vadd.f32 %v4318_v35, %v4290_v7 }
 0x428   :  { %v4445_v49 = vmax.f32 %v4403_v38, 0.0  ;;  %4601 = vadd.xlane.f32.xlu2 %v4600_v26 }
 0x429   :  { %v4347_v8 = vpop.f32.mrf.mxu3  ;;  %v4407_v16 = vpop.f32.mrf.mxu1 }
 0x42a   :  { %v4348_v13 = vadd.f32 %v4347_v8, %v4319_v52  ;;  %v4493_v21 = vadd.f32 %v4445_v49, %v8933_v9 }
 0x42c   :  { %v4377_v18 = vadd.f32 %v4376_v6, %v4348_v13  ;;  %v4555_v44 = vmul.f32 %v8573_v62, %v4493_v21 }
 0x42d   :  { %v4320_v53 = vpop.f32.mrf.mxu2 }
 0x42e   :  { %v4406_v29 = vadd.f32 %v4405_v25, %v4377_v18  ;;  %v4607_v40 = vadd.f32 %v8548_v56, %v4555_v44  ;;  %v4321_v37 = vadd.f32 %v4320_v53, %v4292_v41  ;;  %v8937_v56 = vmax.f32 %v8936_v33, 0.0 }
 0x430   :  { %v4451_v27 = vmax.f32 %v4406_v29, 0.0  ;;  %4608 = vadd.xlane.f32.xlu2 %v4607_v40 }
 0x431   :  { %v4349_v19 = vpop.f32.mrf.mxu3 }
 0x432   :  { %v4350_v23 = vadd.f32 %v4349_v19, %v4321_v37  ;;  %v4499_v63 = vadd.f32 %v4451_v27, %v8935_v15 }
 0x434   :  { %v4379_v59 = vadd.f32 %v4378_v11, %v4350_v23  ;;  %v4561_v48 = vmul.f32 %v8573_v62, %v4499_v63 }
 0x436   :  { %v4408_v32 = vadd.f32 %v4407_v16, %v4379_v59  ;;  %v4614_v61 = vadd.f32 %v8558_v42, %v4561_v48 }
 0x438   :  { %v4457_v51 = vmax.f32 %v4408_v32, 0.0  ;;  %4615 = vadd.xlane.f32.xlu0 %v4614_v61 }
 0x43a   :  { %v4505_v22 = vadd.f32 %v4457_v51, %v8937_v56 }
 0x43c   :  { %v4567_v20 = vmul.f32 %v8573_v62, %v4505_v22 }
 0x43e   :  { %v4621_v36 = vadd.f32 %v8567_v0, %v4567_v20 }
 0x440   :  { %4622 = vadd.xlane.f32.xlu1 %v4621_v36 }
 0x47b   :  { %v4574_v12 = vpop.xlane.xlu0 %4573 }
 0x47c   :  { %v4628_v28 = vadd.f32 %v8625_v1, %v4574_v12 }
 0x47e   :  { %v6533_v5 = vmul.f32 -1.442695, %v4628_v28 }
 0x480   :  { %6998 = vpow2.f32 %v6533_v5 }
 0x483   :  { %v4581_v30 = vpop.xlane.xlu0 %4580 }
 0x484   :  { %v4629_v42 = vadd.f32 %v8625_v1, %v4581_v30 }
 0x486   :  { %v6999_v50 = vpop.eup %6998  ;;  %v6534_v60 = vmul.f32 -1.442695, %v4629_v42 }
 0x487   :  { %v4660_v14 = vadd.f32 1.0, %v6999_v50 }
 0x488   :  { %7000 = vpow2.f32 %v6534_v60 }
 0x489   :  { %7002 = vrcp.f32 %v4660_v14  ;;  %v4679_v17 = vand.u32 2147483648, %v4660_v14  ;;  %v4677_v45 = vand.u32 2147483647, %v4660_v14  ;;  %vm4673_vm1 = vweird.f32 %v4660_v14 }
 0x48b   :  { %v4588_v34 = vpop.xlane.xlu1 %4587  ;;  %v4680_v7 = vor.u32 1.1754944e-38, %v4679_v17  ;;  %vm4678_vm4 = vcmp.eq.f32.partialorder %v4677_v45, 8.507059e+37 }
 0x48c   :  { %v4630_v62 = vadd.f32 %v8625_v1, %v4588_v34 }
 0x48e   :  { %v7001_v0 = vpop.eup %7000  ;;  %v6535_v46 = vmul.f32 -1.442695, %v4630_v62 }
 0x48f   :  { %v7003_v43 = vpop.eup %7002  ;;  %v4661_v4 = vadd.f32 1.0, %v7001_v0 }
 0x490   :  { %v4669_v54 = vmul.f32 %v7003_v43, %v4660_v14  ;;  %7004 = vpow2.f32 %v6535_v46  ;;  %vm4674_vm0 = vweird.f32 %v7003_v43 }
 0x491   :  { %7006 = vrcp.f32 %v4661_v4  ;;  %vm4675_vm3 = vmor %vm4673_vm1, %vm4674_vm0  ;;  %v4694_v8 = vand.u32 2147483648, %v4661_v4  ;;  %v4692_v9 = vand.u32 2147483647, %v4661_v4  ;;  %vm4688_vm6 = vweird.f32 %v4661_v4 }
 0x492   :  { %v4670_v2 = vsub.f32 1.0, %v4669_v54 }
 0x493   :  { %v4595_v55 = vpop.xlane.xlu1 %4594  ;;  %v4695_v53 = vor.u32 1.1754944e-38, %v4694_v8  ;;  %vm4693_vm8 = vcmp.eq.f32.partialorder %v4692_v9, 8.507059e+37 }
 0x494   :  { %v4671_v10 = vmul.f32 %v7003_v43, %v4670_v2  ;;  %v4631_v24 = vadd.f32 %v8625_v1, %v4595_v55 }
 0x496   :  { %v7005_v3 = vpop.eup %7004  ;;  %v4672_v57 = vadd.f32 %v7003_v43, %v4671_v10  ;;  %v6536_v35 = vmul.f32 -1.442695, %v4631_v24 }
 0x497   :  { %v7007_v58 = vpop.eup %7006  ;;  %v4662_v38 = vadd.f32 1.0, %v7005_v3 }
 0x498   :  { %v4676_v26 = vsel %vm4675_vm3, %v7003_v43, %v4672_v57  ;;  %v4684_v49 = vmul.f32 %v7007_v58, %v4661_v4  ;;  %7008 = vpow2.f32 %v6536_v35  ;;  %vm4689_vm5 = vweird.f32 %v7007_v58 }
 0x499   :  { %v4681_v52 = vsel %vm4678_vm4, %v4680_v7, %v4676_v26  ;;  %7010 = vrcp.f32 %v4662_v38  ;;  %vm4690_vm7 = vmor %vm4688_vm6, %vm4689_vm5  ;;  %v4709_v19 = vand.u32 2147483648, %v4662_v38  ;;  %v4707_v15 = vand.u32 2147483647, %v4662_v38 }
 0x49a   :  { %4789 = vst.msk [vmem:[%s8674_s7] sm:$0xff] %vm4788_vm2, %v4681_v52  ;;  %v4685_v6 = vsub.f32 1.0, %v4684_v49  ;;  %vm4703_vm10 = vweird.f32 %v4662_v38 }
 0x49b   :  { %v4602_v13 = vpop.xlane.xlu2 %4601  ;;  %v4710_v32 = vor.u32 1.1754944e-38, %v4709_v19  ;;  %vm4708_vm12 = vcmp.eq.f32.partialorder %v4707_v15, 8.507059e+37 }
 0x49c   :  { %v4686_v47 = vmul.f32 %v7007_v58, %v4685_v6  ;;  %v4632_v21 = vadd.f32 %v8625_v1, %v4602_v13 }
 0x49e   :  { %v7009_v25 = vpop.eup %7008  ;;  %v4687_v39 = vadd.f32 %v7007_v58, %v4686_v47  ;;  %v6537_v18 = vmul.f32 -1.442695, %v4632_v21 }
 0x49f   :  { %v7011_v44 = vpop.eup %7010  ;;  %v4663_v41 = vadd.f32 1.0, %v7009_v25 }
 0x4a0   :  { %v4691_v29 = vsel %vm4690_vm7, %v7007_v58, %v4687_v39  ;;  %v4699_v40 = vmul.f32 %v7011_v44, %v4662_v38  ;;  %7012 = vpow2.f32 %v6537_v18  ;;  %vm4704_vm9 = vweird.f32 %v7011_v44 }
 0x4a1   :  { %v4696_v27 = vsel %vm4693_vm8, %v4695_v53, %v4691_v29  ;;  %7014 = vrcp.f32 %v4663_v41  ;;  %vm4705_vm11 = vmor %vm4703_vm10, %vm4704_vm9  ;;  %v4724_v20 = vand.u32 2147483648, %v4663_v41  ;;  %v4722_v28 = vand.u32 2147483647, %v4663_v41 }
 0x4a2   :  { %4790 = vst.msk [vmem:[%s8674_s7 + $0x8] sm:$0xff] %vm4788_vm2, %v4696_v27  ;;  %v4700_v37 = vsub.f32 1.0, %v4699_v40  ;;  %vm4718_vm14 = vweird.f32 %v4663_v41 }
 0x4a3   :  { %v4609_v23 = vpop.xlane.xlu2 %4608  ;;  %v4725_v14 = vor.u32 1.1754944e-38, %v4724_v20  ;;  %vm4723_vm0 = vcmp.eq.f32.partialorder %v4722_v28, 8.507059e+37 }
 0x4a4   :  { %v4701_v31 = vmul.f32 %v7011_v44, %v4700_v37  ;;  %v4633_v63 = vadd.f32 %v8625_v1, %v4609_v23 }
 0x4a6   :  { %v7013_v11 = vpop.eup %7012  ;;  %v4702_v59 = vadd.f32 %v7011_v44, %v4701_v31  ;;  %v6538_v48 = vmul.f32 -1.442695, %v4633_v63 }
 0x4a7   :  { %v7015_v16 = vpop.eup %7014  ;;  %v4664_v61 = vadd.f32 1.0, %v7013_v11 }
 0x4a8   :  { %v4706_v51 = vsel %vm4705_vm11, %v7011_v44, %v4702_v59  ;;  %v4714_v33 = vmul.f32 %v7015_v16, %v4663_v41  ;;  %7016 = vpow2.f32 %v6538_v48  ;;  %vm4719_vm13 = vweird.f32 %v7015_v16 }
 0x4a9   :  { %v4711_v56 = vsel %vm4708_vm12, %v4710_v32, %v4706_v51  ;;  %7018 = vrcp.f32 %v4664_v61  ;;  %vm4720_vm15 = vmor %vm4718_vm14, %vm4719_vm13  ;;  %v4739_v4 = vand.u32 2147483648, %v4664_v61  ;;  %v4737_v17 = vand.u32 2147483647, %v4664_v61 }
 0x4aa   :  { %4791 = vst.msk [vmem:[%s8674_s7 + $0x10] sm:$0xff] %vm4788_vm2, %v4711_v56  ;;  %v4715_v22 = vsub.f32 1.0, %v4714_v33  ;;  %vm4733_vm3 = vweird.f32 %v4664_v61 }
 0x4ab   :  { %v4616_v36 = vpop.xlane.xlu0 %4615  ;;  %v4740_v57 = vor.u32 1.1754944e-38, %v4739_v4  ;;  %vm4738_vm5 = vcmp.eq.f32.partialorder %v4737_v17, 8.507059e+37 }
 0x4ac   :  { %v4716_v12 = vmul.f32 %v7015_v16, %v4715_v22  ;;  %v4634_v5 = vadd.f32 %v8625_v1, %v4616_v36 }
 0x4ae   :  { %v7017_v30 = vpop.eup %7016  ;;  %v4717_v42 = vadd.f32 %v7015_v16, %v4716_v12  ;;  %v6539_v50 = vmul.f32 -1.442695, %v4634_v5 }
 0x4af   :  { %v7019_v60 = vpop.eup %7018  ;;  %v4665_v34 = vadd.f32 1.0, %v7017_v30 }
 0x4b0   :  { %v4721_v62 = vsel %vm4720_vm15, %v7015_v16, %v4717_v42  ;;  %v4729_v0 = vmul.f32 %v7019_v60, %v4664_v61  ;;  %7020 = vpow2.f32 %v6539_v50  ;;  %vm4734_vm1 = vweird.f32 %v7019_v60 }
 0x4b1   :  { %v4726_v46 = vsel %vm4723_vm0, %v4725_v14, %v4721_v62  ;;  %7022 = vrcp.f32 %v4665_v34  ;;  %vm4735_vm4 = vmor %vm4733_vm3, %vm4734_vm1  ;;  %v4754_v26 = vand.u32 2147483648, %v4665_v34  ;;  %v4752_v52 = vand.u32 2147483647, %v4665_v34 }
 0x4b2   :  { %4792 = vst.msk [vmem:[%s8674_s7 + $0x18] sm:$0xff] %vm4788_vm2, %v4726_v46  ;;  %v4730_v43 = vsub.f32 1.0, %v4729_v0  ;;  %vm4748_vm7 = vweird.f32 %v4665_v34 }
 0x4b3   :  { %v4623_v54 = vpop.xlane.xlu1 %4622  ;;  %v4755_v47 = vor.u32 1.1754944e-38, %v4754_v26  ;;  %vm4753_vm9 = vcmp.eq.f32.partialorder %v4752_v52, 8.507059e+37 }
 0x4b4   :  { %v4731_v2 = vmul.f32 %v7019_v60, %v4730_v43  ;;  %v4635_v55 = vadd.f32 %v8625_v1, %v4623_v54 }
 0x4b6   :  { %v7021_v10 = vpop.eup %7020  ;;  %v4732_v45 = vadd.f32 %v7019_v60, %v4731_v2  ;;  %v6540_v24 = vmul.f32 -1.442695, %v4635_v55 }
 0x4b7   :  { %v7023_v3 = vpop.eup %7022  ;;  %v4666_v35 = vadd.f32 1.0, %v7021_v10 }
 0x4b8   :  { %v4736_v58 = vsel %vm4735_vm4, %v7019_v60, %v4732_v45  ;;  %v4744_v7 = vmul.f32 %v7023_v3, %v4665_v34  ;;  %7024 = vpow2.f32 %v6540_v24  ;;  %vm4749_vm6 = vweird.f32 %v7023_v3 }
 0x4b9   :  { %v4741_v38 = vsel %vm4738_vm5, %v4740_v57, %v4736_v58  ;;  %7026 = vrcp.f32 %v4666_v35  ;;  %vm4750_vm8 = vmor %vm4748_vm7, %vm4749_vm6  ;;  %v4769_v44 = vand.u32 2147483648, %v4666_v35  ;;  %v4767_v41 = vand.u32 2147483647, %v4666_v35 }
 0x4ba   :  { %4793 = vst.msk [vmem:[%s8674_s7 + $0x20] sm:$0xff] %vm4788_vm2, %v4741_v38  ;;  %v4745_v1 = vsub.f32 1.0, %v4744_v7  ;;  %vm4763_vm11 = vweird.f32 %v4666_v35 }
 0x4bb   :  { %v4770_v27 = vor.u32 1.1754944e-38, %v4769_v44  ;;  %vm4768_vm13 = vcmp.eq.f32.partialorder %v4767_v41, 8.507059e+37 }
 0x4bc   :  { %v4746_v49 = vmul.f32 %v7023_v3, %v4745_v1 }
 0x4be   :  { %v7025_v6 = vpop.eup %7024  ;;  %v4747_v8 = vadd.f32 %v7023_v3, %v4746_v49 }
 0x4bf   :  { %v7027_v13 = vpop.eup %7026  ;;  %v4667_v9 = vadd.f32 1.0, %v7025_v6 }
 0x4c0   :  { %v4751_v21 = vsel %vm4750_vm8, %v7023_v3, %v4747_v8  ;;  %v4759_v25 = vmul.f32 %v7027_v13, %v4666_v35  ;;  %vm4764_vm10 = vweird.f32 %v7027_v13 }
 0x4c1   :  { %v4756_v39 = vsel %vm4753_vm9, %v4755_v47, %v4751_v21  ;;  %7028 = vrcp.f32 %v4667_v9  ;;  %vm4765_vm12 = vmor %vm4763_vm11, %vm4764_vm10  ;;  %v4784_v15 = vand.u32 2147483648, %v4667_v9  ;;  %v4782_v11 = vand.u32 2147483647, %v4667_v9 }
 0x4c2   :  { %4794 = vst.msk [vmem:[%s8674_s7 + $0x28] sm:$0xff] %vm4788_vm2, %v4756_v39  ;;  %v4760_v18 = vsub.f32 1.0, %v4759_v25  ;;  %vm4778_vm15 = vweird.f32 %v4667_v9 }
 0x4c3   :  { %v4785_v48 = vor.u32 1.1754944e-38, %v4784_v15  ;;  %vm4783_vm1 = vcmp.eq.f32.partialorder %v4782_v11, 8.507059e+37 }
 0x4c4   :  { %v4761_v53 = vmul.f32 %v7027_v13, %v4760_v18 }
 0x4c6   :  { %v4762_v29 = vadd.f32 %v7027_v13, %v4761_v53 }
 0x4c7   :  { %v7029_v40 = vpop.eup %7028 }
 0x4c8   :  { %v4766_v37 = vsel %vm4765_vm12, %v7027_v13, %v4762_v29  ;;  %v4774_v19 = vmul.f32 %v7029_v40, %v4667_v9  ;;  %vm4779_vm14 = vweird.f32 %v7029_v40 }
 0x4c9   :  { %v4771_v23 = vsel %vm4768_vm13, %v4770_v27, %v4766_v37  ;;  %vm4780_vm0 = vmor %vm4778_vm15, %vm4779_vm14 }
 0x4ca   :  { %4795 = vst.msk [vmem:[%s8674_s7 + $0x30] sm:$0xff] %vm4788_vm2, %v4771_v23  ;;  %v4775_v31 = vsub.f32 1.0, %v4774_v19 }
 0x4cc   :  { %v4776_v63 = vmul.f32 %v7029_v40, %v4775_v31 }
 0x4ce   :  { %v4777_v59 = vadd.f32 %v7029_v40, %v4776_v63 }
 0x4d0   :  { %v4781_v16 = vsel %vm4780_vm0, %v7029_v40, %v4777_v59 }
 0x4d1   :  { %v4786_v32 = vsel %vm4783_vm1, %v4785_v48, %v4781_v16 }
 0x4d2   :  { %4796 = vst.msk [vmem:[%s8674_s7 + $0x38] sm:$0xff] %vm4788_vm2, %v4786_v32 }
 0x4d3   :  { %4801 = vsyncpa [#allocation4], 1 }
 0x4d4   :  { %4802 = vsyncpa [#allocation6], 1 }
 0x4d5   :  { %4803 = vsyncpa [#allocation9], 1 }
 0x4d6   :  { %4804 = vsyncpa [#allocation12], 1 }

</bundles_post_ra>
